<compile_context>
chip_gen: v7x
topology: tpu7x:2x2x1
jax: 0.10.0
libtpu: 0.0.40
codegen_flags: <defaults>
</compile_context>

<pallas_src>
import numpy as np
import jax
import jax.numpy as jnp
from jax.experimental import pallas as pl
from jax.experimental.pallas import tpu as pltpu


# ----------------------------------------------------------------------------
# ConvTranspose3d -> dense matrix (parameter-setup glue; spatial extents are tiny)
# ----------------------------------------------------------------------------
def convtranspose3d_as_matrix(w, bias, in_spatial, stride, padding):
    """Return (M, bias_flat, out_spatial) s.t. flatten_NCDHW(convT(x)) == flatten_NCDHW(x) @ M + bias_flat."""
    w = np.asarray(w, dtype=np.float32)       # (Cin, Cout, KD, KH, KW)  (PyTorch layout)
    bias = np.asarray(bias, dtype=np.float32)
    Cin, Cout, KD, KH, KW = w.shape
    ID, IH, IW = in_spatial
    SD, SH, SW = stride
    PD, PH, PW = padding
    OD = (ID - 1) * SD - 2 * PD + KD
    OH = (IH - 1) * SH - 2 * PH + KH
    OW = (IW - 1) * SW - 2 * PW + KW
    ispat, ospat = ID * IH * IW, OD * OH * OW
    M = np.zeros((Cin * ispat, Cout * ospat), dtype=np.float32)
    rows_c = np.arange(Cin) * ispat
    cols_c = np.arange(Cout) * ospat
    for idd in range(ID):
        for ih in range(IH):
            for iw in range(IW):
                in_off = (idd * IH + ih) * IW + iw
                for kd in range(KD):
                    od = idd * SD - PD + kd
                    if od < 0 or od >= OD:
                        continue
                    for kh in range(KH):
                        oh = ih * SH - PH + kh
                        if oh < 0 or oh >= OH:
                            continue
                        for kw in range(KW):
                            ow = iw * SW - PW + kw
                            if ow < 0 or ow >= OW:
                                continue
                            out_off = (od * OH + oh) * OW + ow
                            M[np.ix_(rows_c + in_off, cols_c + out_off)] += w[:, :, kd, kh, kw]
    bias_flat = np.repeat(bias, ospat).astype(np.float32)
    return M, bias_flat, (OD, OH, OW)


# Layer output widths (also the widths of the consolidated bias buffer). All are
# multiples of 128, so every static bias slice inside the kernel is lane-aligned.
_BIAS_WIDTHS = (1024, 256, 1024, 768, 768, 128)
_BIAS_OFFS = tuple(int(x) for x in np.cumsum((0,) + _BIAS_WIDTHS[:-1]))
_BIAS_TOTAL = int(sum(_BIAS_WIDTHS))          # 3968 = 31 * 128


# ----------------------------------------------------------------------------
# Parameter construction (deterministic, mirrors weight_init(mean=0, std=0.02))
# ----------------------------------------------------------------------------
def init_generator5_params(key, noize=12):
    """Returns (ws, bias):
         ws   = [fc1, fc2, m1, m2, m3, m4]  bf16 weight matrices (last convT kept as ONE matrix)
         bias = (1, 3968) float32, all layer biases concatenated (128-aligned offsets)
    """
    def nrm(k, shape):
        return np.asarray(0.02 * jax.random.normal(k, shape, dtype=jnp.float32))

    keys = jax.random.split(key, 6)
    fc1_w = nrm(keys[0], (noize, 1024)); fc1_b = np.zeros((1024,), np.float32)
    fc2_w = nrm(keys[1], (1024, 256));   fc2_b = np.zeros((256,), np.float32)
    c1_w = nrm(keys[2], (256, 128, 4, 4, 4)); c1_b = np.zeros((128,), np.float32)
    c2_w = nrm(keys[3], (128, 64, 4, 4, 4));  c2_b = np.zeros((64,), np.float32)
    c3_w = nrm(keys[4], (64, 32, 4, 4, 4));   c3_b = np.zeros((32,), np.float32)
    c4_w = nrm(keys[5], (32, 2, 4, 4, 4));    c4_b = np.zeros((2,), np.float32)

    m1, b1, s1 = convtranspose3d_as_matrix(c1_w, c1_b, (1, 1, 1), (2, 2, 2), (1, 1, 1))  # -> (2,2,2)
    m2, b2, s2 = convtranspose3d_as_matrix(c2_w, c2_b, s1, (2, 2, 1), (2, 2, 1))          # -> (2,2,3)
    m3, b3, s3 = convtranspose3d_as_matrix(c3_w, c3_b, s2, (1, 2, 1), (1, 1, 2))          # -> (3,4,2)
    m4, b4, s4 = convtranspose3d_as_matrix(c4_w, c4_b, s3, (1, 2, 2), (1, 1, 2))          # -> (4,8,2)
    assert s4 == (4, 8, 2) and 2 * int(np.prod(s4)) == 128

    ws_np = [fc1_w, fc2_w, m1, m2, m3, m4]
    bs_np = [fc1_b, fc2_b, b1, b2, b3, b4]
    assert tuple(b.shape[0] for b in bs_np) == _BIAS_WIDTHS

    # Weight-DMA bound at small B -> bf16 weights (f32 MXU accumulation in-kernel).
    # TODO(synk): per-generation int8 (v5e/v6e) / fp8-e4m3 (v7x) weight quantization with
    #             per-output-channel scales would halve the weight stream again.
    ws = [jnp.asarray(w, dtype=jnp.bfloat16) for w in ws_np]
    bias = jnp.asarray(np.concatenate(bs_np)[None, :], dtype=jnp.float32)   # (1, 3968)
    return ws, bias


# ----------------------------------------------------------------------------
# Fused Pallas kernel: 6 GEMM layers + lane-dense delta GEMMs, all VMEM-resident
# ----------------------------------------------------------------------------
def _fused_generator_kernel(noise_ref,
                            w1, w2, w3, w4, w5, w6,
                            bias_ref, bpT_ref,
                            out_ref):
    def dense(x, w_ref, layer, leaky):
        off, n = _BIAS_OFFS[layer], _BIAS_WIDTHS[layer]
        y = jnp.dot(x.astype(jnp.bfloat16), w_ref[...],
                    preferred_element_type=jnp.float32)        # MXU, f32 accumulation
        y = y + bias_ref[:, off:off + n]                        # (1, N) broadcasts over batch rows
        if leaky:
            y = jnp.where(y > 0, y, 0.01 * y)                   # nn.LeakyReLU default slope
        return y

    x = noise_ref[...]                                          # (bt, noize) f32
    x = dense(x, w1, 0, True)                                   # fc1      -> (bt, 1024)
    x = dense(x, w2, 1, True)                                   # fc2      -> (bt, 256)
    x = dense(x, w3, 2, True)                                   # convT1   -> (bt, 1024)
    x = dense(x, w4, 3, True)                                   # convT2   -> (bt, 768)
    x = dense(x, w5, 4, True)                                   # convT3   -> (bt, 768)
    deform = dense(x, w6, 5, False)                             # convT4   -> (bt, 128)
    # channel-major flatten: cols [0:64] = channel 0 (y deform), [64:128] = channel 1 (z deform)

    bpT = bpT_ref[...]                                          # (64, Np_pad) bf16, lane-dense

    # delta_c[b, n] = sum_p deform_ch_c[b, p] * base_para[n, p]  -- lane-dense (bt, Np_pad) GEMMs
    out_ref[0] = jnp.dot(deform[:, :64].astype(jnp.bfloat16), bpT,
                         preferred_element_type=jnp.float32)    # y deltas
    out_ref[1] = jnp.dot(deform[:, 64:].astype(jnp.bfloat16), bpT,
                         preferred_element_type=jnp.float32)    # z deltas


def _pick_batch_tile(B):
    """Batch tile: whole batch for small B; otherwise a divisor tile so activations stay small
    and v7x's two cores can split the (parallel) batch axis."""
    if B <= 128:
        return B
    for bt in (128, 64, 32, 16, 8):
        if B % bt == 0:
            return bt
    return B


def _fused_forward(noise, ws, bias, bpT):
    B, nz = noise.shape
    np_pad = bpT.shape[1]
    bt = _pick_batch_tile(B)
    grid = (B // bt,)

    def full_spec(a):
        return pl.BlockSpec(a.shape, lambda i: (0, 0))

    in_specs = [pl.BlockSpec((bt, nz), lambda i: (i, 0))]       # noise: tiled over batch
    in_specs += [full_spec(w) for w in ws]                      # weights: resident (same block each step)
    in_specs += [full_spec(bias), full_spec(bpT)]

    out_specs = pl.BlockSpec((2, bt, np_pad), lambda i: (0, i, 0))

    flops = 2 * 2 * B * 64 * np_pad                             # the two delta GEMMs
    for w in ws:
        flops += 2 * B * w.shape[0] * w.shape[1]
    bytes_accessed = (B * nz * 4 + bias.size * 4 + bpT.size * 2
                      + sum(w.size * 2 for w in ws)
                      + 2 * B * np_pad * 4)

    return pl.pallas_call(
        _fused_generator_kernel,
        grid=grid,
        out_shape=jax.ShapeDtypeStruct((2, B, np_pad), jnp.float32),
        in_specs=in_specs,
        out_specs=out_specs,
        compiler_params=pltpu.CompilerParams(
            # batch tiles are independent -> megacore-shardable on v7x
            dimension_semantics=("parallel",),
            # ~4.3 MB of resident operands (x2 pipeline buffers) + activations: explicit limit
            # keeps v5e's 16 MiB default scoped VMEM from being the tightest budget.
            vmem_limit_bytes=32 * 1024 * 1024,
        ),
        cost_estimate=pl.CostEstimate(
            flops=int(flops), transcendentals=0, bytes_accessed=int(bytes_accessed)),
        # TODO(synk): cross-pallas_call weight prefetch (P10: pl.ANY weight refs + DMA-semaphore
        #             future started before the noise is even produced) would hide the remaining
        #             weight-DMA latency at B=2; omitted here to keep a single robust launch.
    )(noise, *ws, bias, bpT)


# ----------------------------------------------------------------------------
# Forward pass (matches generator5.forward(input, base_point, base_para, shape))
# ----------------------------------------------------------------------------
def generator5_forward(params, noise, base_point, base_para, shape=(18, 68)):
    ws, bias = params
    noise = noise.astype(jnp.float32)
    B = noise.shape[0]
    npts = base_para.shape[0]
    assert npts == shape[0] * shape[1]
    np_pad = ((npts + 127) // 128) * 128                        # 1224 -> 1280 (full MXU/lane tiles)

    # Constant-foldable glue (independent of the noise):
    #   const_pts = base_para @ base_point  (undeformed points), f32
    #   bpT       = base_para^T padded to Np_pad, bf16 (lane-dense operand for the delta GEMMs)
    const_pts = jnp.dot(base_para.astype(jnp.float32), base_point.astype(jnp.float32),
                        precision=jax.lax.Precision.HIGHEST)    # (Np, 3)
    bpT = jnp.pad(base_para.T.astype(jnp.float32), ((0, 0), (0, np_pad - npts))
                  ).astype(jnp.bfloat16)                        # (64, Np_pad)

    deltas = _fused_forward(noise, ws, bias, bpT)               # (2, B, Np_pad) lane-dense
    d = jnp.transpose(deltas[:, :, :npts], (1, 2, 0))           # (B, Np, 2): [...,0]=y, [...,1]=z  (~29 KB)

    out = jnp.broadcast_to(const_pts[None], (B, npts, 3))
    out = out.at[:, :, 1:3].add(d)                              # base_point[:, :, [1,2]] += deform ; bmm
    return out.reshape(B, shape[0], shape[1], 3)


# ----------------------------------------------------------------------------
# Pure-XLA f32 reference (original torch op ordering) for a sanity check
# ----------------------------------------------------------------------------
def reference_forward(params, noise, base_point, base_para, shape=(18, 68)):
    ws, bias = params
    mats = [w.astype(jnp.float32) for w in ws]
    bias_row = bias.astype(jnp.float32)[0]
    leaky = [True, True, True, True, True, False]

    x = noise.astype(jnp.float32)
    for w, off, n, lk in zip(mats, _BIAS_OFFS, _BIAS_WIDTHS, leaky):
        x = jnp.dot(x, w, precision=jax.lax.Precision.HIGHEST) + bias_row[off:off + n]
        if lk:
            x = jnp.where(x > 0, x, 0.01 * x)

    B = noise.shape[0]
    x = x.reshape(B, 2, 64).transpose(0, 2, 1)             # == .view(b,2,64).transpose(1,2) -> (B,64,2)
    pts = jnp.broadcast_to(base_point[None], (B,) + base_point.shape)
    pts = pts.at[:, :, 1:3].add(x)
    out = jnp.einsum('nk,bkc->bnc', base_para, pts, precision=jax.lax.Precision.HIGHEST)
    return out.reshape(B, shape[0], shape[1], 3)


if __name__ == "__main__":
    key = jax.random.PRNGKey(0)
    k_par, k_noise, k_bp, k_para = jax.random.split(key, 4)

    B, NOIZE = 2, 12
    params = init_generator5_params(k_par, noize=NOIZE)

    noise = jax.random.normal(k_noise, (B, NOIZE), dtype=jnp.float32)
    base_point = jax.random.normal(k_bp, (64, 3), dtype=jnp.float32)
    base_para = jax.random.normal(k_para, (18 * 68, 64), dtype=jnp.float32)

    fwd = jax.jit(lambda n, bp, bpar: generator5_forward(params, n, bp, bpar))
    out = jax.block_until_ready(fwd(noise, base_point, base_para))

    assert out.shape == (B, 18, 68, 3), out.shape
    assert out.dtype == jnp.float32

    ref = jax.jit(lambda n, bp, bpar: reference_forward(params, n, bp, bpar))(
        noise, base_point, base_para)
    ref = jax.block_until_ready(ref)
    np.testing.assert_allclose(np.asarray(out), np.asarray(ref), rtol=2e-2, atol=2e-2)

    print("KERNEL_OK")
</pallas_src>

<mosaic_0001>
module attributes {stable_mosaic.version = 11 : i64} {
  func.func @_fused_generator_kernel(%arg0: i32, %arg1: memref<2x12xf32, #tpu.memory_space<vmem>>, %arg2: memref<12x1024xbf16, #tpu.memory_space<vmem>>, %arg3: memref<1024x256xbf16, #tpu.memory_space<vmem>>, %arg4: memref<256x1024xbf16, #tpu.memory_space<vmem>>, %arg5: memref<1024x768xbf16, #tpu.memory_space<vmem>>, %arg6: memref<768x768xbf16, #tpu.memory_space<vmem>>, %arg7: memref<768x128xbf16, #tpu.memory_space<vmem>>, %arg8: memref<1x3968xf32, #tpu.memory_space<vmem>>, %arg9: memref<64x1280xbf16, #tpu.memory_space<vmem>>, %arg10: memref<2x2x1280xf32, #tpu.memory_space<vmem>>) attributes {dimension_semantics = [#tpu.dimension_semantics<parallel>], iteration_bounds = array<i64: 1>, scalar_prefetch = 0 : i64, scratch_operands = 0 : i64, tpu.core_type = #tpu.core_type<tc>, window_params = [{transform_indices = @transform_0, window_bounds = array<i64: 2, 12>}, {pipeline_mode = #tpu.pipeline_mode<synchronous>, transform_indices = @transform_1, window_bounds = array<i64: 12, 1024>}, {pipeline_mode = #tpu.pipeline_mode<synchronous>, transform_indices = @transform_2, window_bounds = array<i64: 1024, 256>}, {pipeline_mode = #tpu.pipeline_mode<synchronous>, transform_indices = @transform_3, window_bounds = array<i64: 256, 1024>}, {pipeline_mode = #tpu.pipeline_mode<synchronous>, transform_indices = @transform_4, window_bounds = array<i64: 1024, 768>}, {pipeline_mode = #tpu.pipeline_mode<synchronous>, transform_indices = @transform_5, window_bounds = array<i64: 768, 768>}, {pipeline_mode = #tpu.pipeline_mode<synchronous>, transform_indices = @transform_6, window_bounds = array<i64: 768, 128>}, {pipeline_mode = #tpu.pipeline_mode<synchronous>, transform_indices = @transform_7, window_bounds = array<i64: 1, 3968>}, {pipeline_mode = #tpu.pipeline_mode<synchronous>, transform_indices = @transform_8, window_bounds = array<i64: 64, 1280>}, {transform_indices = @transform_9, window_bounds = array<i64: 2, 2, 1280>}]} {
    %c0 = arith.constant 0 : index
    %c0_0 = arith.constant 0 : index
    %0 = vector.load %arg1[%c0, %c0_0] : memref<2x12xf32, #tpu.memory_space<vmem>>, vector<2x12xf32>
    %1 = arith.truncf %0 : vector<2x12xf32> to vector<2x12xbf16>
    %c0_1 = arith.constant 0 : index
    %c0_2 = arith.constant 0 : index
    %2 = vector.load %arg2[%c0_1, %c0_2] : memref<12x1024xbf16, #tpu.memory_space<vmem>>, vector<12x1024xbf16>
    %cst = arith.constant dense<0.000000e+00> : vector<2x1024xf32>
    %3 = tpu.matmul %1, %2, %cst {dimension_numbers = #tpu.dot_dimension_numbers<[1], [0], [0], [1], [0, 0, 1, 1], [], []>} : vector<2x12xbf16>, vector<12x1024xbf16>, vector<2x1024xf32> -> vector<2x1024xf32>
    %c0_3 = arith.constant 0 : index
    %c0_4 = arith.constant 0 : index
    %4 = vector.load %arg8[%c0_3, %c0_4] : memref<1x3968xf32, #tpu.memory_space<vmem>>, vector<1x1024xf32>
    %5 = vector.broadcast %4 : vector<1x1024xf32> to vector<2x1024xf32>
    %6 = arith.addf %3, %5 : vector<2x1024xf32>
    %cst_5 = arith.constant 0.000000e+00 : f32
    %7 = vector.broadcast %cst_5 : f32 to vector<2x1024xf32>
    %8 = arith.cmpf ogt, %6, %7 : vector<2x1024xf32>
    %cst_6 = arith.constant 0.00999999977 : f32
    %9 = vector.broadcast %cst_6 : f32 to vector<2x1024xf32>
    %10 = arith.mulf %9, %6 : vector<2x1024xf32>
    %11 = arith.select %8, %6, %10 : vector<2x1024xi1>, vector<2x1024xf32>
    %12 = arith.truncf %11 : vector<2x1024xf32> to vector<2x1024xbf16>
    %c0_7 = arith.constant 0 : index
    %c0_8 = arith.constant 0 : index
    %13 = vector.load %arg3[%c0_7, %c0_8] : memref<1024x256xbf16, #tpu.memory_space<vmem>>, vector<1024x256xbf16>
    %cst_9 = arith.constant dense<0.000000e+00> : vector<2x256xf32>
    %14 = tpu.matmul %12, %13, %cst_9 {dimension_numbers = #tpu.dot_dimension_numbers<[1], [0], [0], [1], [0, 0, 1, 1], [], []>} : vector<2x1024xbf16>, vector<1024x256xbf16>, vector<2x256xf32> -> vector<2x256xf32>
    %c0_10 = arith.constant 0 : index
    %c1024 = arith.constant 1024 : index
    %15 = vector.load %arg8[%c0_10, %c1024] : memref<1x3968xf32, #tpu.memory_space<vmem>>, vector<1x256xf32>
    %16 = vector.broadcast %15 : vector<1x256xf32> to vector<2x256xf32>
    %17 = arith.addf %14, %16 : vector<2x256xf32>
    %cst_11 = arith.constant 0.000000e+00 : f32
    %18 = vector.broadcast %cst_11 : f32 to vector<2x256xf32>
    %19 = arith.cmpf ogt, %17, %18 : vector<2x256xf32>
    %cst_12 = arith.constant 0.00999999977 : f32
    %20 = vector.broadcast %cst_12 : f32 to vector<2x256xf32>
    %21 = arith.mulf %20, %17 : vector<2x256xf32>
    %22 = arith.select %19, %17, %21 : vector<2x256xi1>, vector<2x256xf32>
    %23 = arith.truncf %22 : vector<2x256xf32> to vector<2x256xbf16>
    %c0_13 = arith.constant 0 : index
    %c0_14 = arith.constant 0 : index
    %24 = vector.load %arg4[%c0_13, %c0_14] : memref<256x1024xbf16, #tpu.memory_space<vmem>>, vector<256x1024xbf16>
    %cst_15 = arith.constant dense<0.000000e+00> : vector<2x1024xf32>
    %25 = tpu.matmul %23, %24, %cst_15 {dimension_numbers = #tpu.dot_dimension_numbers<[1], [0], [0], [1], [0, 0, 1, 1], [], []>} : vector<2x256xbf16>, vector<256x1024xbf16>, vector<2x1024xf32> -> vector<2x1024xf32>
    %c0_16 = arith.constant 0 : index
    %c1280 = arith.constant 1280 : index
    %26 = vector.load %arg8[%c0_16, %c1280] : memref<1x3968xf32, #tpu.memory_space<vmem>>, vector<1x1024xf32>
    %27 = vector.broadcast %26 : vector<1x1024xf32> to vector<2x1024xf32>
    %28 = arith.addf %25, %27 : vector<2x1024xf32>
    %cst_17 = arith.constant 0.000000e+00 : f32
    %29 = vector.broadcast %cst_17 : f32 to vector<2x1024xf32>
    %30 = arith.cmpf ogt, %28, %29 : vector<2x1024xf32>
    %cst_18 = arith.constant 0.00999999977 : f32
    %31 = vector.broadcast %cst_18 : f32 to vector<2x1024xf32>
    %32 = arith.mulf %31, %28 : vector<2x1024xf32>
    %33 = arith.select %30, %28, %32 : vector<2x1024xi1>, vector<2x1024xf32>
    %34 = arith.truncf %33 : vector<2x1024xf32> to vector<2x1024xbf16>
    %c0_19 = arith.constant 0 : index
    %c0_20 = arith.constant 0 : index
    %35 = vector.load %arg5[%c0_19, %c0_20] : memref<1024x768xbf16, #tpu.memory_space<vmem>>, vector<1024x768xbf16>
    %cst_21 = arith.constant dense<0.000000e+00> : vector<2x768xf32>
    %36 = tpu.matmul %34, %35, %cst_21 {dimension_numbers = #tpu.dot_dimension_numbers<[1], [0], [0], [1], [0, 0, 1, 1], [], []>} : vector<2x1024xbf16>, vector<1024x768xbf16>, vector<2x768xf32> -> vector<2x768xf32>
    %c0_22 = arith.constant 0 : index
    %c2304 = arith.constant 2304 : index
    %37 = vector.load %arg8[%c0_22, %c2304] : memref<1x3968xf32, #tpu.memory_space<vmem>>, vector<1x768xf32>
    %38 = vector.broadcast %37 : vector<1x768xf32> to vector<2x768xf32>
    %39 = arith.addf %36, %38 : vector<2x768xf32>
    %cst_23 = arith.constant 0.000000e+00 : f32
    %40 = vector.broadcast %cst_23 : f32 to vector<2x768xf32>
    %41 = arith.cmpf ogt, %39, %40 : vector<2x768xf32>
    %cst_24 = arith.constant 0.00999999977 : f32
    %42 = vector.broadcast %cst_24 : f32 to vector<2x768xf32>
    %43 = arith.mulf %42, %39 : vector<2x768xf32>
    %44 = arith.select %41, %39, %43 : vector<2x768xi1>, vector<2x768xf32>
    %45 = arith.truncf %44 : vector<2x768xf32> to vector<2x768xbf16>
    %c0_25 = arith.constant 0 : index
    %c0_26 = arith.constant 0 : index
    %46 = vector.load %arg6[%c0_25, %c0_26] : memref<768x768xbf16, #tpu.memory_space<vmem>>, vector<768x768xbf16>
    %cst_27 = arith.constant dense<0.000000e+00> : vector<2x768xf32>
    %47 = tpu.matmul %45, %46, %cst_27 {dimension_numbers = #tpu.dot_dimension_numbers<[1], [0], [0], [1], [0, 0, 1, 1], [], []>} : vector<2x768xbf16>, vector<768x768xbf16>, vector<2x768xf32> -> vector<2x768xf32>
    %c0_28 = arith.constant 0 : index
    %c3072 = arith.constant 3072 : index
    %48 = vector.load %arg8[%c0_28, %c3072] : memref<1x3968xf32, #tpu.memory_space<vmem>>, vector<1x768xf32>
    %49 = vector.broadcast %48 : vector<1x768xf32> to vector<2x768xf32>
    %50 = arith.addf %47, %49 : vector<2x768xf32>
    %cst_29 = arith.constant 0.000000e+00 : f32
    %51 = vector.broadcast %cst_29 : f32 to vector<2x768xf32>
    %52 = arith.cmpf ogt, %50, %51 : vector<2x768xf32>
    %cst_30 = arith.constant 0.00999999977 : f32
    %53 = vector.broadcast %cst_30 : f32 to vector<2x768xf32>
    %54 = arith.mulf %53, %50 : vector<2x768xf32>
    %55 = arith.select %52, %50, %54 : vector<2x768xi1>, vector<2x768xf32>
    %56 = arith.truncf %55 : vector<2x768xf32> to vector<2x768xbf16>
    %c0_31 = arith.constant 0 : index
    %c0_32 = arith.constant 0 : index
    %57 = vector.load %arg7[%c0_31, %c0_32] : memref<768x128xbf16, #tpu.memory_space<vmem>>, vector<768x128xbf16>
    %cst_33 = arith.constant dense<0.000000e+00> : vector<2x128xf32>
    %58 = tpu.matmul %56, %57, %cst_33 {dimension_numbers = #tpu.dot_dimension_numbers<[1], [0], [0], [1], [0, 0, 1, 1], [], []>} : vector<2x768xbf16>, vector<768x128xbf16>, vector<2x128xf32> -> vector<2x128xf32>
    %c0_34 = arith.constant 0 : index
    %c3840 = arith.constant 3840 : index
    %59 = vector.load %arg8[%c0_34, %c3840] : memref<1x3968xf32, #tpu.memory_space<vmem>>, vector<1x128xf32>
    %60 = vector.broadcast %59 : vector<1x128xf32> to vector<2x128xf32>
    %61 = arith.addf %58, %60 : vector<2x128xf32>
    %c0_35 = arith.constant 0 : index
    %c0_36 = arith.constant 0 : index
    %62 = vector.load %arg9[%c0_35, %c0_36] : memref<64x1280xbf16, #tpu.memory_space<vmem>>, vector<64x1280xbf16>
    %63 = vector.extract_strided_slice %61 {offsets = [0, 0], sizes = [2, 64], strides = [1, 1]} : vector<2x128xf32> to vector<2x64xf32>
    %64 = arith.truncf %63 : vector<2x64xf32> to vector<2x64xbf16>
    %cst_37 = arith.constant dense<0.000000e+00> : vector<2x1280xf32>
    %65 = tpu.matmul %64, %62, %cst_37 {dimension_numbers = #tpu.dot_dimension_numbers<[1], [0], [0], [1], [0, 0, 1, 1], [], []>} : vector<2x64xbf16>, vector<64x1280xbf16>, vector<2x1280xf32> -> vector<2x1280xf32>
    %c0_38 = arith.constant 0 : index
    %c0_39 = arith.constant 0 : index
    %c0_40 = arith.constant 0 : index
    %66 = vector.load %arg10[%c0_38, %c0_39, %c0_40] : memref<2x2x1280xf32, #tpu.memory_space<vmem>>, vector<1x2x1280xf32>
    %67 = vector.shape_cast %66 : vector<1x2x1280xf32> to vector<2x1280xf32>
    %68 = vector.shape_cast %65 : vector<2x1280xf32> to vector<1x2x1280xf32>
    tpu.vector_store %arg10[%c0_38, %c0_39, %c0_40], %68 {strides = array<i32>} : memref<2x2x1280xf32, #tpu.memory_space<vmem>>, vector<1x2x1280xf32>,
    %69 = vector.extract_strided_slice %61 {offsets = [0, 64], sizes = [2, 64], strides = [1, 1]} : vector<2x128xf32> to vector<2x64xf32>
    %70 = arith.truncf %69 : vector<2x64xf32> to vector<2x64xbf16>
    %cst_41 = arith.constant dense<0.000000e+00> : vector<2x1280xf32>
    %71 = tpu.matmul %70, %62, %cst_41 {dimension_numbers = #tpu.dot_dimension_numbers<[1], [0], [0], [1], [0, 0, 1, 1], [], []>} : vector<2x64xbf16>, vector<64x1280xbf16>, vector<2x1280xf32> -> vector<2x1280xf32>
    %c1 = arith.constant 1 : index
    %c0_42 = arith.constant 0 : index
    %c0_43 = arith.constant 0 : index
    %72 = vector.load %arg10[%c1, %c0_42, %c0_43] : memref<2x2x1280xf32, #tpu.memory_space<vmem>>, vector<1x2x1280xf32>
    %73 = vector.shape_cast %72 : vector<1x2x1280xf32> to vector<2x1280xf32>
    %74 = vector.shape_cast %71 : vector<2x1280xf32> to vector<1x2x1280xf32>
    tpu.vector_store %arg10[%c1, %c0_42, %c0_43], %74 {strides = array<i32>} : memref<2x2x1280xf32, #tpu.memory_space<vmem>>, vector<1x2x1280xf32>,
    return
  }
  func.func @transform_0(%arg0: i32) -> (i32, i32) {
    %c0_i32 = arith.constant 0 : i32
    %c0_i32_0 = arith.constant 0 : i32
    return %arg0, %c0_i32 : i32, i32
  }
  func.func @transform_1(%arg0: i32) -> (i32, i32) {
    %c0_i32 = arith.constant 0 : i32
    %c0_i32_0 = arith.constant 0 : i32
    %c0_i32_1 = arith.constant 0 : i32
    return %c0_i32, %c0_i32_0 : i32, i32
  }
  func.func @transform_2(%arg0: i32) -> (i32, i32) {
    %c0_i32 = arith.constant 0 : i32
    %c0_i32_0 = arith.constant 0 : i32
    %c0_i32_1 = arith.constant 0 : i32
    return %c0_i32, %c0_i32_0 : i32, i32
  }
  func.func @transform_3(%arg0: i32) -> (i32, i32) {
    %c0_i32 = arith.constant 0 : i32
    %c0_i32_0 = arith.constant 0 : i32
    %c0_i32_1 = arith.constant 0 : i32
    return %c0_i32, %c0_i32_0 : i32, i32
  }
  func.func @transform_4(%arg0: i32) -> (i32, i32) {
    %c0_i32 = arith.constant 0 : i32
    %c0_i32_0 = arith.constant 0 : i32
    %c0_i32_1 = arith.constant 0 : i32
    return %c0_i32, %c0_i32_0 : i32, i32
  }
  func.func @transform_5(%arg0: i32) -> (i32, i32) {
    %c0_i32 = arith.constant 0 : i32
    %c0_i32_0 = arith.constant 0 : i32
    %c0_i32_1 = arith.constant 0 : i32
    return %c0_i32, %c0_i32_0 : i32, i32
  }
  func.func @transform_6(%arg0: i32) -> (i32, i32) {
    %c0_i32 = arith.constant 0 : i32
    %c0_i32_0 = arith.constant 0 : i32
    %c0_i32_1 = arith.constant 0 : i32
    return %c0_i32, %c0_i32_0 : i32, i32
  }
  func.func @transform_7(%arg0: i32) -> (i32, i32) {
    %c0_i32 = arith.constant 0 : i32
    %c0_i32_0 = arith.constant 0 : i32
    %c0_i32_1 = arith.constant 0 : i32
    return %c0_i32, %c0_i32_0 : i32, i32
  }
  func.func @transform_8(%arg0: i32) -> (i32, i32) {
    %c0_i32 = arith.constant 0 : i32
    %c0_i32_0 = arith.constant 0 : i32
    %c0_i32_1 = arith.constant 0 : i32
    return %c0_i32, %c0_i32_0 : i32, i32
  }
  func.func @transform_9(%arg0: i32) -> (i32, i32, i32) {
    %c0_i32 = arith.constant 0 : i32
    %c0_i32_0 = arith.constant 0 : i32
    %c0_i32_1 = arith.constant 0 : i32
    return %c0_i32, %arg0, %c0_i32_0 : i32, i32, i32
  }
}

</mosaic_0001>

<bundles_post_ra>
// kernel: _lambda_.1
= control target key start
LH: loop header
LB: loop body
LE: loop exit
PB: predicated region body
PF: predicated region fallthrough
CT: control target
= control target key end

     0   :  { %vm121_vm0 = vcmask 1045504   ;;  %v11109_v2 = vmov 0   ;;  %vm117_vm1 = vcmask 97280   ;;  %v45_v56 = vlaneseq  ;;  %s14603_s1 = inlined_call_operand.vmem [shape: bf16[12,1024], index: 1, kind: input, shape index: {}]   ;;  %s14604_s0 = inlined_call_operand.vmem [shape: f32[2,12], index: 0, kind: input, shape index: {}]   ;;  %s14605_s2 = inlined_call_operand.vmem [shape: bf16[1024,256], index: 2, kind: input, shape index: {}]   ;;  %s14606_s7 = inlined_call_operand.vmem [shape: f32[1,3968], index: 7, kind: input, shape index: {}]   ;;  %s14607_s3 = inlined_call_operand.vmem [shape: bf16[256,1024], index: 3, kind: input, shape index: {}]   ;;  %s14608_s4 = inlined_call_operand.vmem [shape: bf16[1024,768], index: 4, kind: input, shape index: {}]   ;;  %s14609_s5 = inlined_call_operand.vmem [shape: bf16[768,768], index: 5, kind: input, shape index: {}]   ;;  %s14610_s6 = inlined_call_operand.vmem [shape: bf16[768,128], index: 6, kind: input, shape index: {}]   ;;  %s14611_s8 = inlined_call_operand.vmem [shape: bf16[64,1280], index: 8, kind: input, shape index: {}]   ;;  %s14612_s9 = inlined_call_operand.vmem [shape: f32[2,2,1280], index: 9, kind: output, shape index: {}]  }
   0x1   :  { %v35_v0 = vld [vmem:[%s14603_s1] sm:$0xff]  ;;  %178 = vmatprep.mubr.bf16.mxu0 %v11109_v2  ;;  %219 = vmatprep.mubr.bf16.mxu1 %v11109_v2  ;;  %v36_v6 = vld [vmem:[%s14603_s1 + $0x8] sm:$0xff]  ;;  %v37_v8 = vld [vmem:[%s14603_s1 + $0x10] sm:$0xff] }
   0x2   :  { %v39_v1 = vld [vmem:[%s14603_s1 + $0x20] sm:$0x33]  ;;  %v40_v7 = vld [vmem:[%s14603_s1 + $0x28] sm:$0x33]  ;;  %v41_v11 = vld [vmem:[%s14603_s1 + $0x30] sm:$0x33] }
   0x3   :  { %v33_v3 = vld [vmem:[%s14604_s0] sm:$0x3]  ;;  %v8599_v4 = vcombine.high %v35_v0, %v39_v1  ;;  %v8598_v5 = vcombine.low %v35_v0, %v39_v1  ;;  %v8601_v9 = vcombine.high %v36_v6, %v40_v7  ;;  %v8600_v10 = vcombine.low %v36_v6, %v40_v7  ;;  %v9803_v18 = vld [vmem:[%s14605_s2 + $0x4] ss:$8 sps:$4 sm:$0xff]   ;;  %v38_v20 = vld [vmem:[%s14603_s1 + $0x18] sm:$0xff]  ;;  %s11110_s0 = smov 64  }
   0x4   :  { %v34_v13 = vpack.c.bf16 %v33_v3, %v33_v3  ;;  %v8603_v14 = vcombine.high %v37_v8, %v41_v11  ;;  %v8602_v15 = vcombine.low %v37_v8, %v41_v11  ;;  %v9801_v19 = vld [vmem:[%s14605_s2] ss:$8 sps:$4 sm:$0xff]   ;;  %v42_v21 = vld [vmem:[%s14603_s1 + $0x38] sm:$0x33]  ;;  %v9809_v27 = vld [vmem:[%s14605_s2 + $0x24] ss:$8 sps:$4 sm:$0xff]  }
   0x5   :  { %8606 = vmatprep.subr.msk.bf16.mxu0 %vm121_vm0, %v8599_v4  ;;  %v123_v12 = vsel %vm121_vm0, %v8598_v5, 0  ;;  %8608 = vmatprep.subr.msk.bf16.mxu1 %vm121_vm0, %v8601_v9  ;;  %v129_v16 = vsel %vm121_vm0, %v8600_v10, 0  ;;  %v9806_v22 = vld [vmem:[%s14605_s2 + $0x14] ss:$8 sps:$4 sm:$0xff]   ;;  %v8605_v23 = vcombine.high %v38_v20, %v42_v21  ;;  %v8604_v24 = vcombine.low %v38_v20, %v42_v21  ;;  %v9804_v26 = vld [vmem:[%s14605_s2 + $0x10] ss:$8 sps:$4 sm:$0xff]  }
   0x6   :  { %147 = vmatpush1.bf16.msra.mxu0 %v123_v12  ;;  %188 = vmatpush1.bf16.msra.mxu1 %v129_v16  ;;  %v135_v17 = vsel %vm121_vm0, %v8602_v15, 0  ;;  %v9807_v28 = vld [vmem:[%s14605_s2 + $0x20] ss:$8 sps:$4 sm:$0xff]   ;;  %v9812_v29 = vld [vmem:[%s14605_s2 + $0x34] ss:$8 sps:$4 sm:$0xff]   ;;  %v11304_v57 = vshrl.u32 %v45_v56, 7 }
   0x7   :  { %8610 = vmatprep.subr.msk.bf16.mxu0 %vm121_vm0, %v8603_v14  ;;  %8612 = vmatprep.subr.msk.bf16.mxu1 %vm121_vm0, %v8605_v23  ;;  %v141_v25 = vsel %vm121_vm0, %v8604_v24, 0  ;;  %v9810_v30 = vld [vmem:[%s14605_s2 + $0x30] ss:$8 sps:$4 sm:$0xff]   ;;  %v9815_v31 = vld [vmem:[%s14605_s2 + $0x44] ss:$8 sps:$4 sm:$0xff]  }
   0x8   :  { %v9813_v32 = vld [vmem:[%s14605_s2 + $0x40] ss:$8 sps:$4 sm:$0xff]   ;;  %v9818_v33 = vld [vmem:[%s14605_s2 + $0x54] ss:$8 sps:$4 sm:$0xff]   ;;  %v9816_v34 = vld [vmem:[%s14605_s2 + $0x50] ss:$8 sps:$4 sm:$0xff]  }
   0x9   :  { %8607 = vmatmul.mubr.msk.bf16.vlgmr.msra.gmra.mrb[0].mxu0 %vm117_vm1, %v34_v13  ;;  %8609 = vmatmul.mubr.msk.bf16.vlgmr.msra.gmra.mrb[0].mxu1 %vm117_vm1, %v34_v13  ;;  %v9821_v35 = vld [vmem:[%s14605_s2 + $0x64] ss:$8 sps:$4 sm:$0xff]   ;;  %v9819_v36 = vld [vmem:[%s14605_s2 + $0x60] ss:$8 sps:$4 sm:$0xff]   ;;  %v9824_v37 = vld [vmem:[%s14605_s2 + $0x74] ss:$8 sps:$4 sm:$0xff]  }
   0xa   :  { %229 = vmatpush1.bf16.msra.mxu0 %v135_v17  ;;  %260 = vmatprep.mubr.bf16.mxu0 %v11109_v2  ;;  %v9822_v38 = vld [vmem:[%s14605_s2 + $0x70] ss:$8 sps:$4 sm:$0xff]   ;;  %v9827_v39 = vld [vmem:[%s14605_s2 + $0x84] ss:$8 sps:$4 sm:$0xff]   ;;  %v9825_v40 = vld [vmem:[%s14605_s2 + $0x80] ss:$8 sps:$4 sm:$0xff]  }
   0xb   :  { %1122 = vmatprep.subr.bf16.mxu0 %v9803_v18  ;;  %301 = vmatprep.mubr.bf16.mxu1 %v11109_v2  ;;  %v9830_v41 = vld [vmem:[%s14605_s2 + $0x94] ss:$8 sps:$4 sm:$0xff]   ;;  %v9828_v42 = vld [vmem:[%s14605_s2 + $0x90] ss:$8 sps:$4 sm:$0xff]   ;;  %v9833_v43 = vld [vmem:[%s14605_s2 + $0xa4] ss:$8 sps:$4 sm:$0xff]  }
   0xc   :  { %270 = vmatpush1.bf16.msra.mxu1 %v141_v25  ;;  %v9831_v44 = vld [vmem:[%s14605_s2 + $0xa0] ss:$8 sps:$4 sm:$0xff]   ;;  %v9836_v45 = vld [vmem:[%s14605_s2 + $0xb4] ss:$8 sps:$4 sm:$0xff]   ;;  %v9834_v46 = vld [vmem:[%s14605_s2 + $0xb0] ss:$8 sps:$4 sm:$0xff]  }
   0xd   :  { %v9839_v47 = vld [vmem:[%s14605_s2 + $0xc4] ss:$8 sps:$4 sm:$0xff]   ;;  %v9837_v48 = vld [vmem:[%s14605_s2 + $0xc0] ss:$8 sps:$4 sm:$0xff]   ;;  %v9842_v49 = vld [vmem:[%s14605_s2 + $0xd4] ss:$8 sps:$4 sm:$0xff]  }
   0xe   :  { %v9840_v50 = vld [vmem:[%s14605_s2 + $0xd0] ss:$8 sps:$4 sm:$0xff]   ;;  %v9845_v51 = vld [vmem:[%s14605_s2 + $0xe4] ss:$8 sps:$4 sm:$0xff]   ;;  %v9843_v52 = vld [vmem:[%s14605_s2 + $0xe0] ss:$8 sps:$4 sm:$0xff]  }
   0xf   :  { %v9848_v53 = vld [vmem:[%s14605_s2 + $0xf4] ss:$8 sps:$4 sm:$0xff]   ;;  %v9846_v54 = vld [vmem:[%s14605_s2 + $0xf0] ss:$8 sps:$4 sm:$0xff]   ;;  %v9851_v55 = vld [vmem:[%s14605_s2 + $0x104] ss:$8 sps:$4 sm:$0xff]  }
  0x10   :  { %v11307_v58 = vsub.s32 0, %v11304_v57  ;;  %v11312_v59 = vld [vmem:[%s14606_s7] sm:$0xff]  ;;  %v11315_v60 = vsub.s32 1, %v11304_v57  ;;  %v11318_v61 = vsub.s32 3, %v11304_v57  ;;  %v9888_v56 = vld [vmem:[%s14605_s2 + $0x1d0] ss:$8 sps:$4 sm:$0xff]  }
  0x11   :  { %8611 = vmatmul.mubr.msk.bf16.vlgmr.msra.gmra.mrb[4].mxu0 %vm117_vm1, %v34_v13  ;;  %8613 = vmatmul.mubr.msk.bf16.vlgmr.msra.gmra.mrb[4].mxu1 %vm117_vm1, %v34_v13 }
  0x12   :  { %1123 = vmatpush1.bf16.msra.mxu0 %v9801_v19  ;;  %v48_v62 = vrot.slane %v11312_v59, %v11307_v58  ;;  %v52_v63 = vrot.slane %v11312_v59, %v11315_v60  ;;  %v60_v0 = vrot.slane %v11312_v59, %v11318_v61  ;;  %v9849_v19 = vld [vmem:[%s14605_s2 + $0x100] ss:$8 sps:$4 sm:$0xff]  }
  0x13   :  { %1124 = vmatprep.subr.bf16.mxu0 %v9806_v22  ;;  %v9854_v22 = vld [vmem:[%s14605_s2 + $0x114] ss:$8 sps:$4 sm:$0xff]  }
  0x16   :  { %1125 = vmatpush1.bf16.msra.mxu0 %v9804_v26 }
  0x17   :  { %1126 = vmatprep.subr.bf16.mxu0 %v9809_v27  ;;  %v9852_v27 = vld [vmem:[%s14605_s2 + $0x110] ss:$8 sps:$4 sm:$0xff]  }
  0x1a   :  { %1127 = vmatpush1.bf16.msra.mxu0 %v9807_v28 }
  0x1b   :  { %1128 = vmatprep.subr.bf16.mxu0 %v9812_v29  ;;  %v9857_v29 = vld [vmem:[%s14605_s2 + $0x124] ss:$8 sps:$4 sm:$0xff]  }
  0x1e   :  { %1129 = vmatpush1.bf16.msra.mxu0 %v9810_v30  ;;  %v9855_v30 = vld [vmem:[%s14605_s2 + $0x120] ss:$8 sps:$4 sm:$0xff]  }
  0x1f   :  { %1130 = vmatprep.subr.bf16.mxu0 %v9815_v31  ;;  %v9860_v31 = vld [vmem:[%s14605_s2 + $0x134] ss:$8 sps:$4 sm:$0xff]  }
  0x22   :  { %1131 = vmatpush1.bf16.msra.mxu0 %v9813_v32  ;;  %v9858_v32 = vld [vmem:[%s14605_s2 + $0x130] ss:$8 sps:$4 sm:$0xff]  }
  0x23   :  { %1132 = vmatprep.subr.bf16.mxu0 %v9818_v33  ;;  %v9863_v33 = vld [vmem:[%s14605_s2 + $0x144] ss:$8 sps:$4 sm:$0xff]  }
  0x26   :  { %1133 = vmatpush1.bf16.msra.mxu0 %v9816_v34  ;;  %v9861_v34 = vld [vmem:[%s14605_s2 + $0x140] ss:$8 sps:$4 sm:$0xff]  }
  0x27   :  { %1134 = vmatprep.subr.bf16.mxu0 %v9821_v35  ;;  %v9866_v35 = vld [vmem:[%s14605_s2 + $0x154] ss:$8 sps:$4 sm:$0xff]  }
  0x2a   :  { %1135 = vmatpush1.bf16.msra.mxu0 %v9819_v36  ;;  %v9864_v36 = vld [vmem:[%s14605_s2 + $0x150] ss:$8 sps:$4 sm:$0xff]  }
  0x2b   :  { %1136 = vmatprep.subr.bf16.mxu0 %v9824_v37  ;;  %v9869_v37 = vld [vmem:[%s14605_s2 + $0x164] ss:$8 sps:$4 sm:$0xff]  }
  0x2e   :  { %1137 = vmatpush1.bf16.msra.mxu0 %v9822_v38  ;;  %v9867_v38 = vld [vmem:[%s14605_s2 + $0x160] ss:$8 sps:$4 sm:$0xff]  }
  0x2f   :  { %1138 = vmatprep.subr.bf16.mxu0 %v9827_v39  ;;  %v9872_v39 = vld [vmem:[%s14605_s2 + $0x174] ss:$8 sps:$4 sm:$0xff]  }
  0x32   :  { %1139 = vmatpush1.bf16.msra.mxu0 %v9825_v40  ;;  %v9870_v40 = vld [vmem:[%s14605_s2 + $0x170] ss:$8 sps:$4 sm:$0xff]  }
  0x33   :  { %1140 = vmatprep.subr.bf16.mxu0 %v9830_v41  ;;  %v9875_v41 = vld [vmem:[%s14605_s2 + $0x184] ss:$8 sps:$4 sm:$0xff]  }
  0x36   :  { %1141 = vmatpush1.bf16.msra.mxu0 %v9828_v42  ;;  %v9873_v42 = vld [vmem:[%s14605_s2 + $0x180] ss:$8 sps:$4 sm:$0xff]  }
  0x37   :  { %1142 = vmatprep.subr.bf16.mxu0 %v9833_v43  ;;  %v9878_v43 = vld [vmem:[%s14605_s2 + $0x194] ss:$8 sps:$4 sm:$0xff]  }
  0x3a   :  { %1143 = vmatpush1.bf16.msra.mxu0 %v9831_v44  ;;  %v9876_v44 = vld [vmem:[%s14605_s2 + $0x190] ss:$8 sps:$4 sm:$0xff]  }
  0x3b   :  { %1144 = vmatprep.subr.bf16.mxu0 %v9836_v45  ;;  %v9881_v45 = vld [vmem:[%s14605_s2 + $0x1a4] ss:$8 sps:$4 sm:$0xff]  }
  0x3e   :  { %1145 = vmatpush1.bf16.msra.mxu0 %v9834_v46  ;;  %v9879_v46 = vld [vmem:[%s14605_s2 + $0x1a0] ss:$8 sps:$4 sm:$0xff]  }
  0x3f   :  { %1146 = vmatprep.subr.bf16.mxu0 %v9839_v47  ;;  %v9884_v47 = vld [vmem:[%s14605_s2 + $0x1b4] ss:$8 sps:$4 sm:$0xff]  }
  0x42   :  { %1147 = vmatpush1.bf16.msra.mxu0 %v9837_v48  ;;  %v9882_v48 = vld [vmem:[%s14605_s2 + $0x1b0] ss:$8 sps:$4 sm:$0xff]  }
  0x43   :  { %1148 = vmatprep.subr.bf16.mxu0 %v9842_v49  ;;  %v9887_v49 = vld [vmem:[%s14605_s2 + $0x1c4] ss:$8 sps:$4 sm:$0xff]  }
  0x46   :  { %1149 = vmatpush1.bf16.msra.mxu0 %v9840_v50  ;;  %v11403_v50 = vsub.s32 5, %v11304_v57 }
  0x47   :  { %1150 = vmatprep.subr.bf16.mxu0 %v9845_v51  ;;  %v11406_v51 = vsub.s32 2, %v11304_v57 }
  0x4a   :  { %1151 = vmatpush1.bf16.msra.mxu0 %v9843_v52  ;;  %v9885_v52 = vld [vmem:[%s14605_s2 + $0x1c0] ss:$8 sps:$4 sm:$0xff]  }
  0x4b   :  { %1152 = vmatprep.subr.bf16.mxu0 %v9848_v53  ;;  %v9890_v53 = vld [vmem:[%s14605_s2 + $0x1d4] ss:$8 sps:$4 sm:$0xff]  }
  0x4e   :  { %1153 = vmatpush1.bf16.msra.mxu0 %v9846_v54  ;;  %v68_v54 = vrot.slane %v11312_v59, %v11403_v50 }
  0x4f   :  { %1163 = vmatprep.subr.bf16.mxu0 %v9851_v55  ;;  %v56_v55 = vrot.slane %v11312_v59, %v11406_v51 }
  0xdc   :  { %v180_v1 = vpop.f32.mrb[0].mxu0  ;;  %v11326_v5 = vpop.f32.mrb[0].mxu1 }
  0xdd   :  { %v181_v3 = vadd.f32 %v180_v1, %v48_v62  ;;  %v182_v4 = vpop.f32.mrb[1].mxu0  ;;  %v223_v8 = vpop.f32.mrb[1].mxu1 }
  0xde   :  { %v183_v6 = vadd.f32 %v182_v4, %v52_v63  ;;  %v184_v7 = vpop.f32.mrb[2].mxu0  ;;  %v224_v11 = vadd.f32 %v223_v8, %v60_v0  ;;  %v225_v12 = vpop.f32.mrb[2].mxu1  ;;  %v9893_v63 = vld [vmem:[%s14605_s2 + $0x1e4] ss:$8 sps:$4 sm:$0xff]   ;;  %v9896_v8 = vld [vmem:[%s14605_s2 + $0x1f4] ss:$8 sps:$4 sm:$0xff]  }
  0xdf   :  { %vm310_vm2 = vcmp.gt.f32.partialorder %v181_v3, 0.0  ;;  %v318_v9 = vmul.f32 0.01, %v181_v3  ;;  %v185_v10 = vpop.f32.mrb[3].mxu0  ;;  %v226_v16 = vpop.f32.mrb[3].mxu1 }
  0xe0   :  { %vm311_vm3 = vcmp.gt.f32.partialorder %v183_v6, 0.0  ;;  %v319_v13 = vmul.f32 0.01, %v183_v6  ;;  %vm313_vm4 = vcmp.gt.f32.partialorder %v224_v11, 0.0  ;;  %v321_v15 = vmul.f32 0.01, %v224_v11 }
  0xe1   :  { %v326_v14 = vsel %vm310_vm2, %v181_v3, %v318_v9  ;;  %v222_v3 = vadd.f32 %v11326_v5, %v56_v55  ;;  %v9891_v7 = vld [vmem:[%s14605_s2 + $0x1e0] ss:$8 sps:$4 sm:$0xff]   ;;  %v9894_v5 = vld [vmem:[%s14605_s2 + $0x1f0] ss:$8 sps:$4 sm:$0xff]  }
  0xe2   :  { %v327_v17 = vsel %vm311_vm3, %v183_v6, %v319_v13  ;;  %v329_v20 = vsel %vm313_vm4, %v224_v11, %v321_v15  ;;  %v334_v21 = vpack.c.bf16 %v326_v14, %v326_v14  ;;  %v9899_v11 = vld [vmem:[%s14605_s2 + $0x204] ss:$8 sps:$4 sm:$0xff]   ;;  %v9897_v14 = vld [vmem:[%s14605_s2 + $0x200] ss:$8 sps:$4 sm:$0xff]  }
  0xe3   :  { %v335_v18 = vpack.c.bf16 %v327_v17, %v327_v17  ;;  %v337_v23 = vpack.c.bf16 %v329_v20, %v329_v20  ;;  %v320_v10 = vmul.f32 0.01, %v222_v3  ;;  %vm312_vm6 = vcmp.gt.f32.partialorder %v222_v3, 0.0  ;;  %v9902_v17 = vld [vmem:[%s14605_s2 + $0x214] ss:$8 sps:$4 sm:$0xff]   ;;  %v1298_v20 = vld [vmem:[%s14607_s3 + $0x20] sm:$0xff] }
  0xe4   :  { %v11334_v24 = vpop.f32.mrb[4].mxu0  ;;  %v11421_v62 = vpop.f32.mrb[4].mxu1  ;;  %v1346_v55 = vld [vmem:[%s14607_s3 + $0x1a0] sm:$0xff] }
  0xe5   :  { %1154 = vmatprep.mubr.bf16.mxu0 %v335_v18  ;;  %v264_v25 = vpop.f32.mrb[5].mxu0  ;;  %v11426_v1 = vpop.f32.mrb[5].mxu1  ;;  %v328_v13 = vsel %vm312_vm6, %v222_v3, %v320_v10  ;;  %v9900_v18 = vld [vmem:[%s14605_s2 + $0x210] ss:$8 sps:$4 sm:$0xff]  }
  0xe6   :  { %1155 = vmatmul.mubr.bf16.vlgmr.msra.gmra.mrb[8].mxu0 %v334_v21  ;;  %v266_v26 = vpop.f32.mrb[6].mxu0  ;;  %v265_v0 = vadd.f32 %v264_v25, %v68_v54  ;;  %v307_v4 = vpop.f32.mrb[6].mxu1  ;;  %v336_v16 = vpack.c.bf16 %v328_v13, %v328_v13  ;;  %v1302_v21 = vld [vmem:[%s14607_s3 + $0x40] sm:$0xff] }
  0xe7   :  { %1164 = vmatpush1.bf16.msra.mxu0 %v9849_v19  ;;  %1195 = vmatprep.mubr.bf16.mxu0 %v337_v23  ;;  %v267_v28 = vpop.f32.mrb[7].mxu0  ;;  %v308_v6 = vpop.f32.mrb[7].mxu1  ;;  %v1294_v19 = vld [vmem:[%s14607_s3] sm:$0xff] }
  0xe8   :  { %1165 = vmatprep.subr.bf16.mxu0 %v9854_v22  ;;  %v323_v9 = vmul.f32 0.01, %v265_v0  ;;  %vm315_vm5 = vcmp.gt.f32.partialorder %v265_v0, 0.0  ;;  %v9905_v22 = vld [vmem:[%s14605_s2 + $0x224] ss:$8 sps:$4 sm:$0xff]   ;;  %v8742_v23 = vcombine.low %v1294_v19, %v1298_v20  ;;  %v8743_v25 = vcombine.high %v1294_v19, %v1298_v20 }
  0xe9   :  { %v1306_v26 = vld [vmem:[%s14607_s3 + $0x60] sm:$0xff] }
  0xea   :  { %v331_v12 = vsel %vm315_vm5, %v265_v0, %v323_v9  ;;  %v1310_v28 = vld [vmem:[%s14607_s3 + $0x80] sm:$0xff]  ;;  %2104 = vmatprep.subr.bf16.mxu1 %v8743_v25  ;;  %v9920_v0 = vld [vmem:[%s14605_s2 + $0x274] ss:$8 sps:$4 sm:$0xff]  }
  0xeb   :  { %1166 = vmatpush1.bf16.msra.mxu0 %v9852_v27  ;;  %v339_v15 = vpack.c.bf16 %v331_v12, %v331_v12  ;;  %v8751_v27 = vcombine.high %v1302_v21, %v1306_v26  ;;  %2105 = vmatpush1.bf16.msra.mxu1 %v8742_v23  ;;  %v1342_v54 = vld [vmem:[%s14607_s3 + $0x180] sm:$0xff] }
  0xec   :  { %1167 = vmatprep.subr.bf16.mxu0 %v9857_v29  ;;  %v1314_v29 = vld [vmem:[%s14607_s3 + $0xa0] sm:$0xff]  ;;  %v8791_v3 = vcombine.high %v1342_v54, %v1346_v55 }
  0xed   :  { %2106 = vmatprep.subr.bf16.mxu1 %v8751_v27  ;;  %v1350_v4 = vld [vmem:[%s14607_s3 + $0x1c0] sm:$0xff]  ;;  %v9932_v27 = vld [vmem:[%s14605_s2 + $0x2b4] ss:$8 sps:$4 sm:$0xff]  }
  0xee   :  { %v1354_v6 = vld [vmem:[%s14607_s3 + $0x1e0] sm:$0xff] }
  0xef   :  { %1168 = vmatpush1.bf16.msra.mxu0 %v9855_v30  ;;  %v9903_v30 = vld [vmem:[%s14605_s2 + $0x220] ss:$8 sps:$4 sm:$0xff]   ;;  %v9923_v9 = vld [vmem:[%s14605_s2 + $0x284] ss:$8 sps:$4 sm:$0xff]   ;;  %v8799_v10 = vcombine.high %v1350_v4, %v1354_v6  ;;  %v8798_v13 = vcombine.low %v1350_v4, %v1354_v6 }
  0xf0   :  { %1169 = vmatprep.subr.bf16.mxu0 %v9860_v31  ;;  %v8750_v31 = vcombine.low %v1302_v21, %v1306_v26  ;;  %v9921_v12 = vld [vmem:[%s14605_s2 + $0x280] ss:$8 sps:$4 sm:$0xff]   ;;  %v9929_v20 = vld [vmem:[%s14605_s2 + $0x2a4] ss:$8 sps:$4 sm:$0xff]  }
  0xf1   :  { %v1378_v23 = vld [vmem:[%s14607_s3 + $0x2a0] sm:$0xff] }
  0xf2   :  { %2107 = vmatpush1.bf16.msra.mxu1 %v8750_v31  ;;  %v9927_v25 = vld [vmem:[%s14605_s2 + $0x2a0] ss:$8 sps:$4 sm:$0xff]   ;;  %v9930_v31 = vld [vmem:[%s14605_s2 + $0x2b0] ss:$8 sps:$4 sm:$0xff]  }
  0xf3   :  { %1170 = vmatpush1.bf16.msra.mxu0 %v9858_v32  ;;  %v9908_v32 = vld [vmem:[%s14605_s2 + $0x234] ss:$8 sps:$4 sm:$0xff]  }
  0xf4   :  { %1171 = vmatprep.subr.bf16.mxu0 %v9863_v33  ;;  %v8759_v33 = vcombine.high %v1310_v28, %v1314_v29 }
  0xf6   :  { %2108 = vmatprep.subr.bf16.mxu1 %v8759_v33  ;;  %v9935_v33 = vld [vmem:[%s14605_s2 + $0x2c4] ss:$8 sps:$4 sm:$0xff]  }
  0xf7   :  { %1172 = vmatpush1.bf16.msra.mxu0 %v9861_v34  ;;  %v1318_v34 = vld [vmem:[%s14607_s3 + $0xc0] sm:$0xff] }
  0xf8   :  { %1173 = vmatprep.subr.bf16.mxu0 %v9866_v35  ;;  %v1322_v35 = vld [vmem:[%s14607_s3 + $0xe0] sm:$0xff] }
  0xfb   :  { %1174 = vmatpush1.bf16.msra.mxu0 %v9864_v36  ;;  %v9906_v36 = vld [vmem:[%s14605_s2 + $0x230] ss:$8 sps:$4 sm:$0xff]  }
  0xfc   :  { %1175 = vmatprep.subr.bf16.mxu0 %v9869_v37  ;;  %v8758_v37 = vcombine.low %v1310_v28, %v1314_v29  ;;  %v1382_v29 = vld [vmem:[%s14607_s3 + $0x2c0] sm:$0xff] }
  0xfe   :  { %2109 = vmatpush1.bf16.msra.mxu1 %v8758_v37  ;;  %v1390_v37 = vld [vmem:[%s14607_s3 + $0x300] sm:$0xff] }
  0xff   :  { %1176 = vmatpush1.bf16.msra.mxu0 %v9867_v38  ;;  %v9911_v38 = vld [vmem:[%s14605_s2 + $0x244] ss:$8 sps:$4 sm:$0xff]  }
 0x100   :  { %1177 = vmatprep.subr.bf16.mxu0 %v9872_v39  ;;  %v8767_v39 = vcombine.high %v1318_v34, %v1322_v35 }
 0x102   :  { %2110 = vmatprep.subr.bf16.mxu1 %v8767_v39  ;;  %v9933_v39 = vld [vmem:[%s14605_s2 + $0x2c0] ss:$8 sps:$4 sm:$0xff]  }
 0x103   :  { %1178 = vmatpush1.bf16.msra.mxu0 %v9870_v40  ;;  %v1326_v40 = vld [vmem:[%s14607_s3 + $0x100] sm:$0xff] }
 0x104   :  { %1179 = vmatprep.subr.bf16.mxu0 %v9875_v41  ;;  %v1330_v41 = vld [vmem:[%s14607_s3 + $0x120] sm:$0xff] }
 0x107   :  { %1180 = vmatpush1.bf16.msra.mxu0 %v9873_v42  ;;  %v9909_v42 = vld [vmem:[%s14605_s2 + $0x240] ss:$8 sps:$4 sm:$0xff]  }
 0x108   :  { %1181 = vmatprep.subr.bf16.mxu0 %v9878_v43  ;;  %v8766_v43 = vcombine.low %v1318_v34, %v1322_v35  ;;  %v75_v34 = vsub.s32 7, %v11304_v57 }
 0x10a   :  { %2111 = vmatpush1.bf16.msra.mxu1 %v8766_v43 }
 0x10b   :  { %1182 = vmatpush1.bf16.msra.mxu0 %v9876_v44  ;;  %v9914_v44 = vld [vmem:[%s14605_s2 + $0x254] ss:$8 sps:$4 sm:$0xff]  }
 0x10c   :  { %1183 = vmatprep.subr.bf16.mxu0 %v9881_v45  ;;  %v8775_v45 = vcombine.high %v1326_v40, %v1330_v41 }
 0x10e   :  { %2112 = vmatprep.subr.bf16.mxu1 %v8775_v45  ;;  %v1398_v45 = vld [vmem:[%s14607_s3 + $0x340] sm:$0xff] }
 0x10f   :  { %1184 = vmatpush1.bf16.msra.mxu0 %v9879_v46  ;;  %v1334_v46 = vld [vmem:[%s14607_s3 + $0x140] sm:$0xff] }
 0x110   :  { %1185 = vmatprep.subr.bf16.mxu0 %v9884_v47  ;;  %v1338_v47 = vld [vmem:[%s14607_s3 + $0x160] sm:$0xff] }
 0x113   :  { %1186 = vmatpush1.bf16.msra.mxu0 %v9882_v48  ;;  %v9912_v48 = vld [vmem:[%s14605_s2 + $0x250] ss:$8 sps:$4 sm:$0xff]  }
 0x114   :  { %1187 = vmatprep.subr.bf16.mxu0 %v9887_v49  ;;  %v8774_v49 = vcombine.low %v1326_v40, %v1330_v41  ;;  %v9938_v41 = vld [vmem:[%s14605_s2 + $0x2d4] ss:$8 sps:$4 sm:$0xff]  }
 0x116   :  { %2113 = vmatpush1.bf16.msra.mxu1 %v8774_v49  ;;  %v9941_v49 = vld [vmem:[%s14605_s2 + $0x2e4] ss:$8 sps:$4 sm:$0xff]  }
 0x117   :  { %1188 = vmatpush1.bf16.msra.mxu0 %v9885_v52  ;;  %v9917_v52 = vld [vmem:[%s14605_s2 + $0x264] ss:$8 sps:$4 sm:$0xff]  }
 0x118   :  { %1189 = vmatprep.subr.bf16.mxu0 %v9890_v53  ;;  %v8783_v53 = vcombine.high %v1334_v46, %v1338_v47 }
 0x11a   :  { %2114 = vmatprep.subr.bf16.mxu1 %v8783_v53 }
 0x11b   :  { %1190 = vmatpush1.bf16.msra.mxu0 %v9888_v56  ;;  %v9915_v56 = vld [vmem:[%s14605_s2 + $0x260] ss:$8 sps:$4 sm:$0xff]  }
 0x11c   :  { %1191 = vmatprep.subr.bf16.mxu0 %v9893_v63  ;;  %v8782_v63 = vcombine.low %v1334_v46, %v1338_v47  ;;  %v1402_v46 = vld [vmem:[%s14607_s3 + $0x360] sm:$0xff]  ;;  %v9936_v47 = vld [vmem:[%s14605_s2 + $0x2d0] ss:$8 sps:$4 sm:$0xff]  }
 0x11d   :  { %v8847_v53 = vcombine.high %v1398_v45, %v1402_v46 }
 0x11e   :  { %2115 = vmatpush1.bf16.msra.mxu1 %v8782_v63  ;;  %v9944_v63 = vld [vmem:[%s14605_s2 + $0x2f4] ss:$8 sps:$4 sm:$0xff]  }
 0x11f   :  { %1192 = vmatpush1.bf16.msra.mxu0 %v9891_v7  ;;  %v9918_v7 = vld [vmem:[%s14605_s2 + $0x270] ss:$8 sps:$4 sm:$0xff]   ;;  %2116 = vmatprep.subr.bf16.mxu1 %v8791_v3 }
 0x120   :  { %1193 = vmatprep.subr.bf16.mxu0 %v9896_v8  ;;  %v8790_v8 = vcombine.low %v1342_v54, %v1346_v55  ;;  %v9939_v55 = vld [vmem:[%s14605_s2 + $0x2e0] ss:$8 sps:$4 sm:$0xff]  }
 0x122   :  { %2117 = vmatpush1.bf16.msra.mxu1 %v8790_v8 }
 0x123   :  { %1194 = vmatpush1.bf16.msra.mxu0 %v9894_v5  ;;  %v1358_v5 = vld [vmem:[%s14607_s3 + $0x200] sm:$0xff]  ;;  %2118 = vmatprep.subr.bf16.mxu1 %v8799_v10  ;;  %v9950_v10 = vld [vmem:[%s14605_s2 + $0x314] ss:$8 sps:$4 sm:$0xff]  }
 0x124   :  { %1204 = vmatprep.subr.bf16.mxu0 %v9899_v11  ;;  %v1362_v11 = vld [vmem:[%s14607_s3 + $0x220] sm:$0xff] }
 0x125   :  { %v8806_v19 = vcombine.low %v1358_v5, %v1362_v11 }
 0x126   :  { %1196 = vmatmul.mubr.bf16.vlgmr.msra.gmra.mrb[8].mxu0 %v336_v16  ;;  %v1366_v16 = vld [vmem:[%s14607_s3 + $0x240] sm:$0xff]  ;;  %2119 = vmatpush1.bf16.msra.mxu1 %v8798_v13  ;;  %v9956_v13 = vld [vmem:[%s14605_s2 + $0x334] ss:$8 sps:$4 sm:$0xff]  }
 0x127   :  { %1205 = vmatpush1.bf16.msra.mxu0 %v9897_v14  ;;  %1236 = vmatprep.mubr.bf16.mxu0 %v339_v15  ;;  %v9926_v14 = vld [vmem:[%s14605_s2 + $0x294] ss:$8 sps:$4 sm:$0xff]   ;;  %v8807_v15 = vcombine.high %v1358_v5, %v1362_v11  ;;  %v9948_v5 = vld [vmem:[%s14605_s2 + $0x310] ss:$8 sps:$4 sm:$0xff]   ;;  %v9953_v11 = vld [vmem:[%s14605_s2 + $0x324] ss:$8 sps:$4 sm:$0xff]  }
 0x128   :  { %1206 = vmatprep.subr.bf16.mxu0 %v9902_v17  ;;  %v1370_v17 = vld [vmem:[%s14607_s3 + $0x260] sm:$0xff] }
 0x129   :  { %2120 = vmatprep.subr.bf16.mxu1 %v8807_v15  ;;  %v8815_v21 = vcombine.high %v1366_v16, %v1370_v17  ;;  %v8814_v26 = vcombine.low %v1366_v16, %v1370_v17  ;;  %v9959_v15 = vld [vmem:[%s14605_s2 + $0x344] ss:$8 sps:$4 sm:$0xff]   ;;  %v9957_v16 = vld [vmem:[%s14605_s2 + $0x340] ss:$8 sps:$4 sm:$0xff]   ;;  %v9962_v17 = vld [vmem:[%s14605_s2 + $0x354] ss:$8 sps:$4 sm:$0xff]  }
 0x12a   :  { %2121 = vmatpush1.bf16.msra.mxu1 %v8806_v19  ;;  %v9965_v19 = vld [vmem:[%s14605_s2 + $0x364] ss:$8 sps:$4 sm:$0xff]  }
 0x12b   :  { %1207 = vmatpush1.bf16.msra.mxu0 %v9900_v18  ;;  %v9924_v18 = vld [vmem:[%s14605_s2 + $0x290] ss:$8 sps:$4 sm:$0xff]   ;;  %2122 = vmatprep.subr.bf16.mxu1 %v8815_v21  ;;  %v9968_v21 = vld [vmem:[%s14605_s2 + $0x374] ss:$8 sps:$4 sm:$0xff]  }
 0x12c   :  { %1208 = vmatprep.subr.bf16.mxu0 %v9905_v22  ;;  %v1374_v22 = vld [vmem:[%s14607_s3 + $0x280] sm:$0xff] }
 0x12d   :  { %v8823_v28 = vcombine.high %v1374_v22, %v1378_v23 }
 0x12e   :  { %2123 = vmatpush1.bf16.msra.mxu1 %v8814_v26  ;;  %v9974_v26 = vld [vmem:[%s14605_s2 + $0x394] ss:$8 sps:$4 sm:$0xff]  }
 0x12f   :  { %1209 = vmatpush1.bf16.msra.mxu0 %v9903_v30  ;;  %v1386_v30 = vld [vmem:[%s14607_s3 + $0x2e0] sm:$0xff]  ;;  %2124 = vmatprep.subr.bf16.mxu1 %v8823_v28 }
 0x130   :  { %1210 = vmatprep.subr.bf16.mxu0 %v9908_v32  ;;  %v8822_v32 = vcombine.low %v1374_v22, %v1378_v23  ;;  %v8831_v35 = vcombine.high %v1382_v29, %v1386_v30  ;;  %v8830_v40 = vcombine.low %v1382_v29, %v1386_v30  ;;  %v9966_v22 = vld [vmem:[%s14605_s2 + $0x370] ss:$8 sps:$4 sm:$0xff]   ;;  %v9971_v23 = vld [vmem:[%s14605_s2 + $0x384] ss:$8 sps:$4 sm:$0xff]   ;;  %v9975_v29 = vld [vmem:[%s14605_s2 + $0x3a0] ss:$8 sps:$4 sm:$0xff]  }
 0x131   :  { %v9977_v28 = vld [vmem:[%s14605_s2 + $0x3a4] ss:$8 sps:$4 sm:$0xff]   ;;  %v9980_v30 = vld [vmem:[%s14605_s2 + $0x3b4] ss:$8 sps:$4 sm:$0xff]  }
 0x132   :  { %2125 = vmatpush1.bf16.msra.mxu1 %v8822_v32  ;;  %v9983_v32 = vld [vmem:[%s14605_s2 + $0x3c4] ss:$8 sps:$4 sm:$0xff]  }
 0x133   :  { %1211 = vmatpush1.bf16.msra.mxu0 %v9906_v36  ;;  %v11587_v36 = vsub.s32 4, %v11304_v57  ;;  %2126 = vmatprep.subr.bf16.mxu1 %v8831_v35  ;;  %v9981_v35 = vld [vmem:[%s14605_s2 + $0x3c0] ss:$8 sps:$4 sm:$0xff]  }
 0x134   :  { %1212 = vmatprep.subr.bf16.mxu0 %v9911_v38  ;;  %v1394_v38 = vld [vmem:[%s14607_s3 + $0x320] sm:$0xff] }
 0x135   :  { %v8839_v43 = vcombine.high %v1390_v37, %v1394_v38 }
 0x136   :  { %2127 = vmatpush1.bf16.msra.mxu1 %v8830_v40  ;;  %v9989_v40 = vld [vmem:[%s14605_s2 + $0x3e4] ss:$8 sps:$4 sm:$0xff]  }
 0x137   :  { %1213 = vmatpush1.bf16.msra.mxu0 %v9909_v42  ;;  %v76_v42 = vrot.slane %v11312_v59, %v75_v34  ;;  %2128 = vmatprep.subr.bf16.mxu1 %v8839_v43 }
 0x138   :  { %1214 = vmatprep.subr.bf16.mxu0 %v9914_v44  ;;  %v64_v44 = vrot.slane %v11312_v59, %v11587_v36 }
 0x13a   :  { %v263_v54 = vadd.f32 %v11334_v24, %v64_v44  ;;  %v9942_v24 = vld [vmem:[%s14605_s2 + $0x2f0] ss:$8 sps:$4 sm:$0xff]  }
 0x13b   :  { %1215 = vmatpush1.bf16.msra.mxu0 %v9912_v48  ;;  %v8838_v48 = vcombine.low %v1390_v37, %v1394_v38  ;;  %v9986_v37 = vld [vmem:[%s14605_s2 + $0x3d4] ss:$8 sps:$4 sm:$0xff]   ;;  %v9990_v44 = vld [vmem:[%s14605_s2 + $0x3f0] ss:$8 sps:$4 sm:$0xff]  }
 0x13c   :  { %1216 = vmatprep.subr.bf16.mxu0 %v9917_v52  ;;  %v306_v52 = vadd.f32 %v11426_v1, %v76_v42  ;;  %v322_v3 = vmul.f32 0.01, %v263_v54  ;;  %vm314_vm8 = vcmp.gt.f32.partialorder %v263_v54, 0.0  ;;  %v9947_v1 = vld [vmem:[%s14605_s2 + $0x304] ss:$8 sps:$4 sm:$0xff]  }
 0x13d   :  { %2129 = vmatpush1.bf16.msra.mxu1 %v8838_v48  ;;  %v9987_v42 = vld [vmem:[%s14605_s2 + $0x3e0] ss:$8 sps:$4 sm:$0xff]  }
 0x13e   :  { %2130 = vmatprep.subr.bf16.mxu1 %v8847_v53  ;;  %vm317_vm7 = vcmp.gt.f32.partialorder %v306_v52, 0.0  ;;  %v330_v6 = vsel %vm314_vm8, %v263_v54, %v322_v3  ;;  %v1418_v53 = vld [vmem:[%s14607_s3 + $0x3e0] sm:$0xff] }
 0x13f   :  { %1217 = vmatpush1.bf16.msra.mxu0 %v9915_v56  ;;  %v8846_v56 = vcombine.low %v1398_v45, %v1402_v46  ;;  %v1406_v46 = vld [vmem:[%s14607_s3 + $0x380] sm:$0xff] }
 0x140   :  { %1218 = vmatprep.subr.bf16.mxu0 %v9920_v0  ;;  %v325_v0 = vmul.f32 0.01, %v306_v52 }
 0x141   :  { %2131 = vmatpush1.bf16.msra.mxu1 %v8846_v56  ;;  %v1295_v56 = vld [vmem:[%s14607_s3 + $0x8] sm:$0xff] }
 0x142   :  { %v333_v4 = vsel %vm317_vm7, %v306_v52, %v325_v0  ;;  %v1414_v52 = vld [vmem:[%s14607_s3 + $0x3c0] sm:$0xff] }
 0x143   :  { %1219 = vmatpush1.bf16.msra.mxu0 %v9918_v7  ;;  %v9945_v7 = vld [vmem:[%s14605_s2 + $0x300] ss:$8 sps:$4 sm:$0xff]   ;;  %v341_v8 = vpack.c.bf16 %v333_v4, %v333_v4  ;;  %v8863_v54 = vcombine.high %v1414_v52, %v1418_v53 }
 0x144   :  { %1220 = vmatprep.subr.bf16.mxu0 %v9923_v9  ;;  %v338_v9 = vpack.c.bf16 %v330_v6, %v330_v6 }
 0x147   :  { %1221 = vmatpush1.bf16.msra.mxu0 %v9921_v12  ;;  %v9951_v12 = vld [vmem:[%s14605_s2 + $0x320] ss:$8 sps:$4 sm:$0xff]  }
 0x148   :  { %1222 = vmatprep.subr.bf16.mxu0 %v9926_v14  ;;  %v9954_v14 = vld [vmem:[%s14605_s2 + $0x330] ss:$8 sps:$4 sm:$0xff]  }
 0x14b   :  { %1223 = vmatpush1.bf16.msra.mxu0 %v9924_v18  ;;  %v9960_v18 = vld [vmem:[%s14605_s2 + $0x350] ss:$8 sps:$4 sm:$0xff]  }
 0x14c   :  { %1224 = vmatprep.subr.bf16.mxu0 %v9929_v20  ;;  %v9963_v20 = vld [vmem:[%s14605_s2 + $0x360] ss:$8 sps:$4 sm:$0xff]  }
 0x14f   :  { %1225 = vmatpush1.bf16.msra.mxu0 %v9927_v25  ;;  %v9969_v25 = vld [vmem:[%s14605_s2 + $0x380] ss:$8 sps:$4 sm:$0xff]  }
 0x150   :  { %1226 = vmatprep.subr.bf16.mxu0 %v9932_v27  ;;  %v9972_v27 = vld [vmem:[%s14605_s2 + $0x390] ss:$8 sps:$4 sm:$0xff]  }
 0x153   :  { %1227 = vmatpush1.bf16.msra.mxu0 %v9930_v31  ;;  %v9978_v31 = vld [vmem:[%s14605_s2 + $0x3b0] ss:$8 sps:$4 sm:$0xff]  }
 0x154   :  { %1228 = vmatprep.subr.bf16.mxu0 %v9935_v33  ;;  %v71_v33 = vsub.s32 6, %v11304_v57 }
 0x156   :  { %v72_v38 = vrot.slane %v11312_v59, %v71_v33  ;;  %v9992_v59 = vld [vmem:[%s14605_s2 + $0x3f4] ss:$8 sps:$4 sm:$0xff]  }
 0x157   :  { %1229 = vmatpush1.bf16.msra.mxu0 %v9933_v39  ;;  %v9984_v39 = vld [vmem:[%s14605_s2 + $0x3d0] ss:$8 sps:$4 sm:$0xff]  }
 0x158   :  { %1230 = vmatprep.subr.bf16.mxu0 %v9938_v41  ;;  %v304_v41 = vadd.f32 %v11421_v62, %v72_v38 }
 0x15a   :  { %v324_v43 = vmul.f32 0.01, %v304_v41  ;;  %vm316_vm9 = vcmp.gt.f32.partialorder %v304_v41, 0.0 }
 0x15b   :  { %1231 = vmatpush1.bf16.msra.mxu0 %v9936_v47  ;;  %v1410_v47 = vld [vmem:[%s14607_s3 + $0x3a0] sm:$0xff] }
 0x15c   :  { %1232 = vmatprep.subr.bf16.mxu0 %v9941_v49  ;;  %v332_v45 = vsel %vm316_vm9, %v304_v41, %v324_v43  ;;  %v8855_v48 = vcombine.high %v1406_v46, %v1410_v47  ;;  %v8854_v49 = vcombine.low %v1406_v46, %v1410_v47  ;;  %v1347_v41 = vld [vmem:[%s14607_s3 + $0x1a8] sm:$0xff] }
 0x15d   :  { %v340_v62 = vpack.c.bf16 %v332_v45, %v332_v45  ;;  %v1351_v43 = vld [vmem:[%s14607_s3 + $0x1c8] sm:$0xff] }
 0x15e   :  { %2132 = vmatprep.subr.bf16.mxu1 %v8855_v48  ;;  %v1359_v46 = vld [vmem:[%s14607_s3 + $0x208] sm:$0xff] }
 0x15f   :  { %1233 = vmatpush1.bf16.msra.mxu0 %v9939_v55  ;;  %2133 = vmatpush1.bf16.msra.mxu1 %v8854_v49  ;;  %v8862_v55 = vcombine.low %v1414_v52, %v1418_v53  ;;  %v1363_v47 = vld [vmem:[%s14607_s3 + $0x228] sm:$0xff] }
 0x160   :  { %1234 = vmatprep.subr.bf16.mxu0 %v9944_v63  ;;  %2134 = vmatprep.subr.bf16.mxu1 %v8863_v54  ;;  %v1299_v63 = vld [vmem:[%s14607_s3 + $0x28] sm:$0xff]  ;;  %v8809_v49 = vcombine.high %v1359_v46, %v1363_v47  ;;  %v9995_v54 = vld [vmem:[%s14608_s4 + $0x4] ss:$24 sps:$4 sm:$0xff]  }
 0x161   :  { %v8745_v0 = vcombine.high %v1295_v56, %v1299_v63  ;;  %v8744_v3 = vcombine.low %v1295_v56, %v1299_v63  ;;  %v1367_v52 = vld [vmem:[%s14607_s3 + $0x248] sm:$0xff]  ;;  %v8808_v56 = vcombine.low %v1359_v46, %v1363_v47  ;;  %v1308_v46 = vld [vmem:[%s14607_s3 + $0x70] sm:$0xff] }
 0x162   :  { %v1371_v53 = vld [vmem:[%s14607_s3 + $0x268] sm:$0xff] }
 0x163   :  { %1235 = vmatpush1.bf16.msra.mxu0 %v9942_v24  ;;  %2135 = vmatpush1.bf16.msra.mxu1 %v8862_v55  ;;  %v470_v24 = vld [vmem:[%s14606_s7 + $0x8] sm:$0x3]  ;;  %v9993_v55 = vld [vmem:[%s14608_s4] ss:$24 sps:$4 sm:$0xff]  }
 0x164   :  { %1245 = vmatprep.subr.bf16.mxu0 %v9947_v1  ;;  %2145 = vmatprep.subr.bf16.mxu1 %v8745_v0  ;;  %v475_v1 = vrot.slane %v470_v24, %v11307_v58  ;;  %v479_v4 = vrot.slane %v470_v24, %v11315_v60  ;;  %v1375_v63 = vld [vmem:[%s14607_s3 + $0x288] sm:$0xff] }
 0x165   :  { %v1379_v0 = vld [vmem:[%s14607_s3 + $0x2a8] sm:$0xff] }
 0x166   :  { %1237 = vmatmul.mubr.bf16.vlgmr.msra.gmra.mrb[8].mxu0 %v338_v9  ;;  %v9998_v24 = vld [vmem:[%s14608_s4 + $0x34] ss:$24 sps:$4 sm:$0xff]  }
 0x167   :  { %1246 = vmatpush1.bf16.msra.mxu0 %v9945_v7  ;;  %1277 = vmatprep.mubr.bf16.mxu0 %v341_v8 }
 0x168   :  { %1247 = vmatprep.subr.bf16.mxu0 %v9950_v10 }
 0x16b   :  { %1248 = vmatpush1.bf16.msra.mxu0 %v9948_v5 }
 0x16c   :  { %1249 = vmatprep.subr.bf16.mxu0 %v9953_v11 }
 0x16f   :  { %1250 = vmatpush1.bf16.msra.mxu0 %v9951_v12 }
 0x170   :  { %1251 = vmatprep.subr.bf16.mxu0 %v9956_v13 }
 0x173   :  { %1252 = vmatpush1.bf16.msra.mxu0 %v9954_v14  ;;  %v1303_v14 = vld [vmem:[%s14607_s3 + $0x48] sm:$0xff] }
 0x174   :  { %1253 = vmatprep.subr.bf16.mxu0 %v9959_v15  ;;  %v1307_v15 = vld [vmem:[%s14607_s3 + $0x68] sm:$0xff] }
 0x177   :  { %1254 = vmatpush1.bf16.msra.mxu0 %v9957_v16 }
 0x178   :  { %1255 = vmatprep.subr.bf16.mxu0 %v9962_v17 }
 0x17b   :  { %1256 = vmatpush1.bf16.msra.mxu0 %v9960_v18 }
 0x17c   :  { %1257 = vmatprep.subr.bf16.mxu0 %v9965_v19  ;;  %v8753_v19 = vcombine.high %v1303_v14, %v1307_v15 }
 0x17f   :  { %1258 = vmatpush1.bf16.msra.mxu0 %v9963_v20  ;;  %v1311_v20 = vld [vmem:[%s14607_s3 + $0x88] sm:$0xff] }
 0x180   :  { %1259 = vmatprep.subr.bf16.mxu0 %v9968_v21  ;;  %v1315_v21 = vld [vmem:[%s14607_s3 + $0xa8] sm:$0xff] }
 0x183   :  { %1260 = vmatpush1.bf16.msra.mxu0 %v9966_v22  ;;  %v8752_v22 = vcombine.low %v1303_v14, %v1307_v15  ;;  %v10004_v14 = vld [vmem:[%s14608_s4 + $0x94] ss:$24 sps:$4 sm:$0xff]   ;;  %v10002_v15 = vld [vmem:[%s14608_s4 + $0x90] ss:$24 sps:$4 sm:$0xff]  }
 0x184   :  { %1261 = vmatprep.subr.bf16.mxu0 %v9971_v23  ;;  %v8761_v23 = vcombine.high %v1311_v20, %v1315_v21 }
 0x187   :  { %1262 = vmatpush1.bf16.msra.mxu0 %v9969_v25  ;;  %v1319_v25 = vld [vmem:[%s14607_s3 + $0xc8] sm:$0xff] }
 0x188   :  { %1263 = vmatprep.subr.bf16.mxu0 %v9974_v26  ;;  %v1323_v26 = vld [vmem:[%s14607_s3 + $0xe8] sm:$0xff] }
 0x18b   :  { %1264 = vmatpush1.bf16.msra.mxu0 %v9972_v27  ;;  %v8760_v27 = vcombine.low %v1311_v20, %v1315_v21  ;;  %v1403_v20 = vld [vmem:[%s14607_s3 + $0x368] sm:$0xff] }
 0x18c   :  { %1265 = vmatprep.subr.bf16.mxu0 %v9977_v28  ;;  %v8769_v28 = vcombine.high %v1319_v25, %v1323_v26 }
 0x18f   :  { %1266 = vmatpush1.bf16.msra.mxu0 %v9975_v29  ;;  %v1327_v29 = vld [vmem:[%s14607_s3 + $0x108] sm:$0xff] }
 0x190   :  { %1267 = vmatprep.subr.bf16.mxu0 %v9980_v30  ;;  %v1331_v30 = vld [vmem:[%s14607_s3 + $0x128] sm:$0xff] }
 0x191   :  { %v8776_v38 = vcombine.low %v1327_v29, %v1331_v30 }
 0x193   :  { %1268 = vmatpush1.bf16.msra.mxu0 %v9978_v31  ;;  %v8768_v31 = vcombine.low %v1319_v25, %v1323_v26  ;;  %v1407_v26 = vld [vmem:[%s14607_s3 + $0x388] sm:$0xff] }
 0x194   :  { %1269 = vmatprep.subr.bf16.mxu0 %v9983_v32  ;;  %v8777_v32 = vcombine.high %v1327_v29, %v1331_v30  ;;  %v10010_v29 = vld [vmem:[%s14608_s4 + $0xf4] ss:$24 sps:$4 sm:$0xff]   ;;  %v10008_v30 = vld [vmem:[%s14608_s4 + $0xf0] ss:$24 sps:$4 sm:$0xff]  }
 0x197   :  { %1270 = vmatpush1.bf16.msra.mxu0 %v9981_v35  ;;  %v1335_v35 = vld [vmem:[%s14607_s3 + $0x148] sm:$0xff] }
 0x198   :  { %1271 = vmatprep.subr.bf16.mxu0 %v9986_v37  ;;  %v1339_v37 = vld [vmem:[%s14607_s3 + $0x168] sm:$0xff] }
 0x19b   :  { %1272 = vmatpush1.bf16.msra.mxu0 %v9984_v39  ;;  %v8785_v39 = vcombine.high %v1335_v35, %v1339_v37 }
 0x19c   :  { %1273 = vmatprep.subr.bf16.mxu0 %v9989_v40  ;;  %v1343_v40 = vld [vmem:[%s14607_s3 + $0x188] sm:$0xff] }
 0x19d   :  { %v8792_v45 = vcombine.low %v1343_v40, %v1347_v41 }
 0x19f   :  { %1274 = vmatpush1.bf16.msra.mxu0 %v9987_v42  ;;  %v8784_v42 = vcombine.low %v1335_v35, %v1339_v37  ;;  %v1419_v35 = vld [vmem:[%s14607_s3 + $0x3e8] sm:$0xff] }
 0x1a0   :  { %1275 = vmatprep.subr.bf16.mxu0 %v9992_v59  ;;  %v8793_v59 = vcombine.high %v1343_v40, %v1347_v41  ;;  %v1296_v41 = vld [vmem:[%s14607_s3 + $0x10] sm:$0xff] }
 0x1a3   :  { %1276 = vmatpush1.bf16.msra.mxu0 %v9990_v44  ;;  %v1355_v44 = vld [vmem:[%s14607_s3 + $0x1e8] sm:$0xff] }
 0x1a4   :  { %v8800_v48 = vcombine.low %v1351_v43, %v1355_v44  ;;  %4636 = vmatprep.subr.bf16.mxu0 %v9995_v54  ;;  %v1312_v54 = vld [vmem:[%s14607_s3 + $0x90] sm:$0xff] }
 0x1a6   :  { %1278 = vmatmul.mubr.bf16.vlgmr.msra.gmra.mrb[8].mxu0 %v340_v62  ;;  %v8801_v62 = vcombine.high %v1351_v43, %v1355_v44  ;;  %v10016_v43 = vld [vmem:[%s14608_s4 + $0x154] ss:$24 sps:$4 sm:$0xff]   ;;  %v10014_v44 = vld [vmem:[%s14608_s4 + $0x150] ss:$24 sps:$4 sm:$0xff]  }
 0x1a7   :  { %4637 = vmatpush1.bf16.msra.mxu0 %v9993_v55  ;;  %v1316_v55 = vld [vmem:[%s14607_s3 + $0xb0] sm:$0xff] }
 0x1a8   :  { %4638 = vmatprep.subr.bf16.mxu0 %v9998_v24  ;;  %v1324_v24 = vld [vmem:[%s14607_s3 + $0xf0] sm:$0xff] }
 0x279   :  { %v1279_v6 = vpop.f32.mrb[8].mxu0 }
 0x27a   :  { %v9712_v7 = vadd.f32 %v1279_v6, %v475_v1  ;;  %v1281_v8 = vpop.f32.mrb[9].mxu0  ;;  %v9996_v1 = vld [vmem:[%s14608_s4 + $0x30] ss:$24 sps:$4 sm:$0xff]  }
 0x27b   :  { %v9713_v9 = vadd.f32 %v1281_v8, %v479_v4  ;;  %v1283_v10 = vpop.f32.mrb[10].mxu0  ;;  %v8816_v4 = vcombine.low %v1367_v52, %v1371_v53  ;;  %v1383_v6 = vld [vmem:[%s14607_s3 + $0x2c8] sm:$0xff]  ;;  %v8825_v8 = vcombine.high %v1375_v63, %v1379_v0  ;;  %4639 = vmatpush1.bf16.msra.mxu0 %v9996_v1  ;;  %v8763_v1 = vcombine.high %v1312_v54, %v1316_v55 }
 0x27c   :  { %vm1286_vm10 = vcmp.gt.f32.partialorder %v9712_v7, 0.0  ;;  %v1288_v5 = vmul.f32 0.01, %v9712_v7  ;;  %v1284_v11 = vpop.f32.mrb[11].mxu0  ;;  %v9999_v10 = vld [vmem:[%s14608_s4 + $0x60] ss:$24 sps:$4 sm:$0xff]  }
 0x27d   :  { %vm1287_vm11 = vcmp.gt.f32.partialorder %v9713_v9, 0.0  ;;  %v1289_v12 = vmul.f32 0.01, %v9713_v9  ;;  %v1391_v11 = vld [vmem:[%s14607_s3 + $0x308] sm:$0xff] }
 0x27e   :  { %v1290_v13 = vsel %vm1286_vm10, %v9712_v7, %v1288_v5  ;;  %v1387_v7 = vld [vmem:[%s14607_s3 + $0x2e8] sm:$0xff]  ;;  %v8824_v5 = vcombine.low %v1375_v63, %v1379_v0 }
 0x27f   :  { %v1291_v16 = vsel %vm1287_vm11, %v9713_v9, %v1289_v12  ;;  %v11761_v18 = vpack.c.bf16 %v1290_v13, %v1290_v13  ;;  %v10001_v9 = vld [vmem:[%s14608_s4 + $0x64] ss:$24 sps:$4 sm:$0xff]   ;;  %v1395_v12 = vld [vmem:[%s14607_s3 + $0x328] sm:$0xff]  ;;  %v8833_v13 = vcombine.high %v1383_v6, %v1387_v7 }
 0x280   :  { %v11759_v17 = vpack.c.bf16 %v1291_v16, %v1291_v16  ;;  %4640 = vmatprep.subr.bf16.mxu0 %v10001_v9  ;;  %v8832_v16 = vcombine.low %v1383_v6, %v1387_v7  ;;  %v8841_v21 = vcombine.high %v1391_v11, %v1395_v12  ;;  %v8840_v25 = vcombine.low %v1391_v11, %v1395_v12  ;;  %v10023_v63 = vld [vmem:[%s14608_s4 + $0x1b0] ss:$24 sps:$4 sm:$0xff]   ;;  %v10031_v6 = vld [vmem:[%s14608_s4 + $0x1e4] ss:$24 sps:$4 sm:$0xff]   ;;  %v10037_v11 = vld [vmem:[%s14608_s4 + $0x214] ss:$24 sps:$4 sm:$0xff]  }
 0x281   :  { %4641 = vmatpush1.bf16.msra.mxu0 %v9999_v10  ;;  %v8762_v7 = vcombine.low %v1312_v54, %v1316_v55  ;;  %v1332_v9 = vld [vmem:[%s14607_s3 + $0x130] sm:$0xff] }
 0x282   :  { %2136 = vmatprep.mubr.bf16.mxu1 %v11759_v17  ;;  %4642 = vmatprep.subr.bf16.mxu0 %v10004_v14  ;;  %v1340_v14 = vld [vmem:[%s14607_s3 + $0x170] sm:$0xff] }
 0x283   :  { %2137 = vmatmul.mubr.bf16.vlgmr.msra.gmra.mrb[8].mxu1 %v11761_v18  ;;  %v1388_v54 = vld [vmem:[%s14607_s3 + $0x2f0] sm:$0xff] }
 0x284   :  { %2146 = vmatpush1.bf16.msra.mxu1 %v8744_v3  ;;  %2177 = vmatprep.mubr.bf16.mxu1 %v11759_v17  ;;  %v8817_v3 = vcombine.high %v1367_v52, %v1371_v53 }
 0x285   :  { %2147 = vmatprep.subr.bf16.mxu1 %v8753_v19  ;;  %v1399_v19 = vld [vmem:[%s14607_s3 + $0x348] sm:$0xff]  ;;  %4643 = vmatpush1.bf16.msra.mxu0 %v10002_v15 }
 0x288   :  { %2148 = vmatpush1.bf16.msra.mxu1 %v8752_v22  ;;  %v10007_v22 = vld [vmem:[%s14608_s4 + $0xc4] ss:$24 sps:$4 sm:$0xff]  }
 0x289   :  { %2149 = vmatprep.subr.bf16.mxu1 %v8761_v23  ;;  %v10005_v23 = vld [vmem:[%s14608_s4 + $0xc0] ss:$24 sps:$4 sm:$0xff]   ;;  %4644 = vmatprep.subr.bf16.mxu0 %v10007_v22  ;;  %v1348_v22 = vld [vmem:[%s14607_s3 + $0x1b0] sm:$0xff] }
 0x28a   :  { %4645 = vmatpush1.bf16.msra.mxu0 %v10005_v23 }
 0x28b   :  { %4646 = vmatprep.subr.bf16.mxu0 %v10010_v29  ;;  %v1352_v29 = vld [vmem:[%s14607_s3 + $0x1d0] sm:$0xff] }
 0x28c   :  { %2150 = vmatpush1.bf16.msra.mxu1 %v8760_v27  ;;  %v1411_v27 = vld [vmem:[%s14607_s3 + $0x3a8] sm:$0xff] }
 0x28d   :  { %2151 = vmatprep.subr.bf16.mxu1 %v8769_v28  ;;  %v8849_v28 = vcombine.high %v1399_v19, %v1403_v20  ;;  %v8857_v37 = vcombine.high %v1407_v26, %v1411_v27  ;;  %v8856_v40 = vcombine.low %v1407_v26, %v1411_v27  ;;  %v10049_v26 = vld [vmem:[%s14608_s4 + $0x274] ss:$24 sps:$4 sm:$0xff]  }
 0x28e   :  { %4647 = vmatpush1.bf16.msra.mxu0 %v10008_v30  ;;  %v1356_v30 = vld [vmem:[%s14607_s3 + $0x1f0] sm:$0xff] }
 0x290   :  { %2152 = vmatpush1.bf16.msra.mxu1 %v8768_v31  ;;  %v8848_v31 = vcombine.low %v1399_v19, %v1403_v20  ;;  %v10043_v19 = vld [vmem:[%s14608_s4 + $0x244] ss:$24 sps:$4 sm:$0xff]  }
 0x291   :  { %2153 = vmatprep.subr.bf16.mxu1 %v8777_v32  ;;  %v1415_v32 = vld [vmem:[%s14607_s3 + $0x3c8] sm:$0xff] }
 0x294   :  { %2154 = vmatpush1.bf16.msra.mxu1 %v8776_v38  ;;  %v10013_v38 = vld [vmem:[%s14608_s4 + $0x124] ss:$24 sps:$4 sm:$0xff]  }
 0x295   :  { %2155 = vmatprep.subr.bf16.mxu1 %v8785_v39  ;;  %v10011_v39 = vld [vmem:[%s14608_s4 + $0x120] ss:$24 sps:$4 sm:$0xff]   ;;  %4648 = vmatprep.subr.bf16.mxu0 %v10013_v38  ;;  %v1360_v38 = vld [vmem:[%s14607_s3 + $0x210] sm:$0xff] }
 0x296   :  { %4649 = vmatpush1.bf16.msra.mxu0 %v10011_v39  ;;  %v1364_v39 = vld [vmem:[%s14607_s3 + $0x230] sm:$0xff] }
 0x297   :  { %4650 = vmatprep.subr.bf16.mxu0 %v10016_v43  ;;  %v1372_v43 = vld [vmem:[%s14607_s3 + $0x270] sm:$0xff] }
 0x298   :  { %2156 = vmatpush1.bf16.msra.mxu1 %v8784_v42  ;;  %v1300_v42 = vld [vmem:[%s14607_s3 + $0x30] sm:$0xff] }
 0x299   :  { %2157 = vmatprep.subr.bf16.mxu1 %v8793_v59  ;;  %v8865_v59 = vcombine.high %v1415_v32, %v1419_v35  ;;  %v8747_v47 = vcombine.high %v1296_v41, %v1300_v42  ;;  %v8746_v52 = vcombine.low %v1296_v41, %v1300_v42  ;;  %v10059_v41 = vld [vmem:[%s14608_s4 + $0x2d0] ss:$24 sps:$4 sm:$0xff]   ;;  %v8802_v42 = vcombine.low %v1352_v29, %v1356_v30 }
 0x29a   :  { %4651 = vmatpush1.bf16.msra.mxu0 %v10014_v44  ;;  %v8811_v44 = vcombine.high %v1360_v38, %v1364_v39 }
 0x29c   :  { %2158 = vmatpush1.bf16.msra.mxu1 %v8792_v45  ;;  %v8864_v45 = vcombine.low %v1415_v32, %v1419_v35  ;;  %v10053_v32 = vld [vmem:[%s14608_s4 + $0x2a0] ss:$24 sps:$4 sm:$0xff]  }
 0x29d   :  { %2159 = vmatprep.subr.bf16.mxu1 %v8801_v62  ;;  %v1304_v62 = vld [vmem:[%s14607_s3 + $0x50] sm:$0xff] }
 0x29e   :  { %v8755_v53 = vcombine.high %v1304_v62, %v1308_v46  ;;  %v8754_v0 = vcombine.low %v1304_v62, %v1308_v46  ;;  %v8810_v62 = vcombine.low %v1360_v38, %v1364_v39 }
 0x2a0   :  { %2160 = vmatpush1.bf16.msra.mxu1 %v8800_v48  ;;  %v10019_v48 = vld [vmem:[%s14608_s4 + $0x184] ss:$24 sps:$4 sm:$0xff]  }
 0x2a1   :  { %2161 = vmatprep.subr.bf16.mxu1 %v8809_v49  ;;  %v10017_v49 = vld [vmem:[%s14608_s4 + $0x180] ss:$24 sps:$4 sm:$0xff]   ;;  %4652 = vmatprep.subr.bf16.mxu0 %v10019_v48  ;;  %v1380_v48 = vld [vmem:[%s14607_s3 + $0x2b0] sm:$0xff] }
 0x2a2   :  { %4653 = vmatpush1.bf16.msra.mxu0 %v10017_v49 }
 0x2a4   :  { %2162 = vmatpush1.bf16.msra.mxu1 %v8808_v56  ;;  %v10025_v56 = vld [vmem:[%s14608_s4 + $0x1b4] ss:$24 sps:$4 sm:$0xff]  }
 0x2a5   :  { %2163 = vmatprep.subr.bf16.mxu1 %v8817_v3  ;;  %v1320_v3 = vld [vmem:[%s14607_s3 + $0xd0] sm:$0xff]  ;;  %4654 = vmatprep.subr.bf16.mxu0 %v10025_v56 }
 0x2a6   :  { %4655 = vmatpush1.bf16.msra.mxu0 %v10023_v63  ;;  %v8771_v10 = vcombine.high %v1320_v3, %v1324_v24  ;;  %v8770_v12 = vcombine.low %v1320_v3, %v1324_v24  ;;  %v1392_v63 = vld [vmem:[%s14607_s3 + $0x310] sm:$0xff] }
 0x2a7   :  { %4656 = vmatprep.subr.bf16.mxu0 %v10031_v6 }
 0x2a8   :  { %2164 = vmatpush1.bf16.msra.mxu1 %v8816_v4  ;;  %v10029_v4 = vld [vmem:[%s14608_s4 + $0x1e0] ss:$24 sps:$4 sm:$0xff]  }
 0x2a9   :  { %2165 = vmatprep.subr.bf16.mxu1 %v8825_v8  ;;  %v1328_v8 = vld [vmem:[%s14607_s3 + $0x110] sm:$0xff] }
 0x2aa   :  { %4657 = vmatpush1.bf16.msra.mxu0 %v10029_v4  ;;  %v8779_v15 = vcombine.high %v1328_v8, %v1332_v9  ;;  %v8778_v20 = vcombine.low %v1328_v8, %v1332_v9  ;;  %v1404_v4 = vld [vmem:[%s14607_s3 + $0x370] sm:$0xff] }
 0x2ab   :  { %4658 = vmatprep.subr.bf16.mxu0 %v10037_v11  ;;  %v1408_v8 = vld [vmem:[%s14607_s3 + $0x390] sm:$0xff] }
 0x2ac   :  { %2166 = vmatpush1.bf16.msra.mxu1 %v8824_v5  ;;  %v10035_v5 = vld [vmem:[%s14608_s4 + $0x210] ss:$24 sps:$4 sm:$0xff]  }
 0x2ad   :  { %2167 = vmatprep.subr.bf16.mxu1 %v8833_v13  ;;  %v1336_v13 = vld [vmem:[%s14607_s3 + $0x150] sm:$0xff] }
 0x2ae   :  { %4659 = vmatpush1.bf16.msra.mxu0 %v10035_v5  ;;  %v8787_v23 = vcombine.high %v1336_v13, %v1340_v14  ;;  %v8786_v27 = vcombine.low %v1336_v13, %v1340_v14  ;;  %v1412_v9 = vld [vmem:[%s14607_s3 + $0x3b0] sm:$0xff] }
 0x2af   :  { %4660 = vmatprep.subr.bf16.mxu0 %v10043_v19  ;;  %v8859_v5 = vcombine.high %v1408_v8, %v1412_v9  ;;  %v1416_v11 = vld [vmem:[%s14607_s3 + $0x3d0] sm:$0xff]  ;;  %v8858_v13 = vcombine.low %v1408_v8, %v1412_v9  ;;  %v1389_v8 = vld [vmem:[%s14607_s3 + $0x2f8] sm:$0xff] }
 0x2b0   :  { %2168 = vmatpush1.bf16.msra.mxu1 %v8832_v16  ;;  %v10041_v16 = vld [vmem:[%s14608_s4 + $0x240] ss:$24 sps:$4 sm:$0xff]  }
 0x2b1   :  { %2169 = vmatprep.subr.bf16.mxu1 %v8841_v21  ;;  %v1344_v21 = vld [vmem:[%s14607_s3 + $0x190] sm:$0xff] }
 0x2b2   :  { %4661 = vmatpush1.bf16.msra.mxu0 %v10041_v16  ;;  %v8794_v35 = vcombine.low %v1344_v21, %v1348_v22  ;;  %v1301_v16 = vld [vmem:[%s14607_s3 + $0x38] sm:$0xff] }
 0x2b3   :  { %4662 = vmatprep.subr.bf16.mxu0 %v10049_v26  ;;  %v1313_v26 = vld [vmem:[%s14607_s3 + $0x98] sm:$0xff] }
 0x2b4   :  { %2170 = vmatpush1.bf16.msra.mxu1 %v8840_v25  ;;  %v10047_v25 = vld [vmem:[%s14608_s4 + $0x270] ss:$24 sps:$4 sm:$0xff]  }
 0x2b5   :  { %2171 = vmatprep.subr.bf16.mxu1 %v8849_v28  ;;  %v8795_v28 = vcombine.high %v1344_v21, %v1348_v22  ;;  %v1305_v21 = vld [vmem:[%s14607_s3 + $0x58] sm:$0xff] }
 0x2b6   :  { %4663 = vmatpush1.bf16.msra.mxu0 %v10047_v25  ;;  %v1309_v22 = vld [vmem:[%s14607_s3 + $0x78] sm:$0xff] }
 0x2b7   :  { %v8757_v25 = vcombine.high %v1305_v21, %v1309_v22 }
 0x2b8   :  { %2172 = vmatpush1.bf16.msra.mxu1 %v8848_v31  ;;  %v10055_v31 = vld [vmem:[%s14608_s4 + $0x2a4] ss:$24 sps:$4 sm:$0xff]  }
 0x2b9   :  { %2173 = vmatprep.subr.bf16.mxu1 %v8857_v37  ;;  %4664 = vmatprep.subr.bf16.mxu0 %v10055_v31  ;;  %v8803_v37 = vcombine.high %v1352_v29, %v1356_v30  ;;  %v1321_v30 = vld [vmem:[%s14607_s3 + $0xd8] sm:$0xff] }
 0x2ba   :  { %4665 = vmatpush1.bf16.msra.mxu0 %v10053_v32  ;;  %v1325_v31 = vld [vmem:[%s14607_s3 + $0xf8] sm:$0xff] }
 0x2bb   :  { %v8772_v38 = vcombine.low %v1321_v30, %v1325_v31 }
 0x2bc   :  { %2174 = vmatpush1.bf16.msra.mxu1 %v8856_v40  ;;  %v10061_v40 = vld [vmem:[%s14608_s4 + $0x2d4] ss:$24 sps:$4 sm:$0xff]  }
 0x2bd   :  { %2175 = vmatprep.subr.bf16.mxu1 %v8865_v59  ;;  %v1368_v59 = vld [vmem:[%s14607_s3 + $0x250] sm:$0xff]  ;;  %4666 = vmatprep.subr.bf16.mxu0 %v10061_v40  ;;  %v1337_v40 = vld [vmem:[%s14607_s3 + $0x158] sm:$0xff] }
 0x2be   :  { %4667 = vmatpush1.bf16.msra.mxu0 %v10059_v41  ;;  %v8819_v46 = vcombine.high %v1368_v59, %v1372_v43  ;;  %v8818_v49 = vcombine.low %v1368_v59, %v1372_v43  ;;  %v1341_v41 = vld [vmem:[%s14607_s3 + $0x178] sm:$0xff] }
 0x2bf   :  { %v8789_v59 = vcombine.high %v1337_v40, %v1341_v41  ;;  %v1345_v43 = vld [vmem:[%s14607_s3 + $0x198] sm:$0xff] }
 0x2c0   :  { %2176 = vmatpush1.bf16.msra.mxu1 %v8864_v45  ;;  %v10067_v45 = vld [vmem:[%s14608_s4 + $0x304] ss:$24 sps:$4 sm:$0xff]  }
 0x2c1   :  { %2186 = vmatprep.subr.bf16.mxu1 %v8747_v47  ;;  %4677 = vmatprep.subr.bf16.mxu0 %v10067_v45  ;;  %v1376_v47 = vld [vmem:[%s14607_s3 + $0x290] sm:$0xff]  ;;  %v8788_v45 = vcombine.low %v1337_v40, %v1341_v41  ;;  %v10044_v40 = vld [vmem:[%s14608_s4 + $0xc8] ss:$24 sps:$4 sm:$0xff]  }
 0x2c2   :  { %v8826_v55 = vcombine.low %v1376_v47, %v1380_v48  ;;  %v12179_v41 = vld [vmem:[%s14606_s7 + $0xa] sm:$0xff] }
 0x2c3   :  { %2178 = vmatmul.mubr.bf16.vlgmr.msra.gmra.mrb[12].mxu1 %v11761_v18 }
 0x2c4   :  { %2187 = vmatpush1.bf16.msra.mxu1 %v8746_v52  ;;  %2218 = vmatprep.mubr.bf16.mxu1 %v11759_v17  ;;  %v8827_v52 = vcombine.high %v1376_v47, %v1380_v48  ;;  %v1357_v47 = vld [vmem:[%s14607_s3 + $0x1f8] sm:$0xff] }
 0x2c5   :  { %2188 = vmatprep.subr.bf16.mxu1 %v8755_v53  ;;  %v1384_v53 = vld [vmem:[%s14607_s3 + $0x2d0] sm:$0xff] }
 0x2c6   :  { %v8835_v56 = vcombine.high %v1384_v53, %v1388_v54  ;;  %v8834_v3 = vcombine.low %v1384_v53, %v1388_v54  ;;  %v1365_v53 = vld [vmem:[%s14607_s3 + $0x238] sm:$0xff] }
 0x2c8   :  { %2189 = vmatpush1.bf16.msra.mxu1 %v8754_v0  ;;  %v1396_v0 = vld [vmem:[%s14607_s3 + $0x330] sm:$0xff] }
 0x2c9   :  { %2190 = vmatprep.subr.bf16.mxu1 %v8763_v1  ;;  %v8843_v24 = vcombine.high %v1392_v63, %v1396_v0  ;;  %v1400_v1 = vld [vmem:[%s14607_s3 + $0x350] sm:$0xff]  ;;  %v8842_v6 = vcombine.low %v1392_v63, %v1396_v0  ;;  %v1373_v63 = vld [vmem:[%s14607_s3 + $0x278] sm:$0xff] }
 0x2cc   :  { %2191 = vmatpush1.bf16.msra.mxu1 %v8762_v7  ;;  %v8851_v7 = vcombine.high %v1400_v1, %v1404_v4 }
 0x2cd   :  { %2192 = vmatprep.subr.bf16.mxu1 %v8771_v10  ;;  %v8850_v10 = vcombine.low %v1400_v1, %v1404_v4  ;;  %v1381_v1 = vld [vmem:[%s14607_s3 + $0x2b8] sm:$0xff] }
 0x2d0   :  { %2193 = vmatpush1.bf16.msra.mxu1 %v8770_v12  ;;  %v1420_v12 = vld [vmem:[%s14607_s3 + $0x3f0] sm:$0xff] }
 0x2d1   :  { %2194 = vmatprep.subr.bf16.mxu1 %v8779_v15  ;;  %v8867_v14 = vcombine.high %v1416_v11, %v1420_v12  ;;  %v1297_v15 = vld [vmem:[%s14607_s3 + $0x18] sm:$0xff]  ;;  %v8866_v19 = vcombine.low %v1416_v11, %v1420_v12 }
 0x2d2   :  { %v1397_v11 = vld [vmem:[%s14607_s3 + $0x338] sm:$0xff] }
 0x2d4   :  { %2195 = vmatpush1.bf16.msra.mxu1 %v8778_v20  ;;  %v8749_v20 = vcombine.high %v1297_v15, %v1301_v16 }
 0x2d5   :  { %2196 = vmatprep.subr.bf16.mxu1 %v8787_v23  ;;  %v8748_v23 = vcombine.low %v1297_v15, %v1301_v16  ;;  %v1405_v15 = vld [vmem:[%s14607_s3 + $0x378] sm:$0xff] }
 0x2d8   :  { %2197 = vmatpush1.bf16.msra.mxu1 %v8786_v27  ;;  %v1317_v27 = vld [vmem:[%s14607_s3 + $0xb8] sm:$0xff] }
 0x2d9   :  { %2198 = vmatprep.subr.bf16.mxu1 %v8795_v28  ;;  %v8756_v28 = vcombine.low %v1305_v21, %v1309_v22  ;;  %v8765_v29 = vcombine.high %v1313_v26, %v1317_v27  ;;  %v8764_v32 = vcombine.low %v1313_v26, %v1317_v27  ;;  %v1413_v21 = vld [vmem:[%s14607_s3 + $0x3b8] sm:$0xff] }
 0x2da   :  { %v1421_v26 = vld [vmem:[%s14607_s3 + $0x3f8] sm:$0xff] }
 0x2dc   :  { %2199 = vmatpush1.bf16.msra.mxu1 %v8794_v35  ;;  %v8773_v35 = vcombine.high %v1321_v30, %v1325_v31  ;;  %v10022_v30 = vld [vmem:[%s14608_s4 + $0xc] ss:$24 sps:$4 sm:$0xff]   ;;  %v10020_v31 = vld [vmem:[%s14608_s4 + $0x8] ss:$24 sps:$4 sm:$0xff]  }
 0x2dd   :  { %2200 = vmatprep.subr.bf16.mxu1 %v8803_v37  ;;  %v1329_v37 = vld [vmem:[%s14607_s3 + $0x118] sm:$0xff] }
 0x2e0   :  { %2201 = vmatpush1.bf16.msra.mxu1 %v8802_v42 }
 0x2e1   :  { %2202 = vmatprep.subr.bf16.mxu1 %v8811_v44  ;;  %v1349_v44 = vld [vmem:[%s14607_s3 + $0x1b8] sm:$0xff] }
 0x2e2   :  { %v8796_v48 = vcombine.low %v1345_v43, %v1349_v44 }
 0x2e4   :  { %2203 = vmatpush1.bf16.msra.mxu1 %v8810_v62  ;;  %v8797_v62 = vcombine.high %v1345_v43, %v1349_v44  ;;  %v1427_v43 = vrot.slane %v12179_v41, %v11307_v58  ;;  %v1431_v44 = vrot.slane %v12179_v41, %v11315_v60 }
 0x2e5   :  { %2204 = vmatprep.subr.bf16.mxu1 %v8819_v46  ;;  %v1353_v46 = vld [vmem:[%s14607_s3 + $0x1d8] sm:$0xff] }
 0x2e6   :  { %v8804_v54 = vcombine.low %v1353_v46, %v1357_v47 }
 0x2e8   :  { %2205 = vmatpush1.bf16.msra.mxu1 %v8818_v49  ;;  %v8805_v49 = vcombine.high %v1353_v46, %v1357_v47 }
 0x2e9   :  { %2206 = vmatprep.subr.bf16.mxu1 %v8827_v52  ;;  %v1361_v52 = vld [vmem:[%s14607_s3 + $0x218] sm:$0xff] }
 0x2ea   :  { %v8812_v0 = vcombine.low %v1361_v52, %v1365_v53 }
 0x2ec   :  { %2207 = vmatpush1.bf16.msra.mxu1 %v8826_v55  ;;  %v8813_v55 = vcombine.high %v1361_v52, %v1365_v53 }
 0x2ed   :  { %2208 = vmatprep.subr.bf16.mxu1 %v8835_v56  ;;  %v1369_v56 = vld [vmem:[%s14607_s3 + $0x258] sm:$0xff] }
 0x2ee   :  { %v8820_v4 = vcombine.low %v1369_v56, %v1373_v63 }
 0x2f0   :  { %2209 = vmatpush1.bf16.msra.mxu1 %v8834_v3  ;;  %v8821_v3 = vcombine.high %v1369_v56, %v1373_v63 }
 0x2f1   :  { %2210 = vmatprep.subr.bf16.mxu1 %v8843_v24  ;;  %v1377_v24 = vld [vmem:[%s14607_s3 + $0x298] sm:$0xff] }
 0x2f2   :  { %v8828_v9 = vcombine.low %v1377_v24, %v1381_v1 }
 0x2f4   :  { %2211 = vmatpush1.bf16.msra.mxu1 %v8842_v6  ;;  %v8829_v6 = vcombine.high %v1377_v24, %v1381_v1 }
 0x2f5   :  { %2212 = vmatprep.subr.bf16.mxu1 %v8851_v7  ;;  %v1385_v7 = vld [vmem:[%s14607_s3 + $0x2d8] sm:$0xff] }
 0x2f6   :  { %v8836_v12 = vcombine.low %v1385_v7, %v1389_v8 }
 0x2f8   :  { %2213 = vmatpush1.bf16.msra.mxu1 %v8850_v10  ;;  %v8837_v10 = vcombine.high %v1385_v7, %v1389_v8  ;;  %v10073_v7 = vld [vmem:[%s14608_s4 + $0x334] ss:$24 sps:$4 sm:$0xff]   ;;  %v10068_v8 = vld [vmem:[%s14608_s4 + $0x188] ss:$24 sps:$4 sm:$0xff]  }
 0x2f9   :  { %2214 = vmatprep.subr.bf16.mxu1 %v8859_v5  ;;  %v1393_v5 = vld [vmem:[%s14607_s3 + $0x318] sm:$0xff] }
 0x2fa   :  { %v8844_v16 = vcombine.low %v1393_v5, %v1397_v11 }
 0x2fc   :  { %2215 = vmatpush1.bf16.msra.mxu1 %v8858_v13  ;;  %v8845_v13 = vcombine.high %v1393_v5, %v1397_v11  ;;  %v10079_v5 = vld [vmem:[%s14608_s4 + $0x364] ss:$24 sps:$4 sm:$0xff]   ;;  %v10074_v11 = vld [vmem:[%s14608_s4 + $0x1b8] ss:$24 sps:$4 sm:$0xff]  }
 0x2fd   :  { %2216 = vmatprep.subr.bf16.mxu1 %v8867_v14  ;;  %v1401_v14 = vld [vmem:[%s14607_s3 + $0x358] sm:$0xff] }
 0x2fe   :  { %v8852_v22 = vcombine.low %v1401_v14, %v1405_v15 }
 0x300   :  { %2217 = vmatpush1.bf16.msra.mxu1 %v8866_v19  ;;  %v8853_v19 = vcombine.high %v1401_v14, %v1405_v15  ;;  %v10085_v14 = vld [vmem:[%s14608_s4 + $0x394] ss:$24 sps:$4 sm:$0xff]   ;;  %v10080_v15 = vld [vmem:[%s14608_s4 + $0x1e8] ss:$24 sps:$4 sm:$0xff]  }
 0x301   :  { %2227 = vmatprep.subr.bf16.mxu1 %v8749_v20  ;;  %v1409_v20 = vld [vmem:[%s14607_s3 + $0x398] sm:$0xff] }
 0x302   :  { %v8860_v27 = vcombine.low %v1409_v20, %v1413_v21 }
 0x303   :  { %2219 = vmatmul.mubr.bf16.vlgmr.msra.gmra.mrb[16].mxu1 %v11761_v18 }
 0x304   :  { %2228 = vmatpush1.bf16.msra.mxu1 %v8748_v23  ;;  %2259 = vmatprep.mubr.bf16.mxu1 %v11759_v17  ;;  %v1333_v17 = vld [vmem:[%s14607_s3 + $0x138] sm:$0xff]  ;;  %v8861_v23 = vcombine.high %v1409_v20, %v1413_v21 }
 0x305   :  { %2229 = vmatprep.subr.bf16.mxu1 %v8757_v25  ;;  %v8781_v39 = vcombine.high %v1329_v37, %v1333_v17  ;;  %v8780_v42 = vcombine.low %v1329_v37, %v1333_v17  ;;  %v1417_v25 = vld [vmem:[%s14607_s3 + $0x3d8] sm:$0xff]  ;;  %v10034_v37 = vld [vmem:[%s14608_s4 + $0x6c] ss:$24 sps:$4 sm:$0xff]   ;;  %v10032_v17 = vld [vmem:[%s14608_s4 + $0x68] ss:$24 sps:$4 sm:$0xff]  }
 0x306   :  { %v10091_v20 = vld [vmem:[%s14608_s4 + $0x3c4] ss:$24 sps:$4 sm:$0xff]   ;;  %v10086_v21 = vld [vmem:[%s14608_s4 + $0x218] ss:$24 sps:$4 sm:$0xff]  }
 0x308   :  { %2230 = vmatpush1.bf16.msra.mxu1 %v8756_v28  ;;  %v8869_v28 = vcombine.high %v1417_v25, %v1421_v26 }
 0x309   :  { %2231 = vmatprep.subr.bf16.mxu1 %v8765_v29  ;;  %v8868_v29 = vcombine.low %v1417_v25, %v1421_v26  ;;  %v10097_v25 = vld [vmem:[%s14608_s4 + $0x3f4] ss:$24 sps:$4 sm:$0xff]   ;;  %v10092_v26 = vld [vmem:[%s14608_s4 + $0x248] ss:$24 sps:$4 sm:$0xff]  }
 0x30c   :  { %2232 = vmatpush1.bf16.msra.mxu1 %v8764_v32  ;;  %v10028_v32 = vld [vmem:[%s14608_s4 + $0x3c] ss:$24 sps:$4 sm:$0xff]  }
 0x30d   :  { %2233 = vmatprep.subr.bf16.mxu1 %v8773_v35  ;;  %v10026_v35 = vld [vmem:[%s14608_s4 + $0x38] ss:$24 sps:$4 sm:$0xff]  }
 0x310   :  { %2234 = vmatpush1.bf16.msra.mxu1 %v8772_v38  ;;  %v10038_v38 = vld [vmem:[%s14608_s4 + $0x98] ss:$24 sps:$4 sm:$0xff]  }
 0x311   :  { %2235 = vmatprep.subr.bf16.mxu1 %v8781_v39  ;;  %v10046_v39 = vld [vmem:[%s14608_s4 + $0xcc] ss:$24 sps:$4 sm:$0xff]  }
 0x314   :  { %2236 = vmatpush1.bf16.msra.mxu1 %v8780_v42  ;;  %v10052_v42 = vld [vmem:[%s14608_s4 + $0xfc] ss:$24 sps:$4 sm:$0xff]  }
 0x315   :  { %2237 = vmatprep.subr.bf16.mxu1 %v8789_v59  ;;  %v10050_v59 = vld [vmem:[%s14608_s4 + $0xf8] ss:$24 sps:$4 sm:$0xff]  }
 0x318   :  { %2238 = vmatpush1.bf16.msra.mxu1 %v8788_v45  ;;  %v10058_v45 = vld [vmem:[%s14608_s4 + $0x12c] ss:$24 sps:$4 sm:$0xff]  }
 0x319   :  { %2239 = vmatprep.subr.bf16.mxu1 %v8797_v62 }
 0x31c   :  { %2240 = vmatpush1.bf16.msra.mxu1 %v8796_v48  ;;  %v10056_v48 = vld [vmem:[%s14608_s4 + $0x128] ss:$24 sps:$4 sm:$0xff]  }
 0x31d   :  { %2241 = vmatprep.subr.bf16.mxu1 %v8805_v49 }
 0x320   :  { %2242 = vmatpush1.bf16.msra.mxu1 %v8804_v54 }
 0x321   :  { %2243 = vmatprep.subr.bf16.mxu1 %v8813_v55  ;;  %v10064_v55 = vld [vmem:[%s14608_s4 + $0x15c] ss:$24 sps:$4 sm:$0xff]  }
 0x324   :  { %2244 = vmatpush1.bf16.msra.mxu1 %v8812_v0  ;;  %v10062_v0 = vld [vmem:[%s14608_s4 + $0x158] ss:$24 sps:$4 sm:$0xff]  }
 0x325   :  { %2245 = vmatprep.subr.bf16.mxu1 %v8821_v3  ;;  %v10065_v3 = vld [vmem:[%s14608_s4 + $0x300] ss:$24 sps:$4 sm:$0xff]  }
 0x328   :  { %2246 = vmatpush1.bf16.msra.mxu1 %v8820_v4  ;;  %v10070_v4 = vld [vmem:[%s14608_s4 + $0x18c] ss:$24 sps:$4 sm:$0xff]  }
 0x329   :  { %2247 = vmatprep.subr.bf16.mxu1 %v8829_v6 }
 0x32c   :  { %2248 = vmatpush1.bf16.msra.mxu1 %v8828_v9  ;;  %v10071_v9 = vld [vmem:[%s14608_s4 + $0x330] ss:$24 sps:$4 sm:$0xff]  }
 0x32d   :  { %2249 = vmatprep.subr.bf16.mxu1 %v8837_v10  ;;  %v10076_v10 = vld [vmem:[%s14608_s4 + $0x1bc] ss:$24 sps:$4 sm:$0xff]  }
 0x330   :  { %2250 = vmatpush1.bf16.msra.mxu1 %v8836_v12  ;;  %v10077_v12 = vld [vmem:[%s14608_s4 + $0x360] ss:$24 sps:$4 sm:$0xff]  }
 0x331   :  { %2251 = vmatprep.subr.bf16.mxu1 %v8845_v13  ;;  %v10082_v13 = vld [vmem:[%s14608_s4 + $0x1ec] ss:$24 sps:$4 sm:$0xff]  }
 0x334   :  { %2252 = vmatpush1.bf16.msra.mxu1 %v8844_v16  ;;  %v10083_v16 = vld [vmem:[%s14608_s4 + $0x390] ss:$24 sps:$4 sm:$0xff]  }
 0x335   :  { %2253 = vmatprep.subr.bf16.mxu1 %v8853_v19  ;;  %v10088_v19 = vld [vmem:[%s14608_s4 + $0x21c] ss:$24 sps:$4 sm:$0xff]  }
 0x338   :  { %2254 = vmatpush1.bf16.msra.mxu1 %v8852_v22  ;;  %v10089_v22 = vld [vmem:[%s14608_s4 + $0x3c0] ss:$24 sps:$4 sm:$0xff]  }
 0x339   :  { %2255 = vmatprep.subr.bf16.mxu1 %v8861_v23  ;;  %v10094_v23 = vld [vmem:[%s14608_s4 + $0x24c] ss:$24 sps:$4 sm:$0xff]  }
 0x33c   :  { %2256 = vmatpush1.bf16.msra.mxu1 %v8860_v27  ;;  %v10095_v27 = vld [vmem:[%s14608_s4 + $0x3f0] ss:$24 sps:$4 sm:$0xff]  }
 0x33d   :  { %2257 = vmatprep.subr.bf16.mxu1 %v8869_v28  ;;  %v10100_v28 = vld [vmem:[%s14608_s4 + $0x27c] ss:$24 sps:$4 sm:$0xff]  }
 0x340   :  { %2258 = vmatpush1.bf16.msra.mxu1 %v8868_v29  ;;  %v10103_v29 = vld [vmem:[%s14608_s4 + $0x424] ss:$24 sps:$4 sm:$0xff]  }
 0x341   :  { %4800 = vmatprep.subr.bf16.mxu1 %v10022_v30  ;;  %v10098_v30 = vld [vmem:[%s14608_s4 + $0x278] ss:$24 sps:$4 sm:$0xff]  }
 0x343   :  { %2260 = vmatmul.mubr.bf16.vlgmr.msra.gmra.mrb[20].mxu1 %v11761_v18  ;;  %v10040_v18 = vld [vmem:[%s14608_s4 + $0x9c] ss:$24 sps:$4 sm:$0xff]  }
 0x344   :  { %4801 = vmatpush1.bf16.msra.mxu1 %v10020_v31  ;;  %v10101_v31 = vld [vmem:[%s14608_s4 + $0x420] ss:$24 sps:$4 sm:$0xff]  }
 0x345   :  { %4802 = vmatprep.subr.bf16.mxu1 %v10028_v32  ;;  %v10106_v32 = vld [vmem:[%s14608_s4 + $0x2ac] ss:$24 sps:$4 sm:$0xff]  }
 0x348   :  { %4803 = vmatpush1.bf16.msra.mxu1 %v10026_v35  ;;  %v10109_v35 = vld [vmem:[%s14608_s4 + $0x454] ss:$24 sps:$4 sm:$0xff]  }
 0x349   :  { %4804 = vmatprep.subr.bf16.mxu1 %v10034_v37  ;;  %v10104_v37 = vld [vmem:[%s14608_s4 + $0x2a8] ss:$24 sps:$4 sm:$0xff]  }
 0x34c   :  { %4805 = vmatpush1.bf16.msra.mxu1 %v10032_v17  ;;  %v10107_v17 = vld [vmem:[%s14608_s4 + $0x450] ss:$24 sps:$4 sm:$0xff]  }
 0x34d   :  { %4806 = vmatprep.subr.bf16.mxu1 %v10040_v18  ;;  %v10112_v18 = vld [vmem:[%s14608_s4 + $0x2dc] ss:$24 sps:$4 sm:$0xff]  }
 0x350   :  { %4807 = vmatpush1.bf16.msra.mxu1 %v10038_v38  ;;  %v10115_v38 = vld [vmem:[%s14608_s4 + $0x484] ss:$24 sps:$4 sm:$0xff]  }
 0x351   :  { %4808 = vmatprep.subr.bf16.mxu1 %v10046_v39  ;;  %v10110_v39 = vld [vmem:[%s14608_s4 + $0x2d8] ss:$24 sps:$4 sm:$0xff]  }
 0x354   :  { %4809 = vmatpush1.bf16.msra.mxu1 %v10044_v40  ;;  %v10113_v40 = vld [vmem:[%s14608_s4 + $0x480] ss:$24 sps:$4 sm:$0xff]  }
 0x355   :  { %4810 = vmatprep.subr.bf16.mxu1 %v10052_v42  ;;  %v10118_v42 = vld [vmem:[%s14608_s4 + $0x30c] ss:$24 sps:$4 sm:$0xff]  }
 0x356   :  { %v2138_v62 = vpop.f32.mrb[8].mxu1 }
 0x357   :  { %v2139_v46 = vadd.f32 %v2138_v62, %v1427_v43  ;;  %v2140_v47 = vpop.f32.mrb[9].mxu1  ;;  %v10116_v43 = vld [vmem:[%s14608_s4 + $0x308] ss:$24 sps:$4 sm:$0xff]   ;;  %v10127_v62 = vld [vmem:[%s14608_s4 + $0x4e4] ss:$24 sps:$4 sm:$0xff]  }
 0x358   :  { %v2141_v49 = vadd.f32 %v2140_v47, %v1431_v44  ;;  %4811 = vmatpush1.bf16.msra.mxu1 %v10050_v59  ;;  %v2142_v52 = vpop.f32.mrb[10].mxu1  ;;  %v10121_v59 = vld [vmem:[%s14608_s4 + $0x4b4] ss:$24 sps:$4 sm:$0xff]   ;;  %v10119_v44 = vld [vmem:[%s14608_s4 + $0x4b0] ss:$24 sps:$4 sm:$0xff]  }
 0x359   :  { %vm2268_vm12 = vcmp.gt.f32.partialorder %v2139_v46, 0.0  ;;  %v2276_v53 = vmul.f32 0.01, %v2139_v46  ;;  %v2143_v54 = vpop.f32.mrb[11].mxu1  ;;  %4812 = vmatprep.subr.bf16.mxu1 %v10058_v45  ;;  %v10124_v45 = vld [vmem:[%s14608_s4 + $0x33c] ss:$24 sps:$4 sm:$0xff]  }
 0x35a   :  { %vm2269_vm13 = vcmp.gt.f32.partialorder %v2141_v49, 0.0  ;;  %v2277_v56 = vmul.f32 0.01, %v2141_v49  ;;  %v10125_v47 = vld [vmem:[%s14608_s4 + $0x4e0] ss:$24 sps:$4 sm:$0xff]  }
 0x35b   :  { %v2284_v63 = vsel %vm2268_vm12, %v2139_v46, %v2276_v53  ;;  %v10122_v46 = vld [vmem:[%s14608_s4 + $0x338] ss:$24 sps:$4 sm:$0xff]   ;;  %v10128_v52 = vld [vmem:[%s14608_s4 + $0x368] ss:$24 sps:$4 sm:$0xff]   ;;  %v10136_v54 = vld [vmem:[%s14608_s4 + $0x39c] ss:$24 sps:$4 sm:$0xff]  }
 0x35c   :  { %4813 = vmatpush1.bf16.msra.mxu1 %v10056_v48  ;;  %v2285_v24 = vsel %vm2269_vm13, %v2141_v49, %v2277_v56  ;;  %v12211_v6 = vpack.c.bf16 %v2284_v63, %v2284_v63  ;;  %v10130_v48 = vld [vmem:[%s14608_s4 + $0x36c] ss:$24 sps:$4 sm:$0xff]   ;;  %v10131_v53 = vld [vmem:[%s14608_s4 + $0x510] ss:$24 sps:$4 sm:$0xff]   ;;  %v10137_v63 = vld [vmem:[%s14608_s4 + $0x540] ss:$24 sps:$4 sm:$0xff]  }
 0x35d   :  { %4814 = vmatprep.subr.bf16.mxu1 %v10064_v55  ;;  %v12206_v1 = vpack.c.bf16 %v2285_v24, %v2285_v24  ;;  %v10133_v49 = vld [vmem:[%s14608_s4 + $0x514] ss:$24 sps:$4 sm:$0xff]   ;;  %v10139_v55 = vld [vmem:[%s14608_s4 + $0x544] ss:$24 sps:$4 sm:$0xff]   ;;  %v10134_v56 = vld [vmem:[%s14608_s4 + $0x398] ss:$24 sps:$4 sm:$0xff]  }
 0x35e   :  { %v10140_v24 = vld [vmem:[%s14608_s4 + $0x3c8] ss:$24 sps:$4 sm:$0xff]  }
 0x35f   :  { %4668 = vmatprep.mubr.bf16.mxu0 %v12206_v1  ;;  %4832 = vmatprep.mubr.bf16.mxu1 %v12206_v1 }
 0x360   :  { %4815 = vmatpush1.bf16.msra.mxu1 %v10062_v0  ;;  %4669 = vmatmul.mubr.bf16.vlgmr.msra.gmra.mrb[12].mxu0 %v12211_v6  ;;  %v10142_v0 = vld [vmem:[%s14608_s4 + $0x3cc] ss:$24 sps:$4 sm:$0xff]  }
 0x361   :  { %4678 = vmatpush1.bf16.msra.mxu0 %v10065_v3  ;;  %4816 = vmatprep.subr.bf16.mxu1 %v10070_v4  ;;  %v10145_v3 = vld [vmem:[%s14608_s4 + $0x574] ss:$24 sps:$4 sm:$0xff]   ;;  %v10143_v4 = vld [vmem:[%s14608_s4 + $0x570] ss:$24 sps:$4 sm:$0xff]  }
 0x362   :  { %4679 = vmatprep.subr.bf16.mxu0 %v10073_v7  ;;  %v10148_v7 = vld [vmem:[%s14608_s4 + $0x3fc] ss:$24 sps:$4 sm:$0xff]  }
 0x364   :  { %4817 = vmatpush1.bf16.msra.mxu1 %v10068_v8  ;;  %v10151_v8 = vld [vmem:[%s14608_s4 + $0x5a4] ss:$24 sps:$4 sm:$0xff]  }
 0x365   :  { %4680 = vmatpush1.bf16.msra.mxu0 %v10071_v9  ;;  %4818 = vmatprep.subr.bf16.mxu1 %v10076_v10  ;;  %v1435_v9 = vrot.slane %v12179_v41, %v11406_v51  ;;  %v1439_v10 = vrot.slane %v12179_v41, %v11318_v61 }
 0x366   :  { %4681 = vmatprep.subr.bf16.mxu0 %v10079_v5  ;;  %v10146_v5 = vld [vmem:[%s14608_s4 + $0x3f8] ss:$24 sps:$4 sm:$0xff]  }
 0x368   :  { %4819 = vmatpush1.bf16.msra.mxu1 %v10074_v11  ;;  %v10149_v11 = vld [vmem:[%s14608_s4 + $0x5a0] ss:$24 sps:$4 sm:$0xff]  }
 0x369   :  { %4682 = vmatpush1.bf16.msra.mxu0 %v10077_v12  ;;  %4820 = vmatprep.subr.bf16.mxu1 %v10082_v13  ;;  %v10154_v12 = vld [vmem:[%s14608_s4 + $0x42c] ss:$24 sps:$4 sm:$0xff]  }
 0x36a   :  { %4683 = vmatprep.subr.bf16.mxu0 %v10085_v14  ;;  %v10157_v14 = vld [vmem:[%s14608_s4 + $0x5d4] ss:$24 sps:$4 sm:$0xff]  }
 0x36c   :  { %4821 = vmatpush1.bf16.msra.mxu1 %v10080_v15 }
 0x36d   :  { %4684 = vmatpush1.bf16.msra.mxu0 %v10083_v16  ;;  %4822 = vmatprep.subr.bf16.mxu1 %v10088_v19 }
 0x36e   :  { %4685 = vmatprep.subr.bf16.mxu0 %v10091_v20 }
 0x370   :  { %4823 = vmatpush1.bf16.msra.mxu1 %v10086_v21  ;;  %v10152_v21 = vld [vmem:[%s14608_s4 + $0x428] ss:$24 sps:$4 sm:$0xff]  }
 0x371   :  { %4686 = vmatpush1.bf16.msra.mxu0 %v10089_v22  ;;  %4824 = vmatprep.subr.bf16.mxu1 %v10094_v23  ;;  %v10155_v22 = vld [vmem:[%s14608_s4 + $0x5d0] ss:$24 sps:$4 sm:$0xff]  }
 0x372   :  { %4687 = vmatprep.subr.bf16.mxu0 %v10097_v25 }
 0x374   :  { %4825 = vmatpush1.bf16.msra.mxu1 %v10092_v26  ;;  %v10160_v26 = vld [vmem:[%s14608_s4 + $0x45c] ss:$24 sps:$4 sm:$0xff]  }
 0x375   :  { %4688 = vmatpush1.bf16.msra.mxu0 %v10095_v27  ;;  %4826 = vmatprep.subr.bf16.mxu1 %v10100_v28  ;;  %v10163_v28 = vld [vmem:[%s14608_s4 + $0x604] ss:$24 sps:$4 sm:$0xff]  }
 0x376   :  { %4689 = vmatprep.subr.bf16.mxu0 %v10103_v29 }
 0x378   :  { %4827 = vmatpush1.bf16.msra.mxu1 %v10098_v30 }
 0x379   :  { %4690 = vmatpush1.bf16.msra.mxu0 %v10101_v31  ;;  %4828 = vmatprep.subr.bf16.mxu1 %v10106_v32  ;;  %v10158_v31 = vld [vmem:[%s14608_s4 + $0x458] ss:$24 sps:$4 sm:$0xff]  }
 0x37a   :  { %4691 = vmatprep.subr.bf16.mxu0 %v10109_v35  ;;  %v10161_v35 = vld [vmem:[%s14608_s4 + $0x600] ss:$24 sps:$4 sm:$0xff]  }
 0x37c   :  { %4829 = vmatpush1.bf16.msra.mxu1 %v10104_v37  ;;  %v10166_v37 = vld [vmem:[%s14608_s4 + $0x48c] ss:$24 sps:$4 sm:$0xff]  }
 0x37d   :  { %4692 = vmatpush1.bf16.msra.mxu0 %v10107_v17  ;;  %4830 = vmatprep.subr.bf16.mxu1 %v10112_v18  ;;  %v10169_v18 = vld [vmem:[%s14608_s4 + $0x634] ss:$24 sps:$4 sm:$0xff]  }
 0x37e   :  { %4693 = vmatprep.subr.bf16.mxu0 %v10115_v38  ;;  %v10164_v38 = vld [vmem:[%s14608_s4 + $0x488] ss:$24 sps:$4 sm:$0xff]  }
 0x380   :  { %4831 = vmatpush1.bf16.msra.mxu1 %v10110_v39  ;;  %v10167_v39 = vld [vmem:[%s14608_s4 + $0x630] ss:$24 sps:$4 sm:$0xff]  }
 0x381   :  { %4694 = vmatpush1.bf16.msra.mxu0 %v10113_v40  ;;  %4841 = vmatprep.subr.bf16.mxu1 %v10118_v42  ;;  %v10172_v40 = vld [vmem:[%s14608_s4 + $0x4bc] ss:$24 sps:$4 sm:$0xff]  }
 0x382   :  { %4695 = vmatprep.subr.bf16.mxu0 %v10121_v59  ;;  %v10175_v42 = vld [vmem:[%s14608_s4 + $0x664] ss:$24 sps:$4 sm:$0xff]   ;;  %v10170_v59 = vld [vmem:[%s14608_s4 + $0x4b8] ss:$24 sps:$4 sm:$0xff]  }
 0x383   :  { %4833 = vmatmul.mubr.bf16.vlgmr.msra.gmra.mrb[24].mxu1 %v12211_v6 }
 0x384   :  { %4842 = vmatpush1.bf16.msra.mxu1 %v10116_v43  ;;  %v10173_v43 = vld [vmem:[%s14608_s4 + $0x660] ss:$24 sps:$4 sm:$0xff]  }
 0x385   :  { %4696 = vmatpush1.bf16.msra.mxu0 %v10119_v44  ;;  %4843 = vmatprep.subr.bf16.mxu1 %v10124_v45  ;;  %v10178_v44 = vld [vmem:[%s14608_s4 + $0x4ec] ss:$24 sps:$4 sm:$0xff]  }
 0x386   :  { %4697 = vmatprep.subr.bf16.mxu0 %v10127_v62  ;;  %v10181_v45 = vld [vmem:[%s14608_s4 + $0x694] ss:$24 sps:$4 sm:$0xff]   ;;  %v10176_v62 = vld [vmem:[%s14608_s4 + $0x4e8] ss:$24 sps:$4 sm:$0xff]  }
 0x388   :  { %4844 = vmatpush1.bf16.msra.mxu1 %v10122_v46  ;;  %v10179_v46 = vld [vmem:[%s14608_s4 + $0x690] ss:$24 sps:$4 sm:$0xff]  }
 0x389   :  { %4698 = vmatpush1.bf16.msra.mxu0 %v10125_v47  ;;  %4845 = vmatprep.subr.bf16.mxu1 %v10130_v48  ;;  %v10184_v47 = vld [vmem:[%s14608_s4 + $0x51c] ss:$24 sps:$4 sm:$0xff]  }
 0x38a   :  { %4699 = vmatprep.subr.bf16.mxu0 %v10133_v49  ;;  %v10187_v48 = vld [vmem:[%s14608_s4 + $0x6c4] ss:$24 sps:$4 sm:$0xff]   ;;  %v10182_v49 = vld [vmem:[%s14608_s4 + $0x518] ss:$24 sps:$4 sm:$0xff]  }
 0x38c   :  { %4846 = vmatpush1.bf16.msra.mxu1 %v10128_v52  ;;  %v10185_v52 = vld [vmem:[%s14608_s4 + $0x6c0] ss:$24 sps:$4 sm:$0xff]  }
 0x38d   :  { %4700 = vmatpush1.bf16.msra.mxu0 %v10131_v53  ;;  %4847 = vmatprep.subr.bf16.mxu1 %v10136_v54  ;;  %v10190_v53 = vld [vmem:[%s14608_s4 + $0x54c] ss:$24 sps:$4 sm:$0xff]  }
 0x38e   :  { %4701 = vmatprep.subr.bf16.mxu0 %v10139_v55  ;;  %v10193_v54 = vld [vmem:[%s14608_s4 + $0x6f4] ss:$24 sps:$4 sm:$0xff]   ;;  %v10188_v55 = vld [vmem:[%s14608_s4 + $0x548] ss:$24 sps:$4 sm:$0xff]  }
 0x390   :  { %4848 = vmatpush1.bf16.msra.mxu1 %v10134_v56  ;;  %v10191_v56 = vld [vmem:[%s14608_s4 + $0x6f0] ss:$24 sps:$4 sm:$0xff]  }
 0x391   :  { %4702 = vmatpush1.bf16.msra.mxu0 %v10137_v63  ;;  %4849 = vmatprep.subr.bf16.mxu1 %v10142_v0  ;;  %v10196_v63 = vld [vmem:[%s14608_s4 + $0x57c] ss:$24 sps:$4 sm:$0xff]  }
 0x392   :  { %4703 = vmatprep.subr.bf16.mxu0 %v10145_v3  ;;  %v10199_v0 = vld [vmem:[%s14608_s4 + $0x724] ss:$24 sps:$4 sm:$0xff]   ;;  %v10194_v3 = vld [vmem:[%s14608_s4 + $0x578] ss:$24 sps:$4 sm:$0xff]  }
 0x394   :  { %4850 = vmatpush1.bf16.msra.mxu1 %v10140_v24  ;;  %v10197_v24 = vld [vmem:[%s14608_s4 + $0x720] ss:$24 sps:$4 sm:$0xff]  }
 0x395   :  { %4704 = vmatpush1.bf16.msra.mxu0 %v10143_v4  ;;  %4851 = vmatprep.subr.bf16.mxu1 %v10148_v7  ;;  %v10202_v4 = vld [vmem:[%s14608_s4 + $0x5ac] ss:$24 sps:$4 sm:$0xff]  }
 0x396   :  { %v2179_v13 = vpop.f32.mrb[12].mxu1  ;;  %4705 = vmatprep.subr.bf16.mxu0 %v10151_v8  ;;  %v10205_v7 = vld [vmem:[%s14608_s4 + $0x754] ss:$24 sps:$4 sm:$0xff]   ;;  %v10200_v8 = vld [vmem:[%s14608_s4 + $0x5a8] ss:$24 sps:$4 sm:$0xff]  }
 0x397   :  { %v2180_v15 = vadd.f32 %v2179_v13, %v1435_v9  ;;  %v2181_v16 = vpop.f32.mrb[13].mxu1  ;;  %v10203_v9 = vld [vmem:[%s14608_s4 + $0x750] ss:$24 sps:$4 sm:$0xff]   ;;  %v10214_v13 = vld [vmem:[%s14608_s4 + $0x60c] ss:$24 sps:$4 sm:$0xff]  }
 0x398   :  { %v2182_v19 = vadd.f32 %v2181_v16, %v1439_v10  ;;  %v2183_v20 = vpop.f32.mrb[14].mxu1  ;;  %4852 = vmatpush1.bf16.msra.mxu1 %v10146_v5  ;;  %v10208_v10 = vld [vmem:[%s14608_s4 + $0x5dc] ss:$24 sps:$4 sm:$0xff]   ;;  %v10215_v16 = vld [vmem:[%s14608_s4 + $0x7b0] ss:$24 sps:$4 sm:$0xff]  }
 0x399   :  { %vm2270_vm14 = vcmp.gt.f32.partialorder %v2180_v15, 0.0  ;;  %v2278_v23 = vmul.f32 0.01, %v2180_v15  ;;  %v2184_v25 = vpop.f32.mrb[15].mxu1  ;;  %4706 = vmatpush1.bf16.msra.mxu0 %v10149_v11  ;;  %4853 = vmatprep.subr.bf16.mxu1 %v10154_v12  ;;  %v10211_v5 = vld [vmem:[%s14608_s4 + $0x784] ss:$24 sps:$4 sm:$0xff]  }
 0x39a   :  { %vm2271_vm15 = vcmp.gt.f32.partialorder %v2182_v19, 0.0  ;;  %v2279_v27 = vmul.f32 0.01, %v2182_v19  ;;  %4707 = vmatprep.subr.bf16.mxu0 %v10157_v14  ;;  %v10206_v11 = vld [vmem:[%s14608_s4 + $0x5d8] ss:$24 sps:$4 sm:$0xff]  }
 0x39b   :  { %v2286_v29 = vsel %vm2270_vm14, %v2180_v15, %v2278_v23  ;;  %v10209_v12 = vld [vmem:[%s14608_s4 + $0x780] ss:$24 sps:$4 sm:$0xff]   ;;  %v10217_v14 = vld [vmem:[%s14608_s4 + $0x7b4] ss:$24 sps:$4 sm:$0xff]   ;;  %v10223_v20 = vld [vmem:[%s14608_s4 + $0x7e4] ss:$24 sps:$4 sm:$0xff]  }
 0x39c   :  { %4854 = vmatpush1.bf16.msra.mxu1 %v10152_v21  ;;  %v2287_v30 = vsel %vm2271_vm15, %v2182_v19, %v2279_v27  ;;  %v12415_v17 = vpack.c.bf16 %v2286_v29, %v2286_v29  ;;  %v10212_v15 = vld [vmem:[%s14608_s4 + $0x608] ss:$24 sps:$4 sm:$0xff]   ;;  %v10220_v19 = vld [vmem:[%s14608_s4 + $0x63c] ss:$24 sps:$4 sm:$0xff]   ;;  %v10218_v21 = vld [vmem:[%s14608_s4 + $0x638] ss:$24 sps:$4 sm:$0xff]  }
 0x39d   :  { %4708 = vmatpush1.bf16.msra.mxu0 %v10155_v22  ;;  %v12407_v32 = vpack.c.bf16 %v2287_v30, %v2287_v30  ;;  %4855 = vmatprep.subr.bf16.mxu1 %v10160_v26  ;;  %v10221_v22 = vld [vmem:[%s14608_s4 + $0x7e0] ss:$24 sps:$4 sm:$0xff]   ;;  %v10226_v23 = vld [vmem:[%s14608_s4 + $0x66c] ss:$24 sps:$4 sm:$0xff]   ;;  %v10227_v27 = vld [vmem:[%s14608_s4 + $0x810] ss:$24 sps:$4 sm:$0xff]  }
 0x39e   :  { %4718 = vmatprep.subr.bf16.mxu0 %v10163_v28  ;;  %v10229_v25 = vld [vmem:[%s14608_s4 + $0x814] ss:$24 sps:$4 sm:$0xff]   ;;  %v10224_v26 = vld [vmem:[%s14608_s4 + $0x668] ss:$24 sps:$4 sm:$0xff]   ;;  %v10235_v29 = vld [vmem:[%s14608_s4 + $0x844] ss:$24 sps:$4 sm:$0xff]  }
 0x39f   :  { %4709 = vmatprep.mubr.bf16.mxu0 %v12407_v32  ;;  %4873 = vmatprep.mubr.bf16.mxu1 %v12407_v32  ;;  %v10232_v28 = vld [vmem:[%s14608_s4 + $0x69c] ss:$24 sps:$4 sm:$0xff]   ;;  %v10230_v30 = vld [vmem:[%s14608_s4 + $0x698] ss:$24 sps:$4 sm:$0xff]  }
 0x3a0   :  { %4710 = vmatmul.mubr.bf16.vlgmr.msra.gmra.mrb[12].mxu0 %v12415_v17  ;;  %4856 = vmatpush1.bf16.msra.mxu1 %v10158_v31  ;;  %v10233_v31 = vld [vmem:[%s14608_s4 + $0x840] ss:$24 sps:$4 sm:$0xff]  }
 0x3a1   :  { %4719 = vmatpush1.bf16.msra.mxu0 %v10161_v35  ;;  %4857 = vmatprep.subr.bf16.mxu1 %v10166_v37  ;;  %v10238_v35 = vld [vmem:[%s14608_s4 + $0x6cc] ss:$24 sps:$4 sm:$0xff]  }
 0x3a2   :  { %4720 = vmatprep.subr.bf16.mxu0 %v10169_v18  ;;  %v10241_v37 = vld [vmem:[%s14608_s4 + $0x874] ss:$24 sps:$4 sm:$0xff]   ;;  %v10236_v18 = vld [vmem:[%s14608_s4 + $0x6c8] ss:$24 sps:$4 sm:$0xff]  }
 0x3a4   :  { %4858 = vmatpush1.bf16.msra.mxu1 %v10164_v38  ;;  %v10239_v38 = vld [vmem:[%s14608_s4 + $0x870] ss:$24 sps:$4 sm:$0xff]  }
 0x3a5   :  { %4721 = vmatpush1.bf16.msra.mxu0 %v10167_v39  ;;  %4859 = vmatprep.subr.bf16.mxu1 %v10172_v40  ;;  %v10244_v39 = vld [vmem:[%s14608_s4 + $0x6fc] ss:$24 sps:$4 sm:$0xff]  }
 0x3a6   :  { %4722 = vmatprep.subr.bf16.mxu0 %v10175_v42  ;;  %v10247_v40 = vld [vmem:[%s14608_s4 + $0x8a4] ss:$24 sps:$4 sm:$0xff]   ;;  %v1443_v42 = vrot.slane %v12179_v41, %v11587_v36 }
 0x3a8   :  { %4860 = vmatpush1.bf16.msra.mxu1 %v10170_v59  ;;  %v1447_v59 = vrot.slane %v12179_v41, %v11403_v50 }
 0x3a9   :  { %4723 = vmatpush1.bf16.msra.mxu0 %v10173_v43  ;;  %4861 = vmatprep.subr.bf16.mxu1 %v10178_v44  ;;  %v10242_v43 = vld [vmem:[%s14608_s4 + $0x6f8] ss:$24 sps:$4 sm:$0xff]  }
 0x3aa   :  { %4724 = vmatprep.subr.bf16.mxu0 %v10181_v45  ;;  %v10245_v44 = vld [vmem:[%s14608_s4 + $0x8a0] ss:$24 sps:$4 sm:$0xff]   ;;  %v10250_v45 = vld [vmem:[%s14608_s4 + $0x72c] ss:$24 sps:$4 sm:$0xff]  }
 0x3ac   :  { %4862 = vmatpush1.bf16.msra.mxu1 %v10176_v62 }
 0x3ad   :  { %4725 = vmatpush1.bf16.msra.mxu0 %v10179_v46  ;;  %4863 = vmatprep.subr.bf16.mxu1 %v10184_v47  ;;  %v10253_v46 = vld [vmem:[%s14608_s4 + $0x8d4] ss:$24 sps:$4 sm:$0xff]  }
 0x3ae   :  { %4726 = vmatprep.subr.bf16.mxu0 %v10187_v48 }
 0x3b0   :  { %4864 = vmatpush1.bf16.msra.mxu1 %v10182_v49 }
 0x3b1   :  { %4727 = vmatpush1.bf16.msra.mxu0 %v10185_v52  ;;  %4865 = vmatprep.subr.bf16.mxu1 %v10190_v53  ;;  %v10248_v53 = vld [vmem:[%s14608_s4 + $0x728] ss:$24 sps:$4 sm:$0xff]  }
 0x3b2   :  { %4728 = vmatprep.subr.bf16.mxu0 %v10193_v54  ;;  %v10251_v54 = vld [vmem:[%s14608_s4 + $0x8d0] ss:$24 sps:$4 sm:$0xff]  }
 0x3b4   :  { %4866 = vmatpush1.bf16.msra.mxu1 %v10188_v55 }
 0x3b5   :  { %4729 = vmatpush1.bf16.msra.mxu0 %v10191_v56  ;;  %4867 = vmatprep.subr.bf16.mxu1 %v10196_v63  ;;  %v10256_v63 = vld [vmem:[%s14608_s4 + $0x75c] ss:$24 sps:$4 sm:$0xff]  }
 0x3b6   :  { %4730 = vmatprep.subr.bf16.mxu0 %v10199_v0 }
 0x3b8   :  { %4868 = vmatpush1.bf16.msra.mxu1 %v10194_v3  ;;  %v10259_v3 = vld [vmem:[%s14608_s4 + $0x904] ss:$24 sps:$4 sm:$0xff]  }
 0x3b9   :  { %4731 = vmatpush1.bf16.msra.mxu0 %v10197_v24  ;;  %4869 = vmatprep.subr.bf16.mxu1 %v10202_v4 }
 0x3ba   :  { %4732 = vmatprep.subr.bf16.mxu0 %v10205_v7  ;;  %v10254_v7 = vld [vmem:[%s14608_s4 + $0x758] ss:$24 sps:$4 sm:$0xff]  }
 0x3bc   :  { %4870 = vmatpush1.bf16.msra.mxu1 %v10200_v8 }
 0x3bd   :  { %4733 = vmatpush1.bf16.msra.mxu0 %v10203_v9  ;;  %4871 = vmatprep.subr.bf16.mxu1 %v10208_v10  ;;  %v10257_v9 = vld [vmem:[%s14608_s4 + $0x900] ss:$24 sps:$4 sm:$0xff]   ;;  %v10262_v10 = vld [vmem:[%s14608_s4 + $0x78c] ss:$24 sps:$4 sm:$0xff]  }
 0x3be   :  { %4734 = vmatprep.subr.bf16.mxu0 %v10211_v5 }
 0x3c0   :  { %4872 = vmatpush1.bf16.msra.mxu1 %v10206_v11  ;;  %v10265_v11 = vld [vmem:[%s14608_s4 + $0x934] ss:$24 sps:$4 sm:$0xff]  }
 0x3c1   :  { %4735 = vmatpush1.bf16.msra.mxu0 %v10209_v12  ;;  %4882 = vmatprep.subr.bf16.mxu1 %v10214_v13  ;;  %v10260_v12 = vld [vmem:[%s14608_s4 + $0x788] ss:$24 sps:$4 sm:$0xff]  }
 0x3c2   :  { %4736 = vmatprep.subr.bf16.mxu0 %v10217_v14  ;;  %v10263_v13 = vld [vmem:[%s14608_s4 + $0x930] ss:$24 sps:$4 sm:$0xff]   ;;  %v10268_v14 = vld [vmem:[%s14608_s4 + $0x7bc] ss:$24 sps:$4 sm:$0xff]  }
 0x3c3   :  { %4874 = vmatmul.mubr.bf16.vlgmr.msra.gmra.mrb[24].mxu1 %v12415_v17 }
 0x3c4   :  { %4883 = vmatpush1.bf16.msra.mxu1 %v10212_v15  ;;  %v10271_v15 = vld [vmem:[%s14608_s4 + $0x964] ss:$24 sps:$4 sm:$0xff]  }
 0x3c5   :  { %4737 = vmatpush1.bf16.msra.mxu0 %v10215_v16  ;;  %4884 = vmatprep.subr.bf16.mxu1 %v10220_v19  ;;  %v10266_v16 = vld [vmem:[%s14608_s4 + $0x7b8] ss:$24 sps:$4 sm:$0xff]  }
 0x3c6   :  { %4738 = vmatprep.subr.bf16.mxu0 %v10223_v20  ;;  %v10269_v19 = vld [vmem:[%s14608_s4 + $0x960] ss:$24 sps:$4 sm:$0xff]   ;;  %v10274_v20 = vld [vmem:[%s14608_s4 + $0x7ec] ss:$24 sps:$4 sm:$0xff]  }
 0x3c8   :  { %4885 = vmatpush1.bf16.msra.mxu1 %v10218_v21  ;;  %v10277_v21 = vld [vmem:[%s14608_s4 + $0x994] ss:$24 sps:$4 sm:$0xff]  }
 0x3c9   :  { %4739 = vmatpush1.bf16.msra.mxu0 %v10221_v22  ;;  %4886 = vmatprep.subr.bf16.mxu1 %v10226_v23  ;;  %v10272_v22 = vld [vmem:[%s14608_s4 + $0x7e8] ss:$24 sps:$4 sm:$0xff]  }
 0x3ca   :  { %4740 = vmatprep.subr.bf16.mxu0 %v10229_v25  ;;  %v10275_v23 = vld [vmem:[%s14608_s4 + $0x990] ss:$24 sps:$4 sm:$0xff]   ;;  %v10280_v25 = vld [vmem:[%s14608_s4 + $0x81c] ss:$24 sps:$4 sm:$0xff]  }
 0x3cc   :  { %4887 = vmatpush1.bf16.msra.mxu1 %v10224_v26  ;;  %v10283_v26 = vld [vmem:[%s14608_s4 + $0x9c4] ss:$24 sps:$4 sm:$0xff]  }
 0x3cd   :  { %4741 = vmatpush1.bf16.msra.mxu0 %v10227_v27  ;;  %4888 = vmatprep.subr.bf16.mxu1 %v10232_v28  ;;  %v10278_v27 = vld [vmem:[%s14608_s4 + $0x818] ss:$24 sps:$4 sm:$0xff]  }
 0x3ce   :  { %4742 = vmatprep.subr.bf16.mxu0 %v10235_v29  ;;  %v10281_v28 = vld [vmem:[%s14608_s4 + $0x9c0] ss:$24 sps:$4 sm:$0xff]   ;;  %v10286_v29 = vld [vmem:[%s14608_s4 + $0x84c] ss:$24 sps:$4 sm:$0xff]  }
 0x3d0   :  { %4889 = vmatpush1.bf16.msra.mxu1 %v10230_v30  ;;  %v10289_v30 = vld [vmem:[%s14608_s4 + $0x9f4] ss:$24 sps:$4 sm:$0xff]  }
 0x3d1   :  { %4743 = vmatpush1.bf16.msra.mxu0 %v10233_v31  ;;  %4890 = vmatprep.subr.bf16.mxu1 %v10238_v35  ;;  %v10284_v31 = vld [vmem:[%s14608_s4 + $0x848] ss:$24 sps:$4 sm:$0xff]  }
 0x3d2   :  { %4744 = vmatprep.subr.bf16.mxu0 %v10241_v37  ;;  %v10287_v35 = vld [vmem:[%s14608_s4 + $0x9f0] ss:$24 sps:$4 sm:$0xff]   ;;  %v10292_v37 = vld [vmem:[%s14608_s4 + $0x87c] ss:$24 sps:$4 sm:$0xff]  }
 0x3d4   :  { %4891 = vmatpush1.bf16.msra.mxu1 %v10236_v18  ;;  %v10295_v18 = vld [vmem:[%s14608_s4 + $0xa24] ss:$24 sps:$4 sm:$0xff]  }
 0x3d5   :  { %4745 = vmatpush1.bf16.msra.mxu0 %v10239_v38  ;;  %4892 = vmatprep.subr.bf16.mxu1 %v10244_v39  ;;  %v10290_v38 = vld [vmem:[%s14608_s4 + $0x878] ss:$24 sps:$4 sm:$0xff]  }
 0x3d6   :  { %v2220_v62 = vpop.f32.mrb[16].mxu1  ;;  %4746 = vmatprep.subr.bf16.mxu0 %v10247_v40  ;;  %v10293_v39 = vld [vmem:[%s14608_s4 + $0xa20] ss:$24 sps:$4 sm:$0xff]   ;;  %v10298_v40 = vld [vmem:[%s14608_s4 + $0x8ac] ss:$24 sps:$4 sm:$0xff]  }
 0x3d7   :  { %v2221_v47 = vadd.f32 %v2220_v62, %v1443_v42  ;;  %v2222_v48 = vpop.f32.mrb[17].mxu1  ;;  %v10301_v42 = vld [vmem:[%s14608_s4 + $0xa54] ss:$24 sps:$4 sm:$0xff]   ;;  %v10302_v62 = vld [vmem:[%s14608_s4 + $0x8d8] ss:$24 sps:$4 sm:$0xff]  }
 0x3d8   :  { %v2223_v49 = vadd.f32 %v2222_v48, %v1447_v59  ;;  %v2224_v52 = vpop.f32.mrb[18].mxu1  ;;  %4893 = vmatpush1.bf16.msra.mxu1 %v10242_v43  ;;  %v10296_v59 = vld [vmem:[%s14608_s4 + $0x8a8] ss:$24 sps:$4 sm:$0xff]   ;;  %v10313_v48 = vld [vmem:[%s14608_s4 + $0xab4] ss:$24 sps:$4 sm:$0xff]  }
 0x3d9   :  { %vm2272_vm0 = vcmp.gt.f32.partialorder %v2221_v47, 0.0  ;;  %v2280_v55 = vmul.f32 0.01, %v2221_v47  ;;  %v2225_v56 = vpop.f32.mrb[19].mxu1  ;;  %4747 = vmatpush1.bf16.msra.mxu0 %v10245_v44  ;;  %4894 = vmatprep.subr.bf16.mxu1 %v10250_v45  ;;  %v10299_v43 = vld [vmem:[%s14608_s4 + $0xa50] ss:$24 sps:$4 sm:$0xff]  }
 0x3da   :  { %vm2273_vm1 = vcmp.gt.f32.partialorder %v2223_v49, 0.0  ;;  %v2281_v0 = vmul.f32 0.01, %v2223_v49  ;;  %4748 = vmatprep.subr.bf16.mxu0 %v10253_v46  ;;  %v10304_v44 = vld [vmem:[%s14608_s4 + $0x8dc] ss:$24 sps:$4 sm:$0xff]  }
 0x3db   :  { %v2288_v24 = vsel %vm2272_vm0, %v2221_v47, %v2280_v55  ;;  %v10307_v45 = vld [vmem:[%s14608_s4 + $0xa84] ss:$24 sps:$4 sm:$0xff]   ;;  %v10305_v46 = vld [vmem:[%s14608_s4 + $0xa80] ss:$24 sps:$4 sm:$0xff]   ;;  %v10311_v52 = vld [vmem:[%s14608_s4 + $0xab0] ss:$24 sps:$4 sm:$0xff]  }
 0x3dc   :  { %4895 = vmatpush1.bf16.msra.mxu1 %v10248_v53  ;;  %v2289_v4 = vsel %vm2273_vm1, %v2223_v49, %v2281_v0  ;;  %v12619_v5 = vpack.c.bf16 %v2288_v24, %v2288_v24  ;;  %v10310_v47 = vld [vmem:[%s14608_s4 + $0x90c] ss:$24 sps:$4 sm:$0xff]   ;;  %v10308_v49 = vld [vmem:[%s14608_s4 + $0x908] ss:$24 sps:$4 sm:$0xff]   ;;  %v10316_v53 = vld [vmem:[%s14608_s4 + $0x93c] ss:$24 sps:$4 sm:$0xff]  }
 0x3dd   :  { %4749 = vmatpush1.bf16.msra.mxu0 %v10251_v54  ;;  %v12611_v8 = vpack.c.bf16 %v2289_v4, %v2289_v4  ;;  %4896 = vmatprep.subr.bf16.mxu1 %v10256_v63  ;;  %v10319_v54 = vld [vmem:[%s14608_s4 + $0xae4] ss:$24 sps:$4 sm:$0xff]   ;;  %v10314_v55 = vld [vmem:[%s14608_s4 + $0x938] ss:$24 sps:$4 sm:$0xff]   ;;  %v10325_v0 = vld [vmem:[%s14608_s4 + $0xb14] ss:$24 sps:$4 sm:$0xff]  }
 0x3de   :  { %4759 = vmatprep.subr.bf16.mxu0 %v10259_v3  ;;  %v10317_v56 = vld [vmem:[%s14608_s4 + $0xae0] ss:$24 sps:$4 sm:$0xff]   ;;  %v10322_v63 = vld [vmem:[%s14608_s4 + $0x96c] ss:$24 sps:$4 sm:$0xff]   ;;  %v10323_v24 = vld [vmem:[%s14608_s4 + $0xb10] ss:$24 sps:$4 sm:$0xff]  }
 0x3df   :  { %4750 = vmatprep.mubr.bf16.mxu0 %v12611_v8  ;;  %4914 = vmatprep.mubr.bf16.mxu1 %v12611_v8  ;;  %v10320_v3 = vld [vmem:[%s14608_s4 + $0x968] ss:$24 sps:$4 sm:$0xff]   ;;  %v10328_v4 = vld [vmem:[%s14608_s4 + $0x99c] ss:$24 sps:$4 sm:$0xff]   ;;  %vm8057_vm0 = vcmask 523264  }
 0x3e0   :  { %4751 = vmatmul.mubr.bf16.vlgmr.msra.gmra.mrb[12].mxu0 %v12619_v5  ;;  %4897 = vmatpush1.bf16.msra.mxu1 %v10254_v7  ;;  %v10331_v7 = vld [vmem:[%s14608_s4 + $0xb44] ss:$24 sps:$4 sm:$0xff]  }
 0x3e1   :  { %4760 = vmatpush1.bf16.msra.mxu0 %v10257_v9  ;;  %4898 = vmatprep.subr.bf16.mxu1 %v10262_v10  ;;  %v10326_v9 = vld [vmem:[%s14608_s4 + $0x998] ss:$24 sps:$4 sm:$0xff]  }
 0x3e2   :  { %4761 = vmatprep.subr.bf16.mxu0 %v10265_v11  ;;  %v10329_v10 = vld [vmem:[%s14608_s4 + $0xb40] ss:$24 sps:$4 sm:$0xff]   ;;  %v10334_v11 = vld [vmem:[%s14608_s4 + $0x9cc] ss:$24 sps:$4 sm:$0xff]  }
 0x3e4   :  { %4899 = vmatpush1.bf16.msra.mxu1 %v10260_v12  ;;  %v10337_v12 = vld [vmem:[%s14608_s4 + $0xb74] ss:$24 sps:$4 sm:$0xff]  }
 0x3e5   :  { %4762 = vmatpush1.bf16.msra.mxu0 %v10263_v13  ;;  %4900 = vmatprep.subr.bf16.mxu1 %v10268_v14  ;;  %v10332_v13 = vld [vmem:[%s14608_s4 + $0x9c8] ss:$24 sps:$4 sm:$0xff]  }
 0x3e6   :  { %4763 = vmatprep.subr.bf16.mxu0 %v10271_v15  ;;  %v10335_v14 = vld [vmem:[%s14608_s4 + $0xb70] ss:$24 sps:$4 sm:$0xff]   ;;  %v10340_v15 = vld [vmem:[%s14608_s4 + $0x9fc] ss:$24 sps:$4 sm:$0xff]  }
 0x3e8   :  { %4901 = vmatpush1.bf16.msra.mxu1 %v10266_v16  ;;  %v10343_v16 = vld [vmem:[%s14608_s4 + $0xba4] ss:$24 sps:$4 sm:$0xff]  }
 0x3e9   :  { %4764 = vmatpush1.bf16.msra.mxu0 %v10269_v19  ;;  %4902 = vmatprep.subr.bf16.mxu1 %v10274_v20  ;;  %v1451_v19 = vrot.slane %v12179_v41, %v71_v33  ;;  %v1455_v20 = vrot.slane %v12179_v41, %v75_v34  ;;  %v10349_v34 = vld [vmem:[%s14608_s4 + $0xbd4] ss:$24 sps:$4 sm:$0xff]  }
 0x3ea   :  { %4765 = vmatprep.subr.bf16.mxu0 %v10277_v21  ;;  %v10338_v21 = vld [vmem:[%s14608_s4 + $0x9f8] ss:$24 sps:$4 sm:$0xff]  }
 0x3ec   :  { %4903 = vmatpush1.bf16.msra.mxu1 %v10272_v22  ;;  %v10341_v22 = vld [vmem:[%s14608_s4 + $0xba0] ss:$24 sps:$4 sm:$0xff]  }
 0x3ed   :  { %4766 = vmatpush1.bf16.msra.mxu0 %v10275_v23  ;;  %4904 = vmatprep.subr.bf16.mxu1 %v10280_v25  ;;  %v10346_v23 = vld [vmem:[%s14608_s4 + $0xa2c] ss:$24 sps:$4 sm:$0xff]  }
 0x3ee   :  { %4767 = vmatprep.subr.bf16.mxu0 %v10283_v26 }
 0x3f0   :  { %4905 = vmatpush1.bf16.msra.mxu1 %v10278_v27 }
 0x3f1   :  { %4768 = vmatpush1.bf16.msra.mxu0 %v10281_v28  ;;  %4906 = vmatprep.subr.bf16.mxu1 %v10286_v29  ;;  %v10344_v28 = vld [vmem:[%s14608_s4 + $0xa28] ss:$24 sps:$4 sm:$0xff]  }
 0x3f2   :  { %4769 = vmatprep.subr.bf16.mxu0 %v10289_v30  ;;  %v10347_v29 = vld [vmem:[%s14608_s4 + $0xbd0] ss:$24 sps:$4 sm:$0xff]  }
 0x3f4   :  { %4907 = vmatpush1.bf16.msra.mxu1 %v10284_v31 }
 0x3f5   :  { %4770 = vmatpush1.bf16.msra.mxu0 %v10287_v35  ;;  %4908 = vmatprep.subr.bf16.mxu1 %v10292_v37  ;;  %v10352_v35 = vld [vmem:[%s14608_s4 + $0xa5c] ss:$24 sps:$4 sm:$0xff]  }
 0x3f6   :  { %4771 = vmatprep.subr.bf16.mxu0 %v10295_v18  ;;  %v10355_v18 = vld [vmem:[%s14608_s4 + $0x14] ss:$24 sps:$4 sm:$0xff]  }
 0x3f8   :  { %4909 = vmatpush1.bf16.msra.mxu1 %v10290_v38 }
 0x3f9   :  { %4772 = vmatpush1.bf16.msra.mxu0 %v10293_v39  ;;  %4910 = vmatprep.subr.bf16.mxu1 %v10298_v40  ;;  %v10350_v40 = vld [vmem:[%s14608_s4 + $0xa58] ss:$24 sps:$4 sm:$0xff]  }
 0x3fa   :  { %4773 = vmatprep.subr.bf16.mxu0 %v10301_v42 }
 0x3fc   :  { %4911 = vmatpush1.bf16.msra.mxu1 %v10296_v59  ;;  %v10353_v59 = vld [vmem:[%s14608_s4 + $0x10] ss:$24 sps:$4 sm:$0xff]  }
 0x3fd   :  { %4774 = vmatpush1.bf16.msra.mxu0 %v10299_v43  ;;  %4912 = vmatprep.subr.bf16.mxu1 %v10304_v44  ;;  %v10358_v44 = vld [vmem:[%s14608_s4 + $0xa8c] ss:$24 sps:$4 sm:$0xff]  }
 0x3fe   :  { %4775 = vmatprep.subr.bf16.mxu0 %v10307_v45  ;;  %v10361_v45 = vld [vmem:[%s14608_s4 + $0x44] ss:$24 sps:$4 sm:$0xff]  }
 0x400   :  { %4913 = vmatpush1.bf16.msra.mxu1 %v10302_v62  ;;  %v10356_v62 = vld [vmem:[%s14608_s4 + $0xa88] ss:$24 sps:$4 sm:$0xff]  }
 0x401   :  { %4776 = vmatpush1.bf16.msra.mxu0 %v10305_v46  ;;  %4923 = vmatprep.subr.bf16.mxu1 %v10310_v47  ;;  %v10359_v46 = vld [vmem:[%s14608_s4 + $0x40] ss:$24 sps:$4 sm:$0xff]   ;;  %v10364_v47 = vld [vmem:[%s14608_s4 + $0xabc] ss:$24 sps:$4 sm:$0xff]  }
 0x402   :  { %4777 = vmatprep.subr.bf16.mxu0 %v10313_v48  ;;  %v10367_v48 = vld [vmem:[%s14608_s4 + $0x74] ss:$24 sps:$4 sm:$0xff]  }
 0x403   :  { %4915 = vmatmul.mubr.bf16.vlgmr.msra.gmra.mrb[24].mxu1 %v12619_v5 }
 0x404   :  { %4924 = vmatpush1.bf16.msra.mxu1 %v10308_v49  ;;  %v10362_v49 = vld [vmem:[%s14608_s4 + $0xab8] ss:$24 sps:$4 sm:$0xff]  }
 0x405   :  { %4778 = vmatpush1.bf16.msra.mxu0 %v10311_v52  ;;  %4925 = vmatprep.subr.bf16.mxu1 %v10316_v53  ;;  %v10370_v52 = vld [vmem:[%s14608_s4 + $0xaec] ss:$24 sps:$4 sm:$0xff]  }
 0x406   :  { %4779 = vmatprep.subr.bf16.mxu0 %v10319_v54  ;;  %v10373_v53 = vld [vmem:[%s14608_s4 + $0xa4] ss:$24 sps:$4 sm:$0xff]   ;;  %v10368_v54 = vld [vmem:[%s14608_s4 + $0xae8] ss:$24 sps:$4 sm:$0xff]  }
 0x408   :  { %4926 = vmatpush1.bf16.msra.mxu1 %v10314_v55  ;;  %v10371_v55 = vld [vmem:[%s14608_s4 + $0xa0] ss:$24 sps:$4 sm:$0xff]  }
 0x409   :  { %4780 = vmatpush1.bf16.msra.mxu0 %v10317_v56  ;;  %4927 = vmatprep.subr.bf16.mxu1 %v10322_v63  ;;  %v10376_v56 = vld [vmem:[%s14608_s4 + $0xb1c] ss:$24 sps:$4 sm:$0xff]  }
 0x40a   :  { %4781 = vmatprep.subr.bf16.mxu0 %v10325_v0  ;;  %v10379_v63 = vld [vmem:[%s14608_s4 + $0xd4] ss:$24 sps:$4 sm:$0xff]   ;;  %v10374_v0 = vld [vmem:[%s14608_s4 + $0xb18] ss:$24 sps:$4 sm:$0xff]  }
 0x40c   :  { %4928 = vmatpush1.bf16.msra.mxu1 %v10320_v3  ;;  %v10377_v3 = vld [vmem:[%s14608_s4 + $0xd0] ss:$24 sps:$4 sm:$0xff]  }
 0x40d   :  { %4782 = vmatpush1.bf16.msra.mxu0 %v10323_v24  ;;  %4929 = vmatprep.subr.bf16.mxu1 %v10328_v4  ;;  %v10382_v24 = vld [vmem:[%s14608_s4 + $0xb4c] ss:$24 sps:$4 sm:$0xff]  }
 0x40e   :  { %4783 = vmatprep.subr.bf16.mxu0 %v10331_v7  ;;  %v10385_v4 = vld [vmem:[%s14608_s4 + $0x104] ss:$24 sps:$4 sm:$0xff]   ;;  %v10380_v7 = vld [vmem:[%s14608_s4 + $0xb48] ss:$24 sps:$4 sm:$0xff]  }
 0x410   :  { %4930 = vmatpush1.bf16.msra.mxu1 %v10326_v9  ;;  %v10383_v9 = vld [vmem:[%s14608_s4 + $0x100] ss:$24 sps:$4 sm:$0xff]  }
 0x411   :  { %4784 = vmatpush1.bf16.msra.mxu0 %v10329_v10  ;;  %4931 = vmatprep.subr.bf16.mxu1 %v10334_v11  ;;  %v10388_v10 = vld [vmem:[%s14608_s4 + $0xb7c] ss:$24 sps:$4 sm:$0xff]  }
 0x412   :  { %4785 = vmatprep.subr.bf16.mxu0 %v10337_v12  ;;  %v10391_v11 = vld [vmem:[%s14608_s4 + $0x134] ss:$24 sps:$4 sm:$0xff]   ;;  %v10386_v12 = vld [vmem:[%s14608_s4 + $0xb78] ss:$24 sps:$4 sm:$0xff]  }
 0x414   :  { %4932 = vmatpush1.bf16.msra.mxu1 %v10332_v13  ;;  %v10389_v13 = vld [vmem:[%s14608_s4 + $0x130] ss:$24 sps:$4 sm:$0xff]  }
 0x415   :  { %4786 = vmatpush1.bf16.msra.mxu0 %v10335_v14  ;;  %4933 = vmatprep.subr.bf16.mxu1 %v10340_v15  ;;  %v10394_v14 = vld [vmem:[%s14608_s4 + $0xbac] ss:$24 sps:$4 sm:$0xff]  }
 0x416   :  { %v2261_v33 = vpop.f32.mrb[20].mxu1  ;;  %4787 = vmatprep.subr.bf16.mxu0 %v10343_v16  ;;  %v10397_v15 = vld [vmem:[%s14608_s4 + $0x164] ss:$24 sps:$4 sm:$0xff]   ;;  %v10392_v16 = vld [vmem:[%s14608_s4 + $0xba8] ss:$24 sps:$4 sm:$0xff]  }
 0x417   :  { %v2262_v41 = vadd.f32 %v2261_v33, %v1451_v19  ;;  %v2263_v25 = vpop.f32.mrb[21].mxu1  ;;  %v10395_v19 = vld [vmem:[%s14608_s4 + $0x160] ss:$24 sps:$4 sm:$0xff]   ;;  %v10499_v33 = vld [vmem:[%s14609_s5 + $0x4] ss:$24 sps:$4 sm:$0xff]  }
 0x418   :  { %v2264_v26 = vadd.f32 %v2263_v25, %v1455_v20  ;;  %v2265_v27 = vpop.f32.mrb[22].mxu1  ;;  %4934 = vmatpush1.bf16.msra.mxu1 %v10338_v21  ;;  %v10400_v20 = vld [vmem:[%s14608_s4 + $0xbdc] ss:$24 sps:$4 sm:$0xff]   ;;  %v10404_v25 = vld [vmem:[%s14608_s4 + $0x1c0] ss:$24 sps:$4 sm:$0xff]  }
 0x419   :  { %vm2274_vm2 = vcmp.gt.f32.partialorder %v2262_v41, 0.0  ;;  %v2282_v30 = vmul.f32 0.01, %v2262_v41  ;;  %v2266_v31 = vpop.f32.mrb[23].mxu1  ;;  %4788 = vmatpush1.bf16.msra.mxu0 %v10341_v22  ;;  %4935 = vmatprep.subr.bf16.mxu1 %v10346_v23  ;;  %v10403_v21 = vld [vmem:[%s14608_s4 + $0x194] ss:$24 sps:$4 sm:$0xff]  }
 0x41a   :  { %vm2275_vm3 = vcmp.gt.f32.partialorder %v2264_v26, 0.0  ;;  %v2283_v37 = vmul.f32 0.01, %v2264_v26  ;;  %4789 = vmatprep.subr.bf16.mxu0 %v10349_v34  ;;  %v10398_v22 = vld [vmem:[%s14608_s4 + $0xbd8] ss:$24 sps:$4 sm:$0xff]  }
 0x41b   :  { %v2290_v38 = vsel %vm2274_vm2, %v2262_v41, %v2282_v30  ;;  %v10401_v23 = vld [vmem:[%s14608_s4 + $0x190] ss:$24 sps:$4 sm:$0xff]   ;;  %v10406_v34 = vld [vmem:[%s14608_s4 + $0x1c4] ss:$24 sps:$4 sm:$0xff]   ;;  %v10497_v41 = vld [vmem:[%s14609_s5] ss:$24 sps:$4 sm:$0xff]  }
 0x41c   :  { %4936 = vmatpush1.bf16.msra.mxu1 %v10344_v28  ;;  %v2291_v39 = vsel %vm2275_vm3, %v2264_v26, %v2283_v37  ;;  %v12822_v43 = vpack.c.bf16 %v2290_v38, %v2290_v38  ;;  %v10505_v26 = vld [vmem:[%s14609_s5 + $0x34] ss:$24 sps:$4 sm:$0xff]   ;;  %v10503_v28 = vld [vmem:[%s14609_s5 + $0x30] ss:$24 sps:$4 sm:$0xff]   ;;  %v10511_v30 = vld [vmem:[%s14609_s5 + $0x64] ss:$24 sps:$4 sm:$0xff]  }
 0x41d   :  { %4790 = vmatpush1.bf16.msra.mxu0 %v10347_v29  ;;  %v12817_v42 = vpack.c.bf16 %v2291_v39, %v2291_v39  ;;  %4937 = vmatprep.subr.bf16.mxu1 %v10352_v35  ;;  %v10409_v27 = vld [vmem:[%s14608_s4 + $0x1f4] ss:$24 sps:$4 sm:$0xff]   ;;  %v10407_v29 = vld [vmem:[%s14608_s4 + $0x1f0] ss:$24 sps:$4 sm:$0xff]   ;;  %v10412_v31 = vld [vmem:[%s14608_s4 + $0x224] ss:$24 sps:$4 sm:$0xff]  }
 0x41e   :  { %4964 = vmatprep.subr.bf16.mxu0 %v10355_v18  ;;  %v10509_v35 = vld [vmem:[%s14609_s5 + $0x60] ss:$24 sps:$4 sm:$0xff]   ;;  %v10517_v18 = vld [vmem:[%s14609_s5 + $0x94] ss:$24 sps:$4 sm:$0xff]   ;;  %v10515_v39 = vld [vmem:[%s14609_s5 + $0x90] ss:$24 sps:$4 sm:$0xff]  }
 0x41f   :  { %4791 = vmatprep.mubr.bf16.mxu0 %v12817_v42  ;;  %4955 = vmatprep.mubr.bf16.mxu1 %v12817_v42  ;;  %v10410_v37 = vld [vmem:[%s14608_s4 + $0x220] ss:$24 sps:$4 sm:$0xff]   ;;  %v10415_v38 = vld [vmem:[%s14608_s4 + $0x254] ss:$24 sps:$4 sm:$0xff]  }
 0x420   :  { %4792 = vmatmul.mubr.bf16.vlgmr.msra.gmra.mrb[12].mxu0 %v12822_v43  ;;  %4938 = vmatpush1.bf16.msra.mxu1 %v10350_v40  ;;  %v10413_v40 = vld [vmem:[%s14608_s4 + $0x250] ss:$24 sps:$4 sm:$0xff]  }
 0x421   :  { %4965 = vmatpush1.bf16.msra.mxu0 %v10353_v59  ;;  %4996 = vmatprep.mubr.bf16.mxu0 %v12206_v1  ;;  %v10365_v1 = vld [vmem:[%s14608_s4 + $0x70] ss:$24 sps:$4 sm:$0xff]   ;;  %v10523_v59 = vld [vmem:[%s14609_s5 + $0xc4] ss:$24 sps:$4 sm:$0xff]  }
 0x422   :  { %4939 = vmatprep.subr.bf16.mxu1 %v10358_v44  ;;  %4966 = vmatprep.subr.bf16.mxu0 %v10361_v45  ;;  %v10418_v44 = vld [vmem:[%s14608_s4 + $0x284] ss:$24 sps:$4 sm:$0xff]   ;;  %v10521_v45 = vld [vmem:[%s14609_s5 + $0xc0] ss:$24 sps:$4 sm:$0xff]  }
 0x424   :  { %4940 = vmatpush1.bf16.msra.mxu1 %v10356_v62  ;;  %v10416_v62 = vld [vmem:[%s14608_s4 + $0x280] ss:$24 sps:$4 sm:$0xff]  }
 0x425   :  { %4967 = vmatpush1.bf16.msra.mxu0 %v10359_v46  ;;  %4941 = vmatprep.subr.bf16.mxu1 %v10364_v47  ;;  %v10529_v46 = vld [vmem:[%s14609_s5 + $0xf4] ss:$24 sps:$4 sm:$0xff]  }
 0x426   :  { %4968 = vmatprep.subr.bf16.mxu0 %v10367_v48  ;;  %v10421_v47 = vld [vmem:[%s14608_s4 + $0x2b4] ss:$24 sps:$4 sm:$0xff]   ;;  %v10527_v48 = vld [vmem:[%s14609_s5 + $0xf0] ss:$24 sps:$4 sm:$0xff]  }
 0x428   :  { %4942 = vmatpush1.bf16.msra.mxu1 %v10362_v49  ;;  %v10419_v49 = vld [vmem:[%s14608_s4 + $0x2b0] ss:$24 sps:$4 sm:$0xff]  }
 0x429   :  { %4969 = vmatpush1.bf16.msra.mxu0 %v10365_v1  ;;  %4943 = vmatprep.subr.bf16.mxu1 %v10370_v52  ;;  %v10535_v1 = vld [vmem:[%s14609_s5 + $0x124] ss:$24 sps:$4 sm:$0xff]  }
 0x42a   :  { %4970 = vmatprep.subr.bf16.mxu0 %v10373_v53  ;;  %v10424_v52 = vld [vmem:[%s14608_s4 + $0x2e4] ss:$24 sps:$4 sm:$0xff]   ;;  %v10533_v53 = vld [vmem:[%s14609_s5 + $0x120] ss:$24 sps:$4 sm:$0xff]  }
 0x42c   :  { %4944 = vmatpush1.bf16.msra.mxu1 %v10368_v54  ;;  %v10422_v54 = vld [vmem:[%s14608_s4 + $0x2e0] ss:$24 sps:$4 sm:$0xff]  }
 0x42d   :  { %4971 = vmatpush1.bf16.msra.mxu0 %v10371_v55  ;;  %4945 = vmatprep.subr.bf16.mxu1 %v10376_v56  ;;  %v10541_v55 = vld [vmem:[%s14609_s5 + $0x154] ss:$24 sps:$4 sm:$0xff]  }
 0x42e   :  { %4972 = vmatprep.subr.bf16.mxu0 %v10379_v63  ;;  %v10427_v56 = vld [vmem:[%s14608_s4 + $0x314] ss:$24 sps:$4 sm:$0xff]   ;;  %v10539_v63 = vld [vmem:[%s14609_s5 + $0x150] ss:$24 sps:$4 sm:$0xff]  }
 0x430   :  { %4946 = vmatpush1.bf16.msra.mxu1 %v10374_v0  ;;  %v10425_v0 = vld [vmem:[%s14608_s4 + $0x310] ss:$24 sps:$4 sm:$0xff]  }
 0x431   :  { %4973 = vmatpush1.bf16.msra.mxu0 %v10377_v3  ;;  %4947 = vmatprep.subr.bf16.mxu1 %v10382_v24  ;;  %v10430_v3 = vld [vmem:[%s14608_s4 + $0x344] ss:$24 sps:$4 sm:$0xff]  }
 0x432   :  { %4974 = vmatprep.subr.bf16.mxu0 %v10385_v4  ;;  %v10547_v24 = vld [vmem:[%s14609_s5 + $0x184] ss:$24 sps:$4 sm:$0xff]   ;;  %v10545_v4 = vld [vmem:[%s14609_s5 + $0x180] ss:$24 sps:$4 sm:$0xff]  }
 0x434   :  { %4948 = vmatpush1.bf16.msra.mxu1 %v10380_v7  ;;  %v10428_v7 = vld [vmem:[%s14608_s4 + $0x340] ss:$24 sps:$4 sm:$0xff]  }
 0x435   :  { %4975 = vmatpush1.bf16.msra.mxu0 %v10383_v9  ;;  %4949 = vmatprep.subr.bf16.mxu1 %v10388_v10  ;;  %v10553_v9 = vld [vmem:[%s14609_s5 + $0x1b4] ss:$24 sps:$4 sm:$0xff]  }
 0x436   :  { %4976 = vmatprep.subr.bf16.mxu0 %v10391_v11  ;;  %v10433_v10 = vld [vmem:[%s14608_s4 + $0x374] ss:$24 sps:$4 sm:$0xff]   ;;  %v10559_v11 = vld [vmem:[%s14609_s5 + $0x1e4] ss:$24 sps:$4 sm:$0xff]  }
 0x438   :  { %4950 = vmatpush1.bf16.msra.mxu1 %v10386_v12  ;;  %v10436_v12 = vld [vmem:[%s14608_s4 + $0x3a4] ss:$24 sps:$4 sm:$0xff]  }
 0x439   :  { %4977 = vmatpush1.bf16.msra.mxu0 %v10389_v13  ;;  %4951 = vmatprep.subr.bf16.mxu1 %v10394_v14  ;;  %v10557_v13 = vld [vmem:[%s14609_s5 + $0x1e0] ss:$24 sps:$4 sm:$0xff]  }
 0x43a   :  { %4978 = vmatprep.subr.bf16.mxu0 %v10397_v15  ;;  %v10434_v14 = vld [vmem:[%s14608_s4 + $0x3a0] ss:$24 sps:$4 sm:$0xff]   ;;  %v10565_v15 = vld [vmem:[%s14609_s5 + $0x214] ss:$24 sps:$4 sm:$0xff]  }
 0x43c   :  { %4952 = vmatpush1.bf16.msra.mxu1 %v10392_v16  ;;  %v10439_v16 = vld [vmem:[%s14608_s4 + $0x3d4] ss:$24 sps:$4 sm:$0xff]  }
 0x43d   :  { %4979 = vmatpush1.bf16.msra.mxu0 %v10395_v19  ;;  %4953 = vmatprep.subr.bf16.mxu1 %v10400_v20  ;;  %v10563_v19 = vld [vmem:[%s14609_s5 + $0x210] ss:$24 sps:$4 sm:$0xff]  }
 0x43e   :  { %4980 = vmatprep.subr.bf16.mxu0 %v10403_v21  ;;  %v10437_v20 = vld [vmem:[%s14608_s4 + $0x3d0] ss:$24 sps:$4 sm:$0xff]   ;;  %v10571_v21 = vld [vmem:[%s14609_s5 + $0x244] ss:$24 sps:$4 sm:$0xff]  }
 0x440   :  { %4954 = vmatpush1.bf16.msra.mxu1 %v10398_v22  ;;  %v10442_v22 = vld [vmem:[%s14608_s4 + $0x404] ss:$24 sps:$4 sm:$0xff]  }
 0x441   :  { %4981 = vmatpush1.bf16.msra.mxu0 %v10401_v23  ;;  %6912 = vmatprep.subr.bf16.mxu1 %v10499_v33  ;;  %v10569_v23 = vld [vmem:[%s14609_s5 + $0x240] ss:$24 sps:$4 sm:$0xff]  }
 0x442   :  { %4982 = vmatprep.subr.bf16.mxu0 %v10406_v34  ;;  %v10440_v33 = vld [vmem:[%s14608_s4 + $0x400] ss:$24 sps:$4 sm:$0xff]   ;;  %v10577_v34 = vld [vmem:[%s14609_s5 + $0x274] ss:$24 sps:$4 sm:$0xff]  }
 0x443   :  { %4956 = vmatmul.mubr.bf16.vlgmr.msra.gmra.mrb[24].mxu1 %v12822_v43 }
 0x444   :  { %6913 = vmatpush1.bf16.msra.mxu1 %v10497_v41  ;;  %v10445_v41 = vld [vmem:[%s14608_s4 + $0x434] ss:$24 sps:$4 sm:$0xff]  }
 0x445   :  { %4983 = vmatpush1.bf16.msra.mxu0 %v10404_v25  ;;  %6914 = vmatprep.subr.bf16.mxu1 %v10505_v26  ;;  %v10443_v25 = vld [vmem:[%s14608_s4 + $0x430] ss:$24 sps:$4 sm:$0xff]  }
 0x446   :  { %4984 = vmatprep.subr.bf16.mxu0 %v10409_v27  ;;  %v10575_v26 = vld [vmem:[%s14609_s5 + $0x270] ss:$24 sps:$4 sm:$0xff]   ;;  %v10583_v27 = vld [vmem:[%s14609_s5 + $0x2a4] ss:$24 sps:$4 sm:$0xff]  }
 0x448   :  { %6915 = vmatpush1.bf16.msra.mxu1 %v10503_v28  ;;  %v10448_v28 = vld [vmem:[%s14608_s4 + $0x464] ss:$24 sps:$4 sm:$0xff]  }
 0x449   :  { %4985 = vmatpush1.bf16.msra.mxu0 %v10407_v29  ;;  %6916 = vmatprep.subr.bf16.mxu1 %v10511_v30  ;;  %v10446_v29 = vld [vmem:[%s14608_s4 + $0x460] ss:$24 sps:$4 sm:$0xff]  }
 0x44a   :  { %4986 = vmatprep.subr.bf16.mxu0 %v10412_v31  ;;  %v10581_v30 = vld [vmem:[%s14609_s5 + $0x2a0] ss:$24 sps:$4 sm:$0xff]   ;;  %v10451_v31 = vld [vmem:[%s14608_s4 + $0x494] ss:$24 sps:$4 sm:$0xff]  }
 0x44c   :  { %6917 = vmatpush1.bf16.msra.mxu1 %v10509_v35  ;;  %v10589_v35 = vld [vmem:[%s14609_s5 + $0x2d4] ss:$24 sps:$4 sm:$0xff]  }
 0x44d   :  { %4987 = vmatpush1.bf16.msra.mxu0 %v10410_v37  ;;  %6918 = vmatprep.subr.bf16.mxu1 %v10517_v18  ;;  %v10587_v37 = vld [vmem:[%s14609_s5 + $0x2d0] ss:$24 sps:$4 sm:$0xff]  }
 0x44e   :  { %4988 = vmatprep.subr.bf16.mxu0 %v10415_v38  ;;  %v10449_v18 = vld [vmem:[%s14608_s4 + $0x490] ss:$24 sps:$4 sm:$0xff]   ;;  %v10595_v38 = vld [vmem:[%s14609_s5 + $0x304] ss:$24 sps:$4 sm:$0xff]  }
 0x450   :  { %6919 = vmatpush1.bf16.msra.mxu1 %v10515_v39  ;;  %v10454_v39 = vld [vmem:[%s14608_s4 + $0x4c4] ss:$24 sps:$4 sm:$0xff]  }
 0x451   :  { %4989 = vmatpush1.bf16.msra.mxu0 %v10413_v40  ;;  %6920 = vmatprep.subr.bf16.mxu1 %v10523_v59  ;;  %v10452_v40 = vld [vmem:[%s14608_s4 + $0x4c0] ss:$24 sps:$4 sm:$0xff]   ;;  %v10457_v59 = vld [vmem:[%s14608_s4 + $0x4f4] ss:$24 sps:$4 sm:$0xff]  }
 0x452   :  { %4990 = vmatprep.subr.bf16.mxu0 %v10418_v44  ;;  %v10455_v44 = vld [vmem:[%s14608_s4 + $0x4f0] ss:$24 sps:$4 sm:$0xff]  }
 0x454   :  { %6921 = vmatpush1.bf16.msra.mxu1 %v10521_v45  ;;  %v10460_v45 = vld [vmem:[%s14608_s4 + $0x524] ss:$24 sps:$4 sm:$0xff]  }
 0x455   :  { %4991 = vmatpush1.bf16.msra.mxu0 %v10416_v62  ;;  %6922 = vmatprep.subr.bf16.mxu1 %v10529_v46  ;;  %v10458_v62 = vld [vmem:[%s14608_s4 + $0x520] ss:$24 sps:$4 sm:$0xff]   ;;  %v10463_v46 = vld [vmem:[%s14608_s4 + $0x554] ss:$24 sps:$4 sm:$0xff]  }
 0x456   :  { %4992 = vmatprep.subr.bf16.mxu0 %v10421_v47  ;;  %v10461_v47 = vld [vmem:[%s14608_s4 + $0x550] ss:$24 sps:$4 sm:$0xff]  }
 0x458   :  { %6923 = vmatpush1.bf16.msra.mxu1 %v10527_v48  ;;  %v10466_v48 = vld [vmem:[%s14608_s4 + $0x584] ss:$24 sps:$4 sm:$0xff]  }
 0x459   :  { %4993 = vmatpush1.bf16.msra.mxu0 %v10419_v49  ;;  %6924 = vmatprep.subr.bf16.mxu1 %v10535_v1  ;;  %v10464_v49 = vld [vmem:[%s14608_s4 + $0x580] ss:$24 sps:$4 sm:$0xff]   ;;  %v10469_v1 = vld [vmem:[%s14608_s4 + $0x5b4] ss:$24 sps:$4 sm:$0xff]  }
 0x45a   :  { %4994 = vmatprep.subr.bf16.mxu0 %v10424_v52  ;;  %v10467_v52 = vld [vmem:[%s14608_s4 + $0x5b0] ss:$24 sps:$4 sm:$0xff]  }
 0x45c   :  { %6925 = vmatpush1.bf16.msra.mxu1 %v10533_v53  ;;  %v10472_v53 = vld [vmem:[%s14608_s4 + $0x5e4] ss:$24 sps:$4 sm:$0xff]  }
 0x45d   :  { %4995 = vmatpush1.bf16.msra.mxu0 %v10422_v54  ;;  %6926 = vmatprep.subr.bf16.mxu1 %v10541_v55  ;;  %v10470_v54 = vld [vmem:[%s14608_s4 + $0x5e0] ss:$24 sps:$4 sm:$0xff]   ;;  %v10475_v55 = vld [vmem:[%s14608_s4 + $0x614] ss:$24 sps:$4 sm:$0xff]  }
 0x45e   :  { %5005 = vmatprep.subr.bf16.mxu0 %v10427_v56  ;;  %v10473_v56 = vld [vmem:[%s14608_s4 + $0x610] ss:$24 sps:$4 sm:$0xff]  }
 0x460   :  { %4997 = vmatmul.mubr.bf16.vlgmr.msra.gmra.mrb[16].mxu0 %v12211_v6  ;;  %6927 = vmatpush1.bf16.msra.mxu1 %v10539_v63  ;;  %v10551_v6 = vld [vmem:[%s14609_s5 + $0x1b0] ss:$24 sps:$4 sm:$0xff]   ;;  %v10478_v63 = vld [vmem:[%s14608_s4 + $0x644] ss:$24 sps:$4 sm:$0xff]  }
 0x461   :  { %5006 = vmatpush1.bf16.msra.mxu0 %v10425_v0  ;;  %5037 = vmatprep.mubr.bf16.mxu0 %v12407_v32  ;;  %v10431_v32 = vld [vmem:[%s14608_s4 + $0x370] ss:$24 sps:$4 sm:$0xff]   ;;  %v10476_v0 = vld [vmem:[%s14608_s4 + $0x640] ss:$24 sps:$4 sm:$0xff]  }
 0x462   :  { %5007 = vmatprep.subr.bf16.mxu0 %v10430_v3  ;;  %6928 = vmatprep.subr.bf16.mxu1 %v10547_v24  ;;  %v10481_v3 = vld [vmem:[%s14608_s4 + $0x674] ss:$24 sps:$4 sm:$0xff]   ;;  %v10479_v24 = vld [vmem:[%s14608_s4 + $0x670] ss:$24 sps:$4 sm:$0xff]  }
 0x464   :  { %6929 = vmatpush1.bf16.msra.mxu1 %v10545_v4  ;;  %v10482_v4 = vld [vmem:[%s14608_s4 + $0x6a0] ss:$24 sps:$4 sm:$0xff]  }
 0x465   :  { %5008 = vmatpush1.bf16.msra.mxu0 %v10428_v7  ;;  %6930 = vmatprep.subr.bf16.mxu1 %v10553_v9  ;;  %v10485_v7 = vld [vmem:[%s14608_s4 + $0x6d0] ss:$24 sps:$4 sm:$0xff]   ;;  %v10490_v9 = vld [vmem:[%s14608_s4 + $0x704] ss:$24 sps:$4 sm:$0xff]  }
 0x466   :  { %5009 = vmatprep.subr.bf16.mxu0 %v10433_v10  ;;  %v10488_v10 = vld [vmem:[%s14608_s4 + $0x700] ss:$24 sps:$4 sm:$0xff]  }
 0x468   :  { %6931 = vmatpush1.bf16.msra.mxu1 %v10551_v6  ;;  %v10493_v6 = vld [vmem:[%s14608_s4 + $0x734] ss:$24 sps:$4 sm:$0xff]  }
 0x469   :  { %5010 = vmatpush1.bf16.msra.mxu0 %v10431_v32  ;;  %6932 = vmatprep.subr.bf16.mxu1 %v10559_v11  ;;  %v10491_v32 = vld [vmem:[%s14608_s4 + $0x730] ss:$24 sps:$4 sm:$0xff]   ;;  %v10496_v11 = vld [vmem:[%s14608_s4 + $0x764] ss:$24 sps:$4 sm:$0xff]  }
 0x46a   :  { %5011 = vmatprep.subr.bf16.mxu0 %v10436_v12  ;;  %v10494_v12 = vld [vmem:[%s14608_s4 + $0x760] ss:$24 sps:$4 sm:$0xff]  }
 0x46c   :  { %6933 = vmatpush1.bf16.msra.mxu1 %v10557_v13  ;;  %v10502_v13 = vld [vmem:[%s14608_s4 + $0x794] ss:$24 sps:$4 sm:$0xff]  }
 0x46d   :  { %5012 = vmatpush1.bf16.msra.mxu0 %v10434_v14  ;;  %6934 = vmatprep.subr.bf16.mxu1 %v10565_v15  ;;  %v10500_v14 = vld [vmem:[%s14608_s4 + $0x790] ss:$24 sps:$4 sm:$0xff]   ;;  %v10508_v15 = vld [vmem:[%s14608_s4 + $0x7c4] ss:$24 sps:$4 sm:$0xff]  }
 0x46e   :  { %5013 = vmatprep.subr.bf16.mxu0 %v10439_v16  ;;  %v10506_v16 = vld [vmem:[%s14608_s4 + $0x7c0] ss:$24 sps:$4 sm:$0xff]  }
 0x470   :  { %6935 = vmatpush1.bf16.msra.mxu1 %v10563_v19  ;;  %v10514_v19 = vld [vmem:[%s14608_s4 + $0x7f4] ss:$24 sps:$4 sm:$0xff]  }
 0x471   :  { %5014 = vmatpush1.bf16.msra.mxu0 %v10437_v20  ;;  %6936 = vmatprep.subr.bf16.mxu1 %v10571_v21  ;;  %v10512_v20 = vld [vmem:[%s14608_s4 + $0x7f0] ss:$24 sps:$4 sm:$0xff]   ;;  %v10520_v21 = vld [vmem:[%s14608_s4 + $0x824] ss:$24 sps:$4 sm:$0xff]  }
 0x472   :  { %5015 = vmatprep.subr.bf16.mxu0 %v10442_v22  ;;  %v10518_v22 = vld [vmem:[%s14608_s4 + $0x820] ss:$24 sps:$4 sm:$0xff]  }
 0x474   :  { %6937 = vmatpush1.bf16.msra.mxu1 %v10569_v23  ;;  %v10526_v23 = vld [vmem:[%s14608_s4 + $0x854] ss:$24 sps:$4 sm:$0xff]  }
 0x475   :  { %5016 = vmatpush1.bf16.msra.mxu0 %v10440_v33  ;;  %6938 = vmatprep.subr.bf16.mxu1 %v10577_v34  ;;  %v10524_v33 = vld [vmem:[%s14608_s4 + $0x850] ss:$24 sps:$4 sm:$0xff]   ;;  %v10532_v34 = vld [vmem:[%s14608_s4 + $0x884] ss:$24 sps:$4 sm:$0xff]  }
 0x476   :  { %5017 = vmatprep.subr.bf16.mxu0 %v10445_v41  ;;  %v10530_v41 = vld [vmem:[%s14608_s4 + $0x880] ss:$24 sps:$4 sm:$0xff]  }
 0x478   :  { %6939 = vmatpush1.bf16.msra.mxu1 %v10575_v26  ;;  %v10536_v26 = vld [vmem:[%s14608_s4 + $0x8b0] ss:$24 sps:$4 sm:$0xff]  }
 0x479   :  { %5018 = vmatpush1.bf16.msra.mxu0 %v10443_v25  ;;  %6940 = vmatprep.subr.bf16.mxu1 %v10583_v27  ;;  %v10538_v25 = vld [vmem:[%s14608_s4 + $0x8b4] ss:$24 sps:$4 sm:$0xff]   ;;  %v10544_v27 = vld [vmem:[%s14608_s4 + $0x8e4] ss:$24 sps:$4 sm:$0xff]  }
 0x47a   :  { %5019 = vmatprep.subr.bf16.mxu0 %v10448_v28  ;;  %v10542_v28 = vld [vmem:[%s14608_s4 + $0x8e0] ss:$24 sps:$4 sm:$0xff]  }
 0x47c   :  { %6941 = vmatpush1.bf16.msra.mxu1 %v10581_v30  ;;  %v10548_v30 = vld [vmem:[%s14608_s4 + $0x910] ss:$24 sps:$4 sm:$0xff]  }
 0x47d   :  { %5020 = vmatpush1.bf16.msra.mxu0 %v10446_v29  ;;  %6942 = vmatprep.subr.bf16.mxu1 %v10589_v35  ;;  %v10550_v29 = vld [vmem:[%s14608_s4 + $0x914] ss:$24 sps:$4 sm:$0xff]   ;;  %v10554_v35 = vld [vmem:[%s14608_s4 + $0x940] ss:$24 sps:$4 sm:$0xff]  }
 0x47e   :  { %5021 = vmatprep.subr.bf16.mxu0 %v10451_v31  ;;  %v10556_v31 = vld [vmem:[%s14608_s4 + $0x944] ss:$24 sps:$4 sm:$0xff]  }
 0x480   :  { %6943 = vmatpush1.bf16.msra.mxu1 %v10587_v37  ;;  %v10562_v37 = vld [vmem:[%s14608_s4 + $0x974] ss:$24 sps:$4 sm:$0xff]  }
 0x481   :  { %5022 = vmatpush1.bf16.msra.mxu0 %v10449_v18  ;;  %6953 = vmatprep.subr.bf16.mxu1 %v10595_v38  ;;  %v10560_v18 = vld [vmem:[%s14608_s4 + $0x970] ss:$24 sps:$4 sm:$0xff]   ;;  %v10574_v38 = vld [vmem:[%s14608_s4 + $0x9d4] ss:$24 sps:$4 sm:$0xff]  }
 0x482   :  { %5023 = vmatprep.subr.bf16.mxu0 %v10454_v39  ;;  %v10572_v39 = vld [vmem:[%s14608_s4 + $0x9d0] ss:$24 sps:$4 sm:$0xff]  }
 0x485   :  { %5024 = vmatpush1.bf16.msra.mxu0 %v10452_v40  ;;  %v13297_v40 = vld [vmem:[%s14606_s7 + $0x12] sm:$0x3f] }
 0x486   :  { %5025 = vmatprep.subr.bf16.mxu0 %v10457_v59  ;;  %v10580_v59 = vld [vmem:[%s14608_s4 + $0xa04] ss:$24 sps:$4 sm:$0xff]  }
 0x489   :  { %5026 = vmatpush1.bf16.msra.mxu0 %v10455_v44  ;;  %v2689_v44 = vrot.slane %v13297_v40, %v11307_v58 }
 0x48a   :  { %5027 = vmatprep.subr.bf16.mxu0 %v10460_v45  ;;  %v2693_v45 = vrot.slane %v13297_v40, %v11315_v60 }
 0x48d   :  { %5028 = vmatpush1.bf16.msra.mxu0 %v10458_v62  ;;  %v10578_v62 = vld [vmem:[%s14608_s4 + $0xa00] ss:$24 sps:$4 sm:$0xff]  }
 0x48e   :  { %5029 = vmatprep.subr.bf16.mxu0 %v10463_v46  ;;  %v10586_v46 = vld [vmem:[%s14608_s4 + $0xa34] ss:$24 sps:$4 sm:$0xff]  }
 0x491   :  { %5030 = vmatpush1.bf16.msra.mxu0 %v10461_v47 }
 0x492   :  { %5031 = vmatprep.subr.bf16.mxu0 %v10466_v48 }
 0x495   :  { %5032 = vmatpush1.bf16.msra.mxu0 %v10464_v49 }
 0x496   :  { %5033 = vmatprep.subr.bf16.mxu0 %v10469_v1 }
 0x499   :  { %5034 = vmatpush1.bf16.msra.mxu0 %v10467_v52 }
 0x49a   :  { %5035 = vmatprep.subr.bf16.mxu0 %v10472_v53  ;;  %v10584_v53 = vld [vmem:[%s14608_s4 + $0xa30] ss:$24 sps:$4 sm:$0xff]  }
 0x49d   :  { %5036 = vmatpush1.bf16.msra.mxu0 %v10470_v54 }
 0x49e   :  { %5046 = vmatprep.subr.bf16.mxu0 %v10475_v55 }
 0x4a0   :  { %5038 = vmatmul.mubr.bf16.vlgmr.msra.gmra.mrb[16].mxu0 %v12415_v17  ;;  %v10484_v17 = vld [vmem:[%s14608_s4 + $0x6a4] ss:$24 sps:$4 sm:$0xff]  }
 0x4a1   :  { %5047 = vmatpush1.bf16.msra.mxu0 %v10473_v56  ;;  %5078 = vmatprep.mubr.bf16.mxu0 %v12611_v8  ;;  %v10487_v8 = vld [vmem:[%s14608_s4 + $0x6d4] ss:$24 sps:$4 sm:$0xff]   ;;  %v10592_v56 = vld [vmem:[%s14608_s4 + $0xa64] ss:$24 sps:$4 sm:$0xff]  }
 0x4a2   :  { %5048 = vmatprep.subr.bf16.mxu0 %v10478_v63 }
 0x4a5   :  { %5049 = vmatpush1.bf16.msra.mxu0 %v10476_v0 }
 0x4a6   :  { %5050 = vmatprep.subr.bf16.mxu0 %v10481_v3  ;;  %v10590_v3 = vld [vmem:[%s14608_s4 + $0xa60] ss:$24 sps:$4 sm:$0xff]  }
 0x4a9   :  { %5051 = vmatpush1.bf16.msra.mxu0 %v10479_v24 }
 0x4aa   :  { %5052 = vmatprep.subr.bf16.mxu0 %v10484_v17 }
 0x4ad   :  { %5053 = vmatpush1.bf16.msra.mxu0 %v10482_v4  ;;  %v10593_v4 = vld [vmem:[%s14609_s5 + $0x300] ss:$24 sps:$4 sm:$0xff]  }
 0x4ae   :  { %5054 = vmatprep.subr.bf16.mxu0 %v10487_v8  ;;  %v10598_v8 = vld [vmem:[%s14608_s4 + $0xa94] ss:$24 sps:$4 sm:$0xff]  }
 0x4b1   :  { %5055 = vmatpush1.bf16.msra.mxu0 %v10485_v7 }
 0x4b2   :  { %5056 = vmatprep.subr.bf16.mxu0 %v10490_v9  ;;  %v10601_v9 = vld [vmem:[%s14609_s5 + $0x334] ss:$24 sps:$4 sm:$0xff]  }
 0x4b5   :  { %5057 = vmatpush1.bf16.msra.mxu0 %v10488_v10  ;;  %v10596_v10 = vld [vmem:[%s14608_s4 + $0xa90] ss:$24 sps:$4 sm:$0xff]  }
 0x4b6   :  { %5058 = vmatprep.subr.bf16.mxu0 %v10493_v6  ;;  %v10599_v6 = vld [vmem:[%s14609_s5 + $0x330] ss:$24 sps:$4 sm:$0xff]  }
 0x4b9   :  { %5059 = vmatpush1.bf16.msra.mxu0 %v10491_v32  ;;  %v10604_v32 = vld [vmem:[%s14608_s4 + $0xac4] ss:$24 sps:$4 sm:$0xff]  }
 0x4ba   :  { %5060 = vmatprep.subr.bf16.mxu0 %v10496_v11  ;;  %v10607_v11 = vld [vmem:[%s14609_s5 + $0x364] ss:$24 sps:$4 sm:$0xff]  }
 0x4bd   :  { %5061 = vmatpush1.bf16.msra.mxu0 %v10494_v12  ;;  %v10602_v12 = vld [vmem:[%s14608_s4 + $0xac0] ss:$24 sps:$4 sm:$0xff]  }
 0x4be   :  { %5062 = vmatprep.subr.bf16.mxu0 %v10502_v13  ;;  %v10605_v13 = vld [vmem:[%s14609_s5 + $0x360] ss:$24 sps:$4 sm:$0xff]  }
 0x4c1   :  { %5063 = vmatpush1.bf16.msra.mxu0 %v10500_v14  ;;  %v10610_v14 = vld [vmem:[%s14608_s4 + $0xaf4] ss:$24 sps:$4 sm:$0xff]  }
 0x4c2   :  { %5064 = vmatprep.subr.bf16.mxu0 %v10508_v15  ;;  %v10613_v15 = vld [vmem:[%s14609_s5 + $0x394] ss:$24 sps:$4 sm:$0xff]  }
 0x4c5   :  { %5065 = vmatpush1.bf16.msra.mxu0 %v10506_v16  ;;  %v10608_v16 = vld [vmem:[%s14608_s4 + $0xaf0] ss:$24 sps:$4 sm:$0xff]  }
 0x4c6   :  { %5066 = vmatprep.subr.bf16.mxu0 %v10514_v19  ;;  %v10611_v19 = vld [vmem:[%s14609_s5 + $0x390] ss:$24 sps:$4 sm:$0xff]  }
 0x4c9   :  { %5067 = vmatpush1.bf16.msra.mxu0 %v10512_v20  ;;  %v10616_v20 = vld [vmem:[%s14608_s4 + $0xb24] ss:$24 sps:$4 sm:$0xff]  }
 0x4ca   :  { %5068 = vmatprep.subr.bf16.mxu0 %v10520_v21  ;;  %v10619_v21 = vld [vmem:[%s14609_s5 + $0x3c4] ss:$24 sps:$4 sm:$0xff]  }
 0x4cd   :  { %5069 = vmatpush1.bf16.msra.mxu0 %v10518_v22  ;;  %v10614_v22 = vld [vmem:[%s14608_s4 + $0xb20] ss:$24 sps:$4 sm:$0xff]  }
 0x4ce   :  { %5070 = vmatprep.subr.bf16.mxu0 %v10526_v23  ;;  %v10617_v23 = vld [vmem:[%s14609_s5 + $0x3c0] ss:$24 sps:$4 sm:$0xff]  }
 0x4d1   :  { %5071 = vmatpush1.bf16.msra.mxu0 %v10524_v33  ;;  %v10622_v33 = vld [vmem:[%s14608_s4 + $0xb54] ss:$24 sps:$4 sm:$0xff]  }
 0x4d2   :  { %5072 = vmatprep.subr.bf16.mxu0 %v10532_v34  ;;  %v10625_v34 = vld [vmem:[%s14609_s5 + $0x3f4] ss:$24 sps:$4 sm:$0xff]  }
 0x4d5   :  { %5073 = vmatpush1.bf16.msra.mxu0 %v10530_v41  ;;  %v10620_v41 = vld [vmem:[%s14608_s4 + $0xb50] ss:$24 sps:$4 sm:$0xff]  }
 0x4d6   :  { %5074 = vmatprep.subr.bf16.mxu0 %v10538_v25  ;;  %v10623_v25 = vld [vmem:[%s14609_s5 + $0x3f0] ss:$24 sps:$4 sm:$0xff]  }
 0x4d9   :  { %5075 = vmatpush1.bf16.msra.mxu0 %v10536_v26  ;;  %v10628_v26 = vld [vmem:[%s14608_s4 + $0xb84] ss:$24 sps:$4 sm:$0xff]  }
 0x4da   :  { %5076 = vmatprep.subr.bf16.mxu0 %v10544_v27  ;;  %v10631_v27 = vld [vmem:[%s14609_s5 + $0x424] ss:$24 sps:$4 sm:$0xff]  }
 0x4dd   :  { %5077 = vmatpush1.bf16.msra.mxu0 %v10542_v28  ;;  %v10626_v28 = vld [vmem:[%s14608_s4 + $0xb80] ss:$24 sps:$4 sm:$0xff]  }
 0x4de   :  { %5087 = vmatprep.subr.bf16.mxu0 %v10550_v29  ;;  %v10629_v29 = vld [vmem:[%s14609_s5 + $0x420] ss:$24 sps:$4 sm:$0xff]  }
 0x4e0   :  { %5079 = vmatmul.mubr.bf16.vlgmr.msra.gmra.mrb[16].mxu0 %v12619_v5  ;;  %v10568_v5 = vld [vmem:[%s14608_s4 + $0x9a4] ss:$24 sps:$4 sm:$0xff]  }
 0x4e1   :  { %5088 = vmatpush1.bf16.msra.mxu0 %v10548_v30  ;;  %5119 = vmatprep.mubr.bf16.mxu0 %v12817_v42  ;;  %v10566_v42 = vld [vmem:[%s14608_s4 + $0x9a0] ss:$24 sps:$4 sm:$0xff]   ;;  %v10634_v30 = vld [vmem:[%s14608_s4 + $0xbb4] ss:$24 sps:$4 sm:$0xff]  }
 0x4e2   :  { %5089 = vmatprep.subr.bf16.mxu0 %v10556_v31  ;;  %v10637_v31 = vld [vmem:[%s14609_s5 + $0x454] ss:$24 sps:$4 sm:$0xff]  }
 0x4e5   :  { %5090 = vmatpush1.bf16.msra.mxu0 %v10554_v35  ;;  %v2701_v35 = vrot.slane %v13297_v40, %v11318_v61 }
 0x4e6   :  { %5091 = vmatprep.subr.bf16.mxu0 %v10562_v37  ;;  %v10632_v37 = vld [vmem:[%s14608_s4 + $0xbb0] ss:$24 sps:$4 sm:$0xff]  }
 0x4e9   :  { %5092 = vmatpush1.bf16.msra.mxu0 %v10560_v18 }
 0x4ea   :  { %5093 = vmatprep.subr.bf16.mxu0 %v10568_v5  ;;  %v10635_v5 = vld [vmem:[%s14609_s5 + $0x450] ss:$24 sps:$4 sm:$0xff]  }
 0x4ed   :  { %5094 = vmatpush1.bf16.msra.mxu0 %v10566_v42  ;;  %v10640_v42 = vld [vmem:[%s14608_s4 + $0xbe4] ss:$24 sps:$4 sm:$0xff]  }
 0x4ee   :  { %5095 = vmatprep.subr.bf16.mxu0 %v10574_v38 }
 0x4f1   :  { %5096 = vmatpush1.bf16.msra.mxu0 %v10572_v39  ;;  %v10643_v39 = vld [vmem:[%s14609_s5 + $0x484] ss:$24 sps:$4 sm:$0xff]  }
 0x4f2   :  { %5097 = vmatprep.subr.bf16.mxu0 %v10580_v59 }
 0x4f3   :  { %v4793_v47 = vpop.f32.mrb[12].mxu0 }
 0x4f4   :  { %v9714_v48 = vadd.f32 %v4793_v47, %v2689_v44  ;;  %v4795_v49 = vpop.f32.mrb[13].mxu0 }
 0x4f5   :  { %v9715_v1 = vadd.f32 %v4795_v49, %v2693_v45  ;;  %v4797_v52 = vpop.f32.mrb[14].mxu0  ;;  %5098 = vmatpush1.bf16.msra.mxu0 %v10578_v62  ;;  %v10638_v62 = vld [vmem:[%s14608_s4 + $0xbe0] ss:$24 sps:$4 sm:$0xff]   ;;  %v10646_v49 = vld [vmem:[%s14609_s5 + $0x4b4] ss:$24 sps:$4 sm:$0xff]  }
 0x4f6   :  { %vm5128_vm4 = vcmp.gt.f32.partialorder %v9714_v48, 0.0  ;;  %v5134_v54 = vmul.f32 0.01, %v9714_v48  ;;  %v4798_v55 = vpop.f32.mrb[15].mxu0  ;;  %5099 = vmatprep.subr.bf16.mxu0 %v10586_v46  ;;  %v10641_v46 = vld [vmem:[%s14609_s5 + $0x480] ss:$24 sps:$4 sm:$0xff]  }
 0x4f7   :  { %vm5129_vm5 = vcmp.gt.f32.partialorder %v9715_v1, 0.0  ;;  %v5135_v63 = vmul.f32 0.01, %v9715_v1  ;;  %v10655_v55 = vld [vmem:[%s14609_s5 + $0x44] ss:$24 sps:$4 sm:$0xff]  }
 0x4f8   :  { %v5140_v0 = vsel %vm5128_vm4, %v9714_v48, %v5134_v54  ;;  %v10649_v48 = vld [vmem:[%s14609_s5 + $0x14] ss:$24 sps:$4 sm:$0xff]   ;;  %v10644_v54 = vld [vmem:[%s14609_s5 + $0x4b0] ss:$24 sps:$4 sm:$0xff]  }
 0x4f9   :  { %5100 = vmatpush1.bf16.msra.mxu0 %v10584_v53  ;;  %v5141_v24 = vsel %vm5129_vm5, %v9715_v1, %v5135_v63  ;;  %v13329_v7 = vpack.c.bf16 %v5140_v0, %v5140_v0  ;;  %v10647_v53 = vld [vmem:[%s14609_s5 + $0x10] ss:$24 sps:$4 sm:$0xff]   ;;  %v10653_v63 = vld [vmem:[%s14609_s5 + $0x40] ss:$24 sps:$4 sm:$0xff]  }
 0x4fa   :  { %5101 = vmatprep.subr.bf16.mxu0 %v10592_v56  ;;  %v13321_v17 = vpack.c.bf16 %v5141_v24, %v5141_v24  ;;  %v10652_v56 = vld [vmem:[%s14609_s5 + $0x4e4] ss:$24 sps:$4 sm:$0xff]   ;;  %v10650_v0 = vld [vmem:[%s14609_s5 + $0x4e0] ss:$24 sps:$4 sm:$0xff]   ;;  %v10659_v24 = vld [vmem:[%s14609_s5 + $0x70] ss:$24 sps:$4 sm:$0xff]  }
 0x4fc   :  { %6944 = vmatprep.mubr.bf16.mxu1 %v13321_v17 }
 0x4fd   :  { %5102 = vmatpush1.bf16.msra.mxu0 %v10590_v3  ;;  %6945 = vmatmul.mubr.bf16.vlgmr.msra.gmra.mrb[28].mxu1 %v13329_v7  ;;  %v10661_v3 = vld [vmem:[%s14609_s5 + $0x74] ss:$24 sps:$4 sm:$0xff]  }
 0x4fe   :  { %6954 = vmatpush1.bf16.msra.mxu1 %v10593_v4  ;;  %5103 = vmatprep.subr.bf16.mxu0 %v10598_v8  ;;  %v10656_v4 = vld [vmem:[%s14609_s5 + $0x510] ss:$24 sps:$4 sm:$0xff]   ;;  %v10667_v8 = vld [vmem:[%s14609_s5 + $0xa4] ss:$24 sps:$4 sm:$0xff]  }
 0x4ff   :  { %6955 = vmatprep.subr.bf16.mxu1 %v10601_v9  ;;  %v10664_v9 = vld [vmem:[%s14609_s5 + $0x544] ss:$24 sps:$4 sm:$0xff]  }
 0x501   :  { %5104 = vmatpush1.bf16.msra.mxu0 %v10596_v10  ;;  %v10665_v10 = vld [vmem:[%s14609_s5 + $0xa0] ss:$24 sps:$4 sm:$0xff]  }
 0x502   :  { %6956 = vmatpush1.bf16.msra.mxu1 %v10599_v6  ;;  %5105 = vmatprep.subr.bf16.mxu0 %v10604_v32  ;;  %v10662_v6 = vld [vmem:[%s14609_s5 + $0x540] ss:$24 sps:$4 sm:$0xff]   ;;  %v10673_v32 = vld [vmem:[%s14609_s5 + $0xd4] ss:$24 sps:$4 sm:$0xff]  }
 0x503   :  { %6957 = vmatprep.subr.bf16.mxu1 %v10607_v11  ;;  %v10670_v11 = vld [vmem:[%s14609_s5 + $0x574] ss:$24 sps:$4 sm:$0xff]  }
 0x505   :  { %5106 = vmatpush1.bf16.msra.mxu0 %v10602_v12  ;;  %v2697_v12 = vrot.slane %v13297_v40, %v11406_v51 }
 0x506   :  { %6958 = vmatpush1.bf16.msra.mxu1 %v10605_v13  ;;  %5107 = vmatprep.subr.bf16.mxu0 %v10610_v14  ;;  %v10671_v13 = vld [vmem:[%s14609_s5 + $0xd0] ss:$24 sps:$4 sm:$0xff]  }
 0x507   :  { %6959 = vmatprep.subr.bf16.mxu1 %v10613_v15  ;;  %v10668_v14 = vld [vmem:[%s14609_s5 + $0x570] ss:$24 sps:$4 sm:$0xff]   ;;  %v10679_v15 = vld [vmem:[%s14609_s5 + $0x104] ss:$24 sps:$4 sm:$0xff]  }
 0x509   :  { %5108 = vmatpush1.bf16.msra.mxu0 %v10608_v16  ;;  %v10676_v16 = vld [vmem:[%s14609_s5 + $0x5a4] ss:$24 sps:$4 sm:$0xff]  }
 0x50a   :  { %6960 = vmatpush1.bf16.msra.mxu1 %v10611_v19  ;;  %5109 = vmatprep.subr.bf16.mxu0 %v10616_v20  ;;  %v10677_v20 = vld [vmem:[%s14609_s5 + $0x100] ss:$24 sps:$4 sm:$0xff]  }
 0x50b   :  { %6961 = vmatprep.subr.bf16.mxu1 %v10619_v21  ;;  %v10674_v21 = vld [vmem:[%s14609_s5 + $0x5a0] ss:$24 sps:$4 sm:$0xff]  }
 0x50d   :  { %5110 = vmatpush1.bf16.msra.mxu0 %v10614_v22  ;;  %v10685_v22 = vld [vmem:[%s14609_s5 + $0x134] ss:$24 sps:$4 sm:$0xff]  }
 0x50e   :  { %6962 = vmatpush1.bf16.msra.mxu1 %v10617_v23  ;;  %5111 = vmatprep.subr.bf16.mxu0 %v10622_v33  ;;  %v10682_v23 = vld [vmem:[%s14609_s5 + $0x5d4] ss:$24 sps:$4 sm:$0xff]  }
 0x50f   :  { %6963 = vmatprep.subr.bf16.mxu1 %v10625_v34  ;;  %v10683_v34 = vld [vmem:[%s14609_s5 + $0x130] ss:$24 sps:$4 sm:$0xff]  }
 0x511   :  { %5112 = vmatpush1.bf16.msra.mxu0 %v10620_v41  ;;  %v10680_v41 = vld [vmem:[%s14609_s5 + $0x5d0] ss:$24 sps:$4 sm:$0xff]  }
 0x512   :  { %6964 = vmatpush1.bf16.msra.mxu1 %v10623_v25  ;;  %5113 = vmatprep.subr.bf16.mxu0 %v10628_v26  ;;  %v10688_v25 = vld [vmem:[%s14609_s5 + $0x164] ss:$24 sps:$4 sm:$0xff]  }
 0x513   :  { %6965 = vmatprep.subr.bf16.mxu1 %v10631_v27  ;;  %v10763_v26 = vld [vmem:[%s14609_s5 + $0x604] ss:$24 sps:$4 sm:$0xff]  }
 0x515   :  { %5114 = vmatpush1.bf16.msra.mxu0 %v10626_v28  ;;  %v10686_v28 = vld [vmem:[%s14609_s5 + $0x160] ss:$24 sps:$4 sm:$0xff]  }
 0x516   :  { %6966 = vmatpush1.bf16.msra.mxu1 %v10629_v29  ;;  %v13413_v18 = vpop.f32.mrb[24].mxu1  ;;  %5115 = vmatprep.subr.bf16.mxu0 %v10634_v30  ;;  %v10691_v29 = vld [vmem:[%s14609_s5 + $0x194] ss:$24 sps:$4 sm:$0xff]   ;;  %v10761_v30 = vld [vmem:[%s14609_s5 + $0x600] ss:$24 sps:$4 sm:$0xff]  }
 0x517   :  { %v4959_v38 = vpop.f32.mrb[25].mxu1  ;;  %6967 = vmatprep.subr.bf16.mxu1 %v10637_v31  ;;  %v9716_v19 = vadd.f32 %v13413_v18, %v2697_v12  ;;  %v10694_v18 = vld [vmem:[%s14609_s5 + $0x1c4] ss:$24 sps:$4 sm:$0xff]   ;;  %v10817_v12 = vld [vmem:[%s14609_s5 + $0x7b4] ss:$24 sps:$4 sm:$0xff]  }
 0x518   :  { %v9717_v59 = vadd.f32 %v4959_v38, %v2701_v35  ;;  %v4961_v44 = vpop.f32.mrb[26].mxu1  ;;  %v10769_v35 = vld [vmem:[%s14609_s5 + $0x634] ss:$24 sps:$4 sm:$0xff]   ;;  %v10692_v38 = vld [vmem:[%s14609_s5 + $0x1c0] ss:$24 sps:$4 sm:$0xff]  }
 0x519   :  { %v4962_v45 = vpop.f32.mrb[27].mxu1  ;;  %5116 = vmatpush1.bf16.msra.mxu0 %v10632_v37  ;;  %v5136_v33 = vmul.f32 0.01, %v9716_v19  ;;  %vm5130_vm7 = vcmp.gt.f32.partialorder %v9716_v19, 0.0  ;;  %v10689_v37 = vld [vmem:[%s14609_s5 + $0x190] ss:$24 sps:$4 sm:$0xff]  }
 0x51a   :  { %vm5131_vm6 = vcmp.gt.f32.partialorder %v9717_v59, 0.0  ;;  %v5137_v47 = vmul.f32 0.01, %v9717_v59  ;;  %6968 = vmatpush1.bf16.msra.mxu1 %v10635_v5  ;;  %5117 = vmatprep.subr.bf16.mxu0 %v10640_v42  ;;  %v10767_v5 = vld [vmem:[%s14609_s5 + $0x630] ss:$24 sps:$4 sm:$0xff]  }
 0x51b   :  { %6969 = vmatprep.subr.bf16.mxu1 %v10643_v39  ;;  %v5142_v27 = vsel %vm5130_vm7, %v9716_v19, %v5136_v33  ;;  %v10775_v42 = vld [vmem:[%s14609_s5 + $0x664] ss:$24 sps:$4 sm:$0xff]   ;;  %v10697_v39 = vld [vmem:[%s14609_s5 + $0x1f4] ss:$24 sps:$4 sm:$0xff]   ;;  %v10695_v45 = vld [vmem:[%s14609_s5 + $0x1f0] ss:$24 sps:$4 sm:$0xff]  }
 0x51c   :  { %v5143_v1 = vsel %vm5131_vm6, %v9717_v59, %v5137_v47  ;;  %v13537_v31 = vpack.c.bf16 %v5142_v27, %v5142_v27  ;;  %v10773_v59 = vld [vmem:[%s14609_s5 + $0x660] ss:$24 sps:$4 sm:$0xff]   ;;  %v10781_v44 = vld [vmem:[%s14609_s5 + $0x694] ss:$24 sps:$4 sm:$0xff]   ;;  %v10787_v47 = vld [vmem:[%s14609_s5 + $0x6c4] ss:$24 sps:$4 sm:$0xff]  }
 0x51d   :  { %5118 = vmatpush1.bf16.msra.mxu0 %v10638_v62  ;;  %v13436_v52 = vpack.c.bf16 %v5143_v1, %v5143_v1  ;;  %v10700_v62 = vld [vmem:[%s14609_s5 + $0x224] ss:$24 sps:$4 sm:$0xff]   ;;  %v10785_v1 = vld [vmem:[%s14609_s5 + $0x6c0] ss:$24 sps:$4 sm:$0xff]  }
 0x51e   :  { %6970 = vmatpush1.bf16.msra.mxu1 %v10641_v46  ;;  %7158 = vmatprep.subr.bf16.mxu0 %v10649_v48  ;;  %v10779_v46 = vld [vmem:[%s14609_s5 + $0x690] ss:$24 sps:$4 sm:$0xff]   ;;  %v10698_v48 = vld [vmem:[%s14609_s5 + $0x220] ss:$24 sps:$4 sm:$0xff]   ;;  %v10724_v33 = vld [vmem:[%s14609_s5 + $0x3a4] ss:$24 sps:$4 sm:$0xff]  }
 0x51f   :  { %6985 = vmatprep.mubr.bf16.mxu1 %v13436_v52  ;;  %6971 = vmatprep.subr.bf16.mxu1 %v10646_v49  ;;  %v10703_v49 = vld [vmem:[%s14609_s5 + $0x254] ss:$24 sps:$4 sm:$0xff]   ;;  %v10716_v19 = vld [vmem:[%s14609_s5 + $0x340] ss:$24 sps:$4 sm:$0xff]  }
 0x520   :  { %5120 = vmatmul.mubr.bf16.vlgmr.msra.gmra.mrb[16].mxu0 %v12822_v43  ;;  %v10658_v43 = vld [vmem:[%s14609_s5 + $0x514] ss:$24 sps:$4 sm:$0xff]   ;;  %v10833_v27 = vld [vmem:[%s14609_s5 + $0x840] ss:$24 sps:$4 sm:$0xff]  }
 0x521   :  { %7159 = vmatpush1.bf16.msra.mxu0 %v10647_v53  ;;  %7190 = vmatprep.mubr.bf16.mxu0 %v13321_v17  ;;  %v10793_v53 = vld [vmem:[%s14609_s5 + $0x6f4] ss:$24 sps:$4 sm:$0xff]  }
 0x522   :  { %6972 = vmatpush1.bf16.msra.mxu1 %v10644_v54  ;;  %7160 = vmatprep.subr.bf16.mxu0 %v10655_v55  ;;  %v10701_v54 = vld [vmem:[%s14609_s5 + $0x250] ss:$24 sps:$4 sm:$0xff]   ;;  %v10706_v55 = vld [vmem:[%s14609_s5 + $0x284] ss:$24 sps:$4 sm:$0xff]  }
 0x523   :  { %6973 = vmatprep.subr.bf16.mxu1 %v10652_v56  ;;  %v10791_v56 = vld [vmem:[%s14609_s5 + $0x6f0] ss:$24 sps:$4 sm:$0xff]  }
 0x525   :  { %7161 = vmatpush1.bf16.msra.mxu0 %v10653_v63  ;;  %v10799_v63 = vld [vmem:[%s14609_s5 + $0x724] ss:$24 sps:$4 sm:$0xff]  }
 0x526   :  { %6974 = vmatpush1.bf16.msra.mxu1 %v10650_v0  ;;  %7162 = vmatprep.subr.bf16.mxu0 %v10661_v3  ;;  %v10704_v0 = vld [vmem:[%s14609_s5 + $0x280] ss:$24 sps:$4 sm:$0xff]   ;;  %v10709_v3 = vld [vmem:[%s14609_s5 + $0x2b4] ss:$24 sps:$4 sm:$0xff]  }
 0x527   :  { %6975 = vmatprep.subr.bf16.mxu1 %v10658_v43  ;;  %v10797_v43 = vld [vmem:[%s14609_s5 + $0x720] ss:$24 sps:$4 sm:$0xff]  }
 0x529   :  { %7163 = vmatpush1.bf16.msra.mxu0 %v10659_v24  ;;  %v10805_v24 = vld [vmem:[%s14609_s5 + $0x754] ss:$24 sps:$4 sm:$0xff]  }
 0x52a   :  { %6976 = vmatpush1.bf16.msra.mxu1 %v10656_v4  ;;  %7164 = vmatprep.subr.bf16.mxu0 %v10667_v8  ;;  %v10707_v4 = vld [vmem:[%s14609_s5 + $0x2b0] ss:$24 sps:$4 sm:$0xff]   ;;  %v10712_v8 = vld [vmem:[%s14609_s5 + $0x2e4] ss:$24 sps:$4 sm:$0xff]  }
 0x52b   :  { %6977 = vmatprep.subr.bf16.mxu1 %v10664_v9  ;;  %v10803_v9 = vld [vmem:[%s14609_s5 + $0x750] ss:$24 sps:$4 sm:$0xff]  }
 0x52d   :  { %7165 = vmatpush1.bf16.msra.mxu0 %v10665_v10  ;;  %v10811_v10 = vld [vmem:[%s14609_s5 + $0x784] ss:$24 sps:$4 sm:$0xff]  }
 0x52e   :  { %6978 = vmatpush1.bf16.msra.mxu1 %v10662_v6  ;;  %7166 = vmatprep.subr.bf16.mxu0 %v10673_v32  ;;  %v10710_v6 = vld [vmem:[%s14609_s5 + $0x2e0] ss:$24 sps:$4 sm:$0xff]   ;;  %v10715_v32 = vld [vmem:[%s14609_s5 + $0x314] ss:$24 sps:$4 sm:$0xff]  }
 0x52f   :  { %6979 = vmatprep.subr.bf16.mxu1 %v10670_v11  ;;  %v10809_v11 = vld [vmem:[%s14609_s5 + $0x780] ss:$24 sps:$4 sm:$0xff]  }
 0x531   :  { %7167 = vmatpush1.bf16.msra.mxu0 %v10671_v13  ;;  %v10713_v13 = vld [vmem:[%s14609_s5 + $0x310] ss:$24 sps:$4 sm:$0xff]  }
 0x532   :  { %6980 = vmatpush1.bf16.msra.mxu1 %v10668_v14  ;;  %7168 = vmatprep.subr.bf16.mxu0 %v10679_v15  ;;  %v10718_v14 = vld [vmem:[%s14609_s5 + $0x344] ss:$24 sps:$4 sm:$0xff]   ;;  %v10815_v15 = vld [vmem:[%s14609_s5 + $0x7b0] ss:$24 sps:$4 sm:$0xff]  }
 0x533   :  { %6981 = vmatprep.subr.bf16.mxu1 %v10676_v16  ;;  %v10823_v16 = vld [vmem:[%s14609_s5 + $0x7e4] ss:$24 sps:$4 sm:$0xff]  }
 0x535   :  { %7169 = vmatpush1.bf16.msra.mxu0 %v10677_v20  ;;  %v10721_v20 = vld [vmem:[%s14609_s5 + $0x374] ss:$24 sps:$4 sm:$0xff]  }
 0x536   :  { %6982 = vmatpush1.bf16.msra.mxu1 %v10674_v21  ;;  %7170 = vmatprep.subr.bf16.mxu0 %v10685_v22  ;;  %v10821_v21 = vld [vmem:[%s14609_s5 + $0x7e0] ss:$24 sps:$4 sm:$0xff]   ;;  %v10829_v22 = vld [vmem:[%s14609_s5 + $0x814] ss:$24 sps:$4 sm:$0xff]  }
 0x537   :  { %6983 = vmatprep.subr.bf16.mxu1 %v10682_v23  ;;  %v10719_v23 = vld [vmem:[%s14609_s5 + $0x370] ss:$24 sps:$4 sm:$0xff]  }
 0x539   :  { %7171 = vmatpush1.bf16.msra.mxu0 %v10683_v34  ;;  %v10827_v34 = vld [vmem:[%s14609_s5 + $0x810] ss:$24 sps:$4 sm:$0xff]  }
 0x53a   :  { %6984 = vmatpush1.bf16.msra.mxu1 %v10680_v41  ;;  %7172 = vmatprep.subr.bf16.mxu0 %v10688_v25  ;;  %v10835_v41 = vld [vmem:[%s14609_s5 + $0x844] ss:$24 sps:$4 sm:$0xff]   ;;  %v10722_v25 = vld [vmem:[%s14609_s5 + $0x3a0] ss:$24 sps:$4 sm:$0xff]  }
 0x53b   :  { %6994 = vmatprep.subr.bf16.mxu1 %v10763_v26  ;;  %v10727_v26 = vld [vmem:[%s14609_s5 + $0x3d4] ss:$24 sps:$4 sm:$0xff]  }
 0x53d   :  { %6986 = vmatmul.mubr.bf16.vlgmr.msra.gmra.mrb[28].mxu1 %v13537_v31  ;;  %7173 = vmatpush1.bf16.msra.mxu0 %v10686_v28  ;;  %v10841_v28 = vld [vmem:[%s14609_s5 + $0x874] ss:$24 sps:$4 sm:$0xff]  }
 0x53e   :  { %7174 = vmatprep.subr.bf16.mxu0 %v10691_v29  ;;  %6995 = vmatpush1.bf16.msra.mxu1 %v10761_v30  ;;  %v10725_v29 = vld [vmem:[%s14609_s5 + $0x3d0] ss:$24 sps:$4 sm:$0xff]   ;;  %v10730_v30 = vld [vmem:[%s14609_s5 + $0x404] ss:$24 sps:$4 sm:$0xff]  }
 0x53f   :  { %6996 = vmatprep.subr.bf16.mxu1 %v10769_v35  ;;  %v10839_v35 = vld [vmem:[%s14609_s5 + $0x870] ss:$24 sps:$4 sm:$0xff]  }
 0x541   :  { %7175 = vmatpush1.bf16.msra.mxu0 %v10689_v37  ;;  %v10728_v37 = vld [vmem:[%s14609_s5 + $0x400] ss:$24 sps:$4 sm:$0xff]  }
 0x542   :  { %7176 = vmatprep.subr.bf16.mxu0 %v10694_v18  ;;  %6997 = vmatpush1.bf16.msra.mxu1 %v10767_v5  ;;  %v10733_v18 = vld [vmem:[%s14609_s5 + $0x434] ss:$24 sps:$4 sm:$0xff]   ;;  %v10847_v5 = vld [vmem:[%s14609_s5 + $0x8a4] ss:$24 sps:$4 sm:$0xff]  }
 0x543   :  { %6998 = vmatprep.subr.bf16.mxu1 %v10775_v42  ;;  %v10845_v42 = vld [vmem:[%s14609_s5 + $0x8a0] ss:$24 sps:$4 sm:$0xff]  }
 0x545   :  { %7177 = vmatpush1.bf16.msra.mxu0 %v10692_v38  ;;  %v10731_v38 = vld [vmem:[%s14609_s5 + $0x430] ss:$24 sps:$4 sm:$0xff]  }
 0x546   :  { %7178 = vmatprep.subr.bf16.mxu0 %v10697_v39  ;;  %6999 = vmatpush1.bf16.msra.mxu1 %v10773_v59  ;;  %v10736_v39 = vld [vmem:[%s14609_s5 + $0x464] ss:$24 sps:$4 sm:$0xff]   ;;  %v10853_v59 = vld [vmem:[%s14609_s5 + $0x8d4] ss:$24 sps:$4 sm:$0xff]  }
 0x547   :  { %7000 = vmatprep.subr.bf16.mxu1 %v10781_v44  ;;  %v10851_v44 = vld [vmem:[%s14609_s5 + $0x8d0] ss:$24 sps:$4 sm:$0xff]  }
 0x549   :  { %7179 = vmatpush1.bf16.msra.mxu0 %v10695_v45  ;;  %v10734_v45 = vld [vmem:[%s14609_s5 + $0x460] ss:$24 sps:$4 sm:$0xff]  }
 0x54a   :  { %7180 = vmatprep.subr.bf16.mxu0 %v10700_v62  ;;  %7001 = vmatpush1.bf16.msra.mxu1 %v10779_v46  ;;  %v10739_v62 = vld [vmem:[%s14609_s5 + $0x494] ss:$24 sps:$4 sm:$0xff]  }
 0x54b   :  { %7002 = vmatprep.subr.bf16.mxu1 %v10787_v47  ;;  %v10859_v46 = vld [vmem:[%s14609_s5 + $0xc] ss:$24 sps:$4 sm:$0xff]   ;;  %v10737_v47 = vld [vmem:[%s14609_s5 + $0x490] ss:$24 sps:$4 sm:$0xff]  }
 0x54d   :  { %7181 = vmatpush1.bf16.msra.mxu0 %v10698_v48  ;;  %v10742_v48 = vld [vmem:[%s14609_s5 + $0x4c4] ss:$24 sps:$4 sm:$0xff]  }
 0x54e   :  { %7182 = vmatprep.subr.bf16.mxu0 %v10703_v49  ;;  %7003 = vmatpush1.bf16.msra.mxu1 %v10785_v1  ;;  %v10740_v49 = vld [vmem:[%s14609_s5 + $0x4c0] ss:$24 sps:$4 sm:$0xff]   ;;  %v10745_v1 = vld [vmem:[%s14609_s5 + $0x4f4] ss:$24 sps:$4 sm:$0xff]  }
 0x54f   :  { %7004 = vmatprep.subr.bf16.mxu1 %v10793_v53  ;;  %v10743_v53 = vld [vmem:[%s14609_s5 + $0x4f0] ss:$24 sps:$4 sm:$0xff]  }
 0x551   :  { %7183 = vmatpush1.bf16.msra.mxu0 %v10701_v54  ;;  %v10748_v54 = vld [vmem:[%s14609_s5 + $0x524] ss:$24 sps:$4 sm:$0xff]  }
 0x552   :  { %7184 = vmatprep.subr.bf16.mxu0 %v10706_v55  ;;  %7005 = vmatpush1.bf16.msra.mxu1 %v10791_v56  ;;  %v10746_v55 = vld [vmem:[%s14609_s5 + $0x520] ss:$24 sps:$4 sm:$0xff]   ;;  %v10751_v56 = vld [vmem:[%s14609_s5 + $0x554] ss:$24 sps:$4 sm:$0xff]  }
 0x553   :  { %7006 = vmatprep.subr.bf16.mxu1 %v10799_v63  ;;  %v10749_v63 = vld [vmem:[%s14609_s5 + $0x550] ss:$24 sps:$4 sm:$0xff]  }
 0x555   :  { %7185 = vmatpush1.bf16.msra.mxu0 %v10704_v0  ;;  %v10754_v0 = vld [vmem:[%s14609_s5 + $0x584] ss:$24 sps:$4 sm:$0xff]  }
 0x556   :  { %7186 = vmatprep.subr.bf16.mxu0 %v10709_v3  ;;  %7007 = vmatpush1.bf16.msra.mxu1 %v10797_v43  ;;  %v10752_v3 = vld [vmem:[%s14609_s5 + $0x580] ss:$24 sps:$4 sm:$0xff]   ;;  %v10757_v43 = vld [vmem:[%s14609_s5 + $0x5b4] ss:$24 sps:$4 sm:$0xff]  }
 0x557   :  { %7008 = vmatprep.subr.bf16.mxu1 %v10805_v24  ;;  %v10755_v24 = vld [vmem:[%s14609_s5 + $0x5b0] ss:$24 sps:$4 sm:$0xff]  }
 0x559   :  { %7187 = vmatpush1.bf16.msra.mxu0 %v10707_v4  ;;  %v10760_v4 = vld [vmem:[%s14609_s5 + $0x5e4] ss:$24 sps:$4 sm:$0xff]  }
 0x55a   :  { %7188 = vmatprep.subr.bf16.mxu0 %v10712_v8  ;;  %7009 = vmatpush1.bf16.msra.mxu1 %v10803_v9  ;;  %v10758_v8 = vld [vmem:[%s14609_s5 + $0x5e0] ss:$24 sps:$4 sm:$0xff]   ;;  %v10766_v9 = vld [vmem:[%s14609_s5 + $0x614] ss:$24 sps:$4 sm:$0xff]  }
 0x55b   :  { %7010 = vmatprep.subr.bf16.mxu1 %v10811_v10  ;;  %v10764_v10 = vld [vmem:[%s14609_s5 + $0x610] ss:$24 sps:$4 sm:$0xff]  }
 0x55d   :  { %7189 = vmatpush1.bf16.msra.mxu0 %v10710_v6  ;;  %v10772_v6 = vld [vmem:[%s14609_s5 + $0x644] ss:$24 sps:$4 sm:$0xff]  }
 0x55e   :  { %7199 = vmatprep.subr.bf16.mxu0 %v10715_v32  ;;  %7011 = vmatpush1.bf16.msra.mxu1 %v10809_v11  ;;  %v10770_v32 = vld [vmem:[%s14609_s5 + $0x640] ss:$24 sps:$4 sm:$0xff]   ;;  %v10778_v11 = vld [vmem:[%s14609_s5 + $0x674] ss:$24 sps:$4 sm:$0xff]  }
 0x55f   :  { %7012 = vmatprep.subr.bf16.mxu1 %v10817_v12  ;;  %v10776_v12 = vld [vmem:[%s14609_s5 + $0x670] ss:$24 sps:$4 sm:$0xff]  }
 0x560   :  { %7191 = vmatmul.mubr.bf16.vlgmr.msra.gmra.mrb[20].mxu0 %v13329_v7 }
 0x561   :  { %7200 = vmatpush1.bf16.msra.mxu0 %v10713_v13  ;;  %7231 = vmatprep.mubr.bf16.mxu0 %v13436_v52  ;;  %v10784_v13 = vld [vmem:[%s14609_s5 + $0x6a4] ss:$24 sps:$4 sm:$0xff]  }
 0x562   :  { %7201 = vmatprep.subr.bf16.mxu0 %v10718_v14  ;;  %7013 = vmatpush1.bf16.msra.mxu1 %v10815_v15  ;;  %v10782_v14 = vld [vmem:[%s14609_s5 + $0x6a0] ss:$24 sps:$4 sm:$0xff]   ;;  %v10790_v15 = vld [vmem:[%s14609_s5 + $0x6d4] ss:$24 sps:$4 sm:$0xff]  }
 0x563   :  { %7014 = vmatprep.subr.bf16.mxu1 %v10823_v16  ;;  %v10788_v16 = vld [vmem:[%s14609_s5 + $0x6d0] ss:$24 sps:$4 sm:$0xff]  }
 0x565   :  { %7202 = vmatpush1.bf16.msra.mxu0 %v10716_v19  ;;  %v10796_v19 = vld [vmem:[%s14609_s5 + $0x704] ss:$24 sps:$4 sm:$0xff]  }
 0x566   :  { %7203 = vmatprep.subr.bf16.mxu0 %v10721_v20  ;;  %7015 = vmatpush1.bf16.msra.mxu1 %v10821_v21  ;;  %v10794_v20 = vld [vmem:[%s14609_s5 + $0x700] ss:$24 sps:$4 sm:$0xff]   ;;  %v10802_v21 = vld [vmem:[%s14609_s5 + $0x734] ss:$24 sps:$4 sm:$0xff]  }
 0x567   :  { %7016 = vmatprep.subr.bf16.mxu1 %v10829_v22  ;;  %v10800_v22 = vld [vmem:[%s14609_s5 + $0x730] ss:$24 sps:$4 sm:$0xff]  }
 0x569   :  { %7204 = vmatpush1.bf16.msra.mxu0 %v10719_v23  ;;  %v10808_v23 = vld [vmem:[%s14609_s5 + $0x764] ss:$24 sps:$4 sm:$0xff]  }
 0x56a   :  { %7205 = vmatprep.subr.bf16.mxu0 %v10724_v33  ;;  %7017 = vmatpush1.bf16.msra.mxu1 %v10827_v34  ;;  %v10806_v33 = vld [vmem:[%s14609_s5 + $0x760] ss:$24 sps:$4 sm:$0xff]   ;;  %v10814_v34 = vld [vmem:[%s14609_s5 + $0x794] ss:$24 sps:$4 sm:$0xff]  }
 0x56b   :  { %7018 = vmatprep.subr.bf16.mxu1 %v10835_v41  ;;  %v10812_v41 = vld [vmem:[%s14609_s5 + $0x790] ss:$24 sps:$4 sm:$0xff]  }
 0x56d   :  { %7206 = vmatpush1.bf16.msra.mxu0 %v10722_v25  ;;  %v10820_v25 = vld [vmem:[%s14609_s5 + $0x7c4] ss:$24 sps:$4 sm:$0xff]  }
 0x56e   :  { %7207 = vmatprep.subr.bf16.mxu0 %v10727_v26  ;;  %7019 = vmatpush1.bf16.msra.mxu1 %v10833_v27  ;;  %v10818_v26 = vld [vmem:[%s14609_s5 + $0x7c0] ss:$24 sps:$4 sm:$0xff]   ;;  %v10826_v27 = vld [vmem:[%s14609_s5 + $0x7f4] ss:$24 sps:$4 sm:$0xff]  }
 0x56f   :  { %7020 = vmatprep.subr.bf16.mxu1 %v10841_v28  ;;  %v10824_v28 = vld [vmem:[%s14609_s5 + $0x7f0] ss:$24 sps:$4 sm:$0xff]  }
 0x571   :  { %7208 = vmatpush1.bf16.msra.mxu0 %v10725_v29  ;;  %v10832_v29 = vld [vmem:[%s14609_s5 + $0x824] ss:$24 sps:$4 sm:$0xff]  }
 0x572   :  { %7209 = vmatprep.subr.bf16.mxu0 %v10730_v30  ;;  %7021 = vmatpush1.bf16.msra.mxu1 %v10839_v35  ;;  %v10830_v30 = vld [vmem:[%s14609_s5 + $0x820] ss:$24 sps:$4 sm:$0xff]   ;;  %v10838_v35 = vld [vmem:[%s14609_s5 + $0x854] ss:$24 sps:$4 sm:$0xff]  }
 0x573   :  { %7022 = vmatprep.subr.bf16.mxu1 %v10847_v5  ;;  %v10842_v5 = vld [vmem:[%s14609_s5 + $0x880] ss:$24 sps:$4 sm:$0xff]  }
 0x575   :  { %7210 = vmatpush1.bf16.msra.mxu0 %v10728_v37  ;;  %v10836_v37 = vld [vmem:[%s14609_s5 + $0x850] ss:$24 sps:$4 sm:$0xff]  }
 0x576   :  { %7211 = vmatprep.subr.bf16.mxu0 %v10733_v18  ;;  %7023 = vmatpush1.bf16.msra.mxu1 %v10845_v42  ;;  %v10844_v18 = vld [vmem:[%s14609_s5 + $0x884] ss:$24 sps:$4 sm:$0xff]   ;;  %v10850_v42 = vld [vmem:[%s14609_s5 + $0x8b4] ss:$24 sps:$4 sm:$0xff]  }
 0x577   :  { %7024 = vmatprep.subr.bf16.mxu1 %v10853_v59  ;;  %v10854_v59 = vld [vmem:[%s14609_s5 + $0x8e0] ss:$24 sps:$4 sm:$0xff]  }
 0x579   :  { %7212 = vmatpush1.bf16.msra.mxu0 %v10731_v38  ;;  %v10848_v38 = vld [vmem:[%s14609_s5 + $0x8b0] ss:$24 sps:$4 sm:$0xff]  }
 0x57a   :  { %7213 = vmatprep.subr.bf16.mxu0 %v10736_v39  ;;  %7025 = vmatpush1.bf16.msra.mxu1 %v10851_v44  ;;  %v10856_v39 = vld [vmem:[%s14609_s5 + $0x8e4] ss:$24 sps:$4 sm:$0xff]   ;;  %v2705_v44 = vrot.slane %v13297_v40, %v11587_v36 }
 0x57b   :  { %7035 = vmatprep.subr.bf16.mxu1 %v10859_v46 }
 0x57d   :  { %7214 = vmatpush1.bf16.msra.mxu0 %v10734_v45  ;;  %v2709_v45 = vrot.slane %v13297_v40, %v11403_v50  ;;  %v10862_v40 = vld [vmem:[%s14609_s5 + $0x3c] ss:$24 sps:$4 sm:$0xff]  }
 0x57e   :  { %7215 = vmatprep.subr.bf16.mxu0 %v10739_v62 }
 0x581   :  { %7216 = vmatpush1.bf16.msra.mxu0 %v10737_v47 }
 0x582   :  { %7217 = vmatprep.subr.bf16.mxu0 %v10742_v48 }
 0x585   :  { %7218 = vmatpush1.bf16.msra.mxu0 %v10740_v49 }
 0x586   :  { %7219 = vmatprep.subr.bf16.mxu0 %v10745_v1 }
 0x589   :  { %7220 = vmatpush1.bf16.msra.mxu0 %v10743_v53 }
 0x58a   :  { %7221 = vmatprep.subr.bf16.mxu0 %v10748_v54 }
 0x58d   :  { %7222 = vmatpush1.bf16.msra.mxu0 %v10746_v55 }
 0x58e   :  { %7223 = vmatprep.subr.bf16.mxu0 %v10751_v56 }
 0x591   :  { %7224 = vmatpush1.bf16.msra.mxu0 %v10749_v63 }
 0x592   :  { %7225 = vmatprep.subr.bf16.mxu0 %v10754_v0  ;;  %v10857_v0 = vld [vmem:[%s14609_s5 + $0x8] ss:$24 sps:$4 sm:$0xff]  }
 0x595   :  { %7226 = vmatpush1.bf16.msra.mxu0 %v10752_v3 }
 0x596   :  { %7227 = vmatprep.subr.bf16.mxu0 %v10757_v43  ;;  %v10860_v43 = vld [vmem:[%s14609_s5 + $0x38] ss:$24 sps:$4 sm:$0xff]  }
 0x599   :  { %7228 = vmatpush1.bf16.msra.mxu0 %v10755_v24  ;;  %v10865_v24 = vld [vmem:[%s14609_s5 + $0x6c] ss:$24 sps:$4 sm:$0xff]  }
 0x59a   :  { %7229 = vmatprep.subr.bf16.mxu0 %v10760_v4  ;;  %v10863_v4 = vld [vmem:[%s14609_s5 + $0x68] ss:$24 sps:$4 sm:$0xff]  }
 0x59d   :  { %7230 = vmatpush1.bf16.msra.mxu0 %v10758_v8  ;;  %v10868_v8 = vld [vmem:[%s14609_s5 + $0x9c] ss:$24 sps:$4 sm:$0xff]  }
 0x59e   :  { %7240 = vmatprep.subr.bf16.mxu0 %v10766_v9  ;;  %v10871_v9 = vld [vmem:[%s14609_s5 + $0xcc] ss:$24 sps:$4 sm:$0xff]  }
 0x5a0   :  { %7232 = vmatmul.mubr.bf16.vlgmr.msra.gmra.mrb[20].mxu0 %v13537_v31 }
 0x5a1   :  { %7241 = vmatpush1.bf16.msra.mxu0 %v10764_v10  ;;  %v10869_v10 = vld [vmem:[%s14609_s5 + $0xc8] ss:$24 sps:$4 sm:$0xff]  }
 0x5a2   :  { %7242 = vmatprep.subr.bf16.mxu0 %v10772_v6  ;;  %v10874_v6 = vld [vmem:[%s14609_s5 + $0xfc] ss:$24 sps:$4 sm:$0xff]  }
 0x5a5   :  { %7243 = vmatpush1.bf16.msra.mxu0 %v10770_v32  ;;  %v10872_v32 = vld [vmem:[%s14609_s5 + $0xf8] ss:$24 sps:$4 sm:$0xff]  }
 0x5a6   :  { %7244 = vmatprep.subr.bf16.mxu0 %v10778_v11  ;;  %v10877_v11 = vld [vmem:[%s14609_s5 + $0x12c] ss:$24 sps:$4 sm:$0xff]  }
 0x5a9   :  { %7245 = vmatpush1.bf16.msra.mxu0 %v10776_v12  ;;  %v10875_v12 = vld [vmem:[%s14609_s5 + $0x128] ss:$24 sps:$4 sm:$0xff]  }
 0x5aa   :  { %7246 = vmatprep.subr.bf16.mxu0 %v10784_v13  ;;  %v10880_v13 = vld [vmem:[%s14609_s5 + $0x15c] ss:$24 sps:$4 sm:$0xff]  }
 0x5ad   :  { %7247 = vmatpush1.bf16.msra.mxu0 %v10782_v14  ;;  %v10878_v14 = vld [vmem:[%s14609_s5 + $0x158] ss:$24 sps:$4 sm:$0xff]  }
 0x5ae   :  { %7248 = vmatprep.subr.bf16.mxu0 %v10790_v15  ;;  %v10883_v15 = vld [vmem:[%s14609_s5 + $0x18c] ss:$24 sps:$4 sm:$0xff]  }
 0x5b1   :  { %7249 = vmatpush1.bf16.msra.mxu0 %v10788_v16  ;;  %v10881_v16 = vld [vmem:[%s14609_s5 + $0x188] ss:$24 sps:$4 sm:$0xff]  }
 0x5b2   :  { %7250 = vmatprep.subr.bf16.mxu0 %v10796_v19  ;;  %v10886_v19 = vld [vmem:[%s14609_s5 + $0x1bc] ss:$24 sps:$4 sm:$0xff]  }
 0x5b5   :  { %7251 = vmatpush1.bf16.msra.mxu0 %v10794_v20  ;;  %v10884_v20 = vld [vmem:[%s14609_s5 + $0x1b8] ss:$24 sps:$4 sm:$0xff]  }
 0x5b6   :  { %7252 = vmatprep.subr.bf16.mxu0 %v10802_v21  ;;  %v10889_v21 = vld [vmem:[%s14609_s5 + $0x1ec] ss:$24 sps:$4 sm:$0xff]  }
 0x5b9   :  { %7253 = vmatpush1.bf16.msra.mxu0 %v10800_v22  ;;  %v10887_v22 = vld [vmem:[%s14609_s5 + $0x1e8] ss:$24 sps:$4 sm:$0xff]  }
 0x5ba   :  { %7254 = vmatprep.subr.bf16.mxu0 %v10808_v23  ;;  %v10892_v23 = vld [vmem:[%s14609_s5 + $0x21c] ss:$24 sps:$4 sm:$0xff]  }
 0x5bd   :  { %7255 = vmatpush1.bf16.msra.mxu0 %v10806_v33  ;;  %v10890_v33 = vld [vmem:[%s14609_s5 + $0x218] ss:$24 sps:$4 sm:$0xff]  }
 0x5be   :  { %7256 = vmatprep.subr.bf16.mxu0 %v10814_v34  ;;  %v10895_v34 = vld [vmem:[%s14609_s5 + $0x24c] ss:$24 sps:$4 sm:$0xff]  }
 0x5c1   :  { %7257 = vmatpush1.bf16.msra.mxu0 %v10812_v41  ;;  %v10893_v41 = vld [vmem:[%s14609_s5 + $0x248] ss:$24 sps:$4 sm:$0xff]  }
 0x5c2   :  { %7258 = vmatprep.subr.bf16.mxu0 %v10820_v25  ;;  %v10898_v25 = vld [vmem:[%s14609_s5 + $0x27c] ss:$24 sps:$4 sm:$0xff]  }
 0x5c5   :  { %7259 = vmatpush1.bf16.msra.mxu0 %v10818_v26  ;;  %v10896_v26 = vld [vmem:[%s14609_s5 + $0x278] ss:$24 sps:$4 sm:$0xff]  }
 0x5c6   :  { %7260 = vmatprep.subr.bf16.mxu0 %v10826_v27  ;;  %v10901_v27 = vld [vmem:[%s14609_s5 + $0x2ac] ss:$24 sps:$4 sm:$0xff]  }
 0x5c9   :  { %7261 = vmatpush1.bf16.msra.mxu0 %v10824_v28  ;;  %v10899_v28 = vld [vmem:[%s14609_s5 + $0x2a8] ss:$24 sps:$4 sm:$0xff]  }
 0x5ca   :  { %7262 = vmatprep.subr.bf16.mxu0 %v10832_v29  ;;  %v10904_v29 = vld [vmem:[%s14609_s5 + $0x2dc] ss:$24 sps:$4 sm:$0xff]  }
 0x5cd   :  { %7263 = vmatpush1.bf16.msra.mxu0 %v10830_v30  ;;  %v10902_v30 = vld [vmem:[%s14609_s5 + $0x2d8] ss:$24 sps:$4 sm:$0xff]  }
 0x5ce   :  { %7264 = vmatprep.subr.bf16.mxu0 %v10838_v35  ;;  %v10907_v35 = vld [vmem:[%s14609_s5 + $0x30c] ss:$24 sps:$4 sm:$0xff]  }
 0x5d1   :  { %7265 = vmatpush1.bf16.msra.mxu0 %v10836_v37  ;;  %v10905_v37 = vld [vmem:[%s14609_s5 + $0x308] ss:$24 sps:$4 sm:$0xff]  }
 0x5d2   :  { %7266 = vmatprep.subr.bf16.mxu0 %v10844_v18  ;;  %v11001_v18 = vld [vmem:[%s14610_s6 + $0x140] sm:$0xff]  }
 0x5d5   :  { %7267 = vmatpush1.bf16.msra.mxu0 %v10842_v5  ;;  %v11002_v5 = vld [vmem:[%s14610_s6 + $0x100] sm:$0xff]  }
 0x5d6   :  { %7268 = vmatprep.subr.bf16.mxu0 %v10850_v42  ;;  %v10910_v42 = vld [vmem:[%s14609_s5 + $0x33c] ss:$24 sps:$4 sm:$0xff]  }
 0x5d9   :  { %7269 = vmatpush1.bf16.msra.mxu0 %v10848_v38  ;;  %v10908_v38 = vld [vmem:[%s14609_s5 + $0x338] ss:$24 sps:$4 sm:$0xff]  }
 0x5da   :  { %7270 = vmatprep.subr.bf16.mxu0 %v10856_v39  ;;  %v11005_v39 = vld [vmem:[%s14610_s6 + $0x148] sm:$0xff]  }
 0x5dd   :  { %7271 = vmatpush1.bf16.msra.mxu0 %v10854_v59  ;;  %v11006_v59 = vld [vmem:[%s14610_s6 + $0x108] sm:$0xff]  }
 0x5de   :  { %9690 = vmatprep.subr.bf16.mxu0 %v11001_v18  ;;  %v10965_v18 = vld [vmem:[%s14609_s5 + $0x6c8] ss:$24 sps:$4 sm:$0xff]  }
 0x5f3   :  { %v5121_v62 = vpop.f32.mrb[16].mxu0 }
 0x5f4   :  { %v9718_v46 = vadd.f32 %v5121_v62, %v2705_v44  ;;  %v5123_v47 = vpop.f32.mrb[17].mxu0  ;;  %v10913_v44 = vld [vmem:[%s14609_s5 + $0x36c] ss:$24 sps:$4 sm:$0xff]   ;;  %v10916_v62 = vld [vmem:[%s14609_s5 + $0x39c] ss:$24 sps:$4 sm:$0xff]  }
 0x5f5   :  { %v9719_v48 = vadd.f32 %v5123_v47, %v2709_v45  ;;  %v5125_v49 = vpop.f32.mrb[18].mxu0  ;;  %v11009_v45 = vld [vmem:[%s14610_s6 + $0x150] sm:$0xff]   ;;  %v11013_v47 = vld [vmem:[%s14610_s6 + $0x158] sm:$0xff]  }
 0x5f6   :  { %vm5132_vm8 = vcmp.gt.f32.partialorder %v9718_v46, 0.0  ;;  %v5138_v1 = vmul.f32 0.01, %v9718_v46  ;;  %v5126_v53 = vpop.f32.mrb[19].mxu0  ;;  %v10919_v49 = vld [vmem:[%s14609_s5 + $0x3cc] ss:$24 sps:$4 sm:$0xff]  }
 0x5f7   :  { %vm5133_vm9 = vcmp.gt.f32.partialorder %v9719_v48, 0.0  ;;  %v5139_v54 = vmul.f32 0.01, %v9719_v48  ;;  %v11017_v53 = vld [vmem:[%s14610_s6 + $0x160] sm:$0xff]  }
 0x5f8   :  { %v5144_v55 = vsel %vm5132_vm8, %v9718_v46, %v5138_v1  ;;  %v10914_v46 = vld [vmem:[%s14609_s5 + $0x398] ss:$24 sps:$4 sm:$0xff]   ;;  %v10917_v1 = vld [vmem:[%s14609_s5 + $0x3c8] ss:$24 sps:$4 sm:$0xff]  }
 0x5f9   :  { %v5145_v56 = vsel %vm5133_vm9, %v9719_v48, %v5139_v54  ;;  %v13882_v3 = vpack.c.bf16 %v5144_v55, %v5144_v55  ;;  %v11014_v48 = vld [vmem:[%s14610_s6 + $0x118] sm:$0xff]   ;;  %v11018_v54 = vld [vmem:[%s14610_s6 + $0x120] sm:$0xff]  }
 0x5fa   :  { %v13877_v63 = vpack.c.bf16 %v5145_v56, %v5145_v56  ;;  %v10922_v55 = vld [vmem:[%s14609_s5 + $0x3fc] ss:$24 sps:$4 sm:$0xff]   ;;  %v10920_v56 = vld [vmem:[%s14609_s5 + $0x3f8] ss:$24 sps:$4 sm:$0xff]  }
 0x5fc   :  { %7026 = vmatprep.mubr.bf16.mxu1 %v13877_v63  ;;  %7272 = vmatprep.mubr.bf16.mxu0 %v13877_v63 }
 0x5fd   :  { %7027 = vmatmul.mubr.bf16.vlgmr.msra.gmra.mrb[28].mxu1 %v13882_v3  ;;  %7273 = vmatmul.mubr.bf16.vlgmr.msra.gmra.mrb[20].mxu0 %v13882_v3 }
 0x5fe   :  { %7036 = vmatpush1.bf16.msra.mxu1 %v10857_v0  ;;  %7067 = vmatprep.mubr.bf16.mxu1 %v13321_v17  ;;  %v10866_v17 = vld [vmem:[%s14609_s5 + $0x98] ss:$24 sps:$4 sm:$0xff]   ;;  %v11021_v0 = vld [vmem:[%s14610_s6 + $0x168] sm:$0xff]  }
 0x5ff   :  { %7037 = vmatprep.subr.bf16.mxu1 %v10862_v40  ;;  %9691 = vmatpush3.bf16.msra.mxu0 %v11002_v5  ;;  %v11022_v40 = vld [vmem:[%s14610_s6 + $0x128] sm:$0xff]   ;;  %v10970_v5 = vld [vmem:[%s14609_s5 + $0x6fc] ss:$24 sps:$4 sm:$0xff]  }
 0x600   :  { %9692 = vmatprep.subr.bf16.mxu0 %v11005_v39  ;;  %v10971_v39 = vld [vmem:[%s14609_s5 + $0x728] ss:$24 sps:$4 sm:$0xff]  }
 0x602   :  { %7038 = vmatpush1.bf16.msra.mxu1 %v10860_v43  ;;  %v10925_v43 = vld [vmem:[%s14609_s5 + $0x42c] ss:$24 sps:$4 sm:$0xff]  }
 0x603   :  { %7039 = vmatprep.subr.bf16.mxu1 %v10865_v24  ;;  %9693 = vmatpush3.bf16.msra.mxu0 %v11006_v59  ;;  %v10923_v24 = vld [vmem:[%s14609_s5 + $0x428] ss:$24 sps:$4 sm:$0xff]   ;;  %v10976_v59 = vld [vmem:[%s14609_s5 + $0x75c] ss:$24 sps:$4 sm:$0xff]  }
 0x604   :  { %9694 = vmatprep.subr.bf16.mxu0 %v11009_v45  ;;  %v10977_v45 = vld [vmem:[%s14609_s5 + $0x788] ss:$24 sps:$4 sm:$0xff]  }
 0x606   :  { %7040 = vmatpush1.bf16.msra.mxu1 %v10863_v4  ;;  %v10928_v4 = vld [vmem:[%s14609_s5 + $0x45c] ss:$24 sps:$4 sm:$0xff]  }
 0x607   :  { %7041 = vmatprep.subr.bf16.mxu1 %v10868_v8  ;;  %v11025_v8 = vld [vmem:[%s14610_s6 + $0x170] sm:$0xff]  }
 0x60a   :  { %7042 = vmatpush1.bf16.msra.mxu1 %v10866_v17  ;;  %v11026_v17 = vld [vmem:[%s14610_s6 + $0x130] sm:$0xff]  }
 0x60b   :  { %7043 = vmatprep.subr.bf16.mxu1 %v10871_v9  ;;  %v10926_v9 = vld [vmem:[%s14609_s5 + $0x458] ss:$24 sps:$4 sm:$0xff]  }
 0x60e   :  { %7044 = vmatpush1.bf16.msra.mxu1 %v10869_v10  ;;  %v10931_v10 = vld [vmem:[%s14609_s5 + $0x48c] ss:$24 sps:$4 sm:$0xff]  }
 0x60f   :  { %7045 = vmatprep.subr.bf16.mxu1 %v10874_v6  ;;  %v11029_v6 = vld [vmem:[%s14610_s6 + $0x178] sm:$0xff]  }
 0x612   :  { %7046 = vmatpush1.bf16.msra.mxu1 %v10872_v32  ;;  %v11030_v32 = vld [vmem:[%s14610_s6 + $0x138] sm:$0xff]  }
 0x613   :  { %7047 = vmatprep.subr.bf16.mxu1 %v10877_v11  ;;  %v10929_v11 = vld [vmem:[%s14609_s5 + $0x488] ss:$24 sps:$4 sm:$0xff]  }
 0x616   :  { %7048 = vmatpush1.bf16.msra.mxu1 %v10875_v12  ;;  %v10934_v12 = vld [vmem:[%s14609_s5 + $0x4bc] ss:$24 sps:$4 sm:$0xff]  }
 0x617   :  { %7049 = vmatprep.subr.bf16.mxu1 %v10880_v13  ;;  %v10932_v13 = vld [vmem:[%s14609_s5 + $0x4b8] ss:$24 sps:$4 sm:$0xff]  }
 0x61a   :  { %7050 = vmatpush1.bf16.msra.mxu1 %v10878_v14  ;;  %v10937_v14 = vld [vmem:[%s14609_s5 + $0x4ec] ss:$24 sps:$4 sm:$0xff]  }
 0x61b   :  { %7051 = vmatprep.subr.bf16.mxu1 %v10883_v15  ;;  %v10935_v15 = vld [vmem:[%s14609_s5 + $0x4e8] ss:$24 sps:$4 sm:$0xff]  }
 0x61e   :  { %7052 = vmatpush1.bf16.msra.mxu1 %v10881_v16  ;;  %v10940_v16 = vld [vmem:[%s14609_s5 + $0x51c] ss:$24 sps:$4 sm:$0xff]  }
 0x61f   :  { %7053 = vmatprep.subr.bf16.mxu1 %v10886_v19  ;;  %v10938_v19 = vld [vmem:[%s14609_s5 + $0x518] ss:$24 sps:$4 sm:$0xff]  }
 0x622   :  { %7054 = vmatpush1.bf16.msra.mxu1 %v10884_v20  ;;  %v10943_v20 = vld [vmem:[%s14609_s5 + $0x54c] ss:$24 sps:$4 sm:$0xff]  }
 0x623   :  { %7055 = vmatprep.subr.bf16.mxu1 %v10889_v21  ;;  %v10941_v21 = vld [vmem:[%s14609_s5 + $0x548] ss:$24 sps:$4 sm:$0xff]  }
 0x626   :  { %7056 = vmatpush1.bf16.msra.mxu1 %v10887_v22  ;;  %v10946_v22 = vld [vmem:[%s14609_s5 + $0x57c] ss:$24 sps:$4 sm:$0xff]  }
 0x627   :  { %7057 = vmatprep.subr.bf16.mxu1 %v10892_v23  ;;  %v10944_v23 = vld [vmem:[%s14609_s5 + $0x578] ss:$24 sps:$4 sm:$0xff]  }
 0x62a   :  { %7058 = vmatpush1.bf16.msra.mxu1 %v10890_v33  ;;  %v10949_v33 = vld [vmem:[%s14609_s5 + $0x5ac] ss:$24 sps:$4 sm:$0xff]  }
 0x62b   :  { %7059 = vmatprep.subr.bf16.mxu1 %v10895_v34  ;;  %v10947_v34 = vld [vmem:[%s14609_s5 + $0x5a8] ss:$24 sps:$4 sm:$0xff]  }
 0x62e   :  { %7060 = vmatpush1.bf16.msra.mxu1 %v10893_v41  ;;  %v10952_v41 = vld [vmem:[%s14609_s5 + $0x5dc] ss:$24 sps:$4 sm:$0xff]  }
 0x62f   :  { %7061 = vmatprep.subr.bf16.mxu1 %v10898_v25  ;;  %v10950_v25 = vld [vmem:[%s14609_s5 + $0x5d8] ss:$24 sps:$4 sm:$0xff]  }
 0x632   :  { %7062 = vmatpush1.bf16.msra.mxu1 %v10896_v26  ;;  %v10955_v26 = vld [vmem:[%s14609_s5 + $0x60c] ss:$24 sps:$4 sm:$0xff]  }
 0x633   :  { %7063 = vmatprep.subr.bf16.mxu1 %v10901_v27  ;;  %v10953_v27 = vld [vmem:[%s14609_s5 + $0x608] ss:$24 sps:$4 sm:$0xff]  }
 0x636   :  { %7064 = vmatpush1.bf16.msra.mxu1 %v10899_v28  ;;  %v10958_v28 = vld [vmem:[%s14609_s5 + $0x63c] ss:$24 sps:$4 sm:$0xff]  }
 0x637   :  { %7065 = vmatprep.subr.bf16.mxu1 %v10904_v29  ;;  %v10956_v29 = vld [vmem:[%s14609_s5 + $0x638] ss:$24 sps:$4 sm:$0xff]  }
 0x63a   :  { %7066 = vmatpush1.bf16.msra.mxu1 %v10902_v30  ;;  %v10961_v30 = vld [vmem:[%s14609_s5 + $0x66c] ss:$24 sps:$4 sm:$0xff]  }
 0x63b   :  { %7076 = vmatprep.subr.bf16.mxu1 %v10907_v35  ;;  %v10959_v35 = vld [vmem:[%s14609_s5 + $0x668] ss:$24 sps:$4 sm:$0xff]  }
 0x63d   :  { %7068 = vmatmul.mubr.bf16.vlgmr.msra.gmra.mrb[32].mxu1 %v13329_v7  ;;  %v10911_v7 = vld [vmem:[%s14609_s5 + $0x368] ss:$24 sps:$4 sm:$0xff]  }
 0x63e   :  { %7077 = vmatpush1.bf16.msra.mxu1 %v10905_v37  ;;  %7108 = vmatprep.mubr.bf16.mxu1 %v13436_v52  ;;  %v11010_v52 = vld [vmem:[%s14610_s6 + $0x110] sm:$0xff]   ;;  %v10967_v37 = vld [vmem:[%s14609_s5 + $0x6cc] ss:$24 sps:$4 sm:$0xff]  }
 0x63f   :  { %7078 = vmatprep.subr.bf16.mxu1 %v10910_v42  ;;  %9695 = vmatpush3.bf16.msra.mxu0 %v11010_v52  ;;  %v10968_v42 = vld [vmem:[%s14609_s5 + $0x6f8] ss:$24 sps:$4 sm:$0xff]   ;;  %v10982_v52 = vld [vmem:[%s14609_s5 + $0x7bc] ss:$24 sps:$4 sm:$0xff]  }
 0x640   :  { %9696 = vmatprep.subr.bf16.mxu0 %v11013_v47  ;;  %v10983_v47 = vld [vmem:[%s14609_s5 + $0x7e8] ss:$24 sps:$4 sm:$0xff]  }
 0x642   :  { %7079 = vmatpush1.bf16.msra.mxu1 %v10908_v38  ;;  %v10973_v38 = vld [vmem:[%s14609_s5 + $0x72c] ss:$24 sps:$4 sm:$0xff]  }
 0x643   :  { %7080 = vmatprep.subr.bf16.mxu1 %v10913_v44  ;;  %9697 = vmatpush3.bf16.msra.mxu0 %v11014_v48  ;;  %v10974_v44 = vld [vmem:[%s14609_s5 + $0x758] ss:$24 sps:$4 sm:$0xff]   ;;  %v10988_v48 = vld [vmem:[%s14609_s5 + $0x81c] ss:$24 sps:$4 sm:$0xff]  }
 0x644   :  { %9698 = vmatprep.subr.bf16.mxu0 %v11017_v53  ;;  %v10989_v53 = vld [vmem:[%s14609_s5 + $0x848] ss:$24 sps:$4 sm:$0xff]  }
 0x646   :  { %7081 = vmatpush1.bf16.msra.mxu1 %v10911_v7  ;;  %v10979_v7 = vld [vmem:[%s14609_s5 + $0x78c] ss:$24 sps:$4 sm:$0xff]  }
 0x647   :  { %7082 = vmatprep.subr.bf16.mxu1 %v10916_v62  ;;  %9699 = vmatpush3.bf16.msra.mxu0 %v11018_v54  ;;  %v10980_v62 = vld [vmem:[%s14609_s5 + $0x7b8] ss:$24 sps:$4 sm:$0xff]   ;;  %v10994_v54 = vld [vmem:[%s14609_s5 + $0x87c] ss:$24 sps:$4 sm:$0xff]  }
 0x648   :  { %9700 = vmatprep.subr.bf16.mxu0 %v11021_v0  ;;  %v10995_v0 = vld [vmem:[%s14609_s5 + $0x8a8] ss:$24 sps:$4 sm:$0xff]  }
 0x64a   :  { %7083 = vmatpush1.bf16.msra.mxu1 %v10914_v46  ;;  %v10985_v46 = vld [vmem:[%s14609_s5 + $0x7ec] ss:$24 sps:$4 sm:$0xff]  }
 0x64b   :  { %7084 = vmatprep.subr.bf16.mxu1 %v10919_v49  ;;  %9701 = vmatpush3.bf16.msra.mxu0 %v11022_v40  ;;  %v10986_v49 = vld [vmem:[%s14609_s5 + $0x818] ss:$24 sps:$4 sm:$0xff]   ;;  %v11000_v40 = vld [vmem:[%s14609_s5 + $0x8dc] ss:$24 sps:$4 sm:$0xff]  }
 0x64c   :  { %9702 = vmatprep.subr.bf16.mxu0 %v11025_v8  ;;  %v11007_v8 = vld [vmem:[%s14610_s6 + $0x48] sm:$0xff]  }
 0x64e   :  { %7085 = vmatpush1.bf16.msra.mxu1 %v10917_v1  ;;  %v10991_v1 = vld [vmem:[%s14609_s5 + $0x84c] ss:$24 sps:$4 sm:$0xff]  }
 0x64f   :  { %7086 = vmatprep.subr.bf16.mxu1 %v10922_v55  ;;  %9703 = vmatpush3.bf16.msra.mxu0 %v11026_v17  ;;  %v10992_v55 = vld [vmem:[%s14609_s5 + $0x878] ss:$24 sps:$4 sm:$0xff]   ;;  %v11008_v17 = vld [vmem:[%s14610_s6 + $0x8] sm:$0xff]  }
 0x650   :  { %9704 = vmatprep.subr.bf16.mxu0 %v11029_v6  ;;  %v11016_v6 = vld [vmem:[%s14610_s6 + $0x18] sm:$0xff]  }
 0x652   :  { %7087 = vmatpush1.bf16.msra.mxu1 %v10920_v56  ;;  %v10997_v56 = vld [vmem:[%s14609_s5 + $0x8ac] ss:$24 sps:$4 sm:$0xff]  }
 0x653   :  { %7088 = vmatprep.subr.bf16.mxu1 %v10925_v43  ;;  %9705 = vmatpush3.bf16.msra.mxu0 %v11030_v32  ;;  %v10998_v43 = vld [vmem:[%s14609_s5 + $0x8d8] ss:$24 sps:$4 sm:$0xff]   ;;  %v11019_v32 = vld [vmem:[%s14610_s6 + $0x60] sm:$0xff]  }
 0x656   :  { %7089 = vmatpush1.bf16.msra.mxu1 %v10923_v24  ;;  %v11003_v24 = vld [vmem:[%s14610_s6 + $0x40] sm:$0xff]  }
 0x657   :  { %7090 = vmatprep.subr.bf16.mxu1 %v10928_v4  ;;  %v11004_v4 = vld [vmem:[%s14610_s6] sm:$0xff]  }
 0x65a   :  { %7091 = vmatpush1.bf16.msra.mxu1 %v10926_v9  ;;  %v11011_v9 = vld [vmem:[%s14610_s6 + $0x50] sm:$0xff]  }
 0x65b   :  { %7092 = vmatprep.subr.bf16.mxu1 %v10931_v10  ;;  %v11012_v10 = vld [vmem:[%s14610_s6 + $0x10] sm:$0xff]  }
 0x65e   :  { %7093 = vmatpush1.bf16.msra.mxu1 %v10929_v11  ;;  %v11020_v11 = vld [vmem:[%s14610_s6 + $0x20] sm:$0xff]  }
 0x65f   :  { %7094 = vmatprep.subr.bf16.mxu1 %v10934_v12  ;;  %v14257_v12 = vld [vmem:[%s14606_s7 + $0x18] sm:$0x3f] }
 0x662   :  { %7095 = vmatpush1.bf16.msra.mxu1 %v10932_v13  ;;  %v11023_v13 = vld [vmem:[%s14610_s6 + $0x68] sm:$0xff]  }
 0x663   :  { %7096 = vmatprep.subr.bf16.mxu1 %v10937_v14  ;;  %v5445_v14 = vrot.slane %v14257_v12, %v11307_v58 }
 0x666   :  { %7097 = vmatpush1.bf16.msra.mxu1 %v10935_v15  ;;  %v5461_v15 = vrot.slane %v14257_v12, %v11587_v36 }
 0x667   :  { %7098 = vmatprep.subr.bf16.mxu1 %v10940_v16  ;;  %v5449_v16 = vrot.slane %v14257_v12, %v11315_v60 }
 0x66a   :  { %7099 = vmatpush1.bf16.msra.mxu1 %v10938_v19  ;;  %v5465_v19 = vrot.slane %v14257_v12, %v11403_v50 }
 0x66b   :  { %7100 = vmatprep.subr.bf16.mxu1 %v10943_v20  ;;  %v11024_v20 = vld [vmem:[%s14610_s6 + $0x28] sm:$0xff]  }
 0x66e   :  { %7101 = vmatpush1.bf16.msra.mxu1 %v10941_v21  ;;  %v11027_v21 = vld [vmem:[%s14610_s6 + $0x70] sm:$0xff]  }
 0x66f   :  { %7102 = vmatprep.subr.bf16.mxu1 %v10946_v22 }
 0x672   :  { %7103 = vmatpush1.bf16.msra.mxu1 %v10944_v23 }
 0x673   :  { %7104 = vmatprep.subr.bf16.mxu1 %v10949_v33 }
 0x676   :  { %7105 = vmatpush1.bf16.msra.mxu1 %v10947_v34 }
 0x677   :  { %7106 = vmatprep.subr.bf16.mxu1 %v10952_v41 }
 0x67a   :  { %7107 = vmatpush1.bf16.msra.mxu1 %v10950_v25 }
 0x67b   :  { %7117 = vmatprep.subr.bf16.mxu1 %v10955_v26  ;;  %v11028_v26 = vld [vmem:[%s14610_s6 + $0x30] sm:$0xff]  }
 0x67d   :  { %7109 = vmatmul.mubr.bf16.vlgmr.msra.gmra.mrb[32].mxu1 %v13537_v31  ;;  %v10964_v31 = vld [vmem:[%s14609_s5 + $0x69c] ss:$24 sps:$4 sm:$0xff]  }
 0x67e   :  { %7118 = vmatpush1.bf16.msra.mxu1 %v10953_v27  ;;  %7149 = vmatprep.mubr.bf16.mxu1 %v13877_v63  ;;  %v10962_v63 = vld [vmem:[%s14609_s5 + $0x698] ss:$24 sps:$4 sm:$0xff]  }
 0x67f   :  { %7119 = vmatprep.subr.bf16.mxu1 %v10958_v28 }
 0x682   :  { %7120 = vmatpush1.bf16.msra.mxu1 %v10956_v29  ;;  %v11031_v29 = vld [vmem:[%s14610_s6 + $0x78] sm:$0xff]  }
 0x683   :  { %7121 = vmatprep.subr.bf16.mxu1 %v10961_v30 }
 0x686   :  { %7122 = vmatpush1.bf16.msra.mxu1 %v10959_v35 }
 0x687   :  { %7123 = vmatprep.subr.bf16.mxu1 %v10964_v31 }
 0x68a   :  { %7124 = vmatpush1.bf16.msra.mxu1 %v10962_v63 }
 0x68b   :  { %7125 = vmatprep.subr.bf16.mxu1 %v10967_v37 }
 0x68e   :  { %7126 = vmatpush1.bf16.msra.mxu1 %v10965_v18  ;;  %v11032_v18 = vld [vmem:[%s14610_s6 + $0x38] sm:$0xff]  }
 0x68f   :  { %7127 = vmatprep.subr.bf16.mxu1 %v10970_v5 }
 0x692   :  { %7128 = vmatpush1.bf16.msra.mxu1 %v10968_v42 }
 0x693   :  { %7129 = vmatprep.subr.bf16.mxu1 %v10973_v38 }
 0x696   :  { %7130 = vmatpush1.bf16.msra.mxu1 %v10971_v39 }
 0x697   :  { %7131 = vmatprep.subr.bf16.mxu1 %v10976_v59  ;;  %v11033_v59 = vld [vmem:[%s14610_s6 + $0xc0] sm:$0xff]  }
 0x69a   :  { %7132 = vmatpush1.bf16.msra.mxu1 %v10974_v44 }
 0x69b   :  { %7133 = vmatprep.subr.bf16.mxu1 %v10979_v7 }
 0x69e   :  { %7134 = vmatpush1.bf16.msra.mxu1 %v10977_v45  ;;  %v11034_v45 = vld [vmem:[%s14610_s6 + $0x80] sm:$0xff]  }
 0x69f   :  { %7135 = vmatprep.subr.bf16.mxu1 %v10982_v52 }
 0x6a2   :  { %7136 = vmatpush1.bf16.msra.mxu1 %v10980_v62  ;;  %v11035_v62 = vld [vmem:[%s14610_s6 + $0xc8] sm:$0xff]  }
 0x6a3   :  { %7137 = vmatprep.subr.bf16.mxu1 %v10985_v46  ;;  %v11036_v46 = vld [vmem:[%s14610_s6 + $0x88] sm:$0xff]  }
 0x6a6   :  { %7138 = vmatpush1.bf16.msra.mxu1 %v10983_v47  ;;  %v11037_v47 = vld [vmem:[%s14610_s6 + $0xd0] sm:$0xff]  }
 0x6a7   :  { %7139 = vmatprep.subr.bf16.mxu1 %v10988_v48  ;;  %v11038_v48 = vld [vmem:[%s14610_s6 + $0x90] sm:$0xff]  }
 0x6aa   :  { %7140 = vmatpush1.bf16.msra.mxu1 %v10986_v49  ;;  %v11039_v49 = vld [vmem:[%s14610_s6 + $0xd8] sm:$0xff]  }
 0x6ab   :  { %7141 = vmatprep.subr.bf16.mxu1 %v10991_v1  ;;  %v11040_v1 = vld [vmem:[%s14610_s6 + $0x98] sm:$0xff]  }
 0x6ae   :  { %7142 = vmatpush1.bf16.msra.mxu1 %v10989_v53  ;;  %v11041_v53 = vld [vmem:[%s14610_s6 + $0xe0] sm:$0xff]  }
 0x6af   :  { %7143 = vmatprep.subr.bf16.mxu1 %v10994_v54  ;;  %v11042_v54 = vld [vmem:[%s14610_s6 + $0xa0] sm:$0xff]  }
 0x6b2   :  { %7144 = vmatpush1.bf16.msra.mxu1 %v10992_v55  ;;  %v11043_v55 = vld [vmem:[%s14610_s6 + $0xe8] sm:$0xff]  }
 0x6b3   :  { %7145 = vmatprep.subr.bf16.mxu1 %v10997_v56  ;;  %v11044_v56 = vld [vmem:[%s14610_s6 + $0xa8] sm:$0xff]  }
 0x6b6   :  { %7146 = vmatpush1.bf16.msra.mxu1 %v10995_v0  ;;  %v11045_v0 = vld [vmem:[%s14610_s6 + $0xf0] sm:$0xff]  }
 0x6b7   :  { %7147 = vmatprep.subr.bf16.mxu1 %v11000_v40  ;;  %v11046_v40 = vld [vmem:[%s14610_s6 + $0xb0] sm:$0xff]  }
 0x6ba   :  { %7148 = vmatpush1.bf16.msra.mxu1 %v10998_v43  ;;  %v11047_v43 = vld [vmem:[%s14610_s6 + $0xf8] sm:$0xff]  }
 0x6bb   :  { %9646 = vmatprep.subr.bf16.mxu1 %v11003_v24  ;;  %v11048_v24 = vld [vmem:[%s14610_s6 + $0xb8] sm:$0xff]  }
 0x6bd   :  { %7150 = vmatmul.mubr.bf16.vlgmr.msra.gmra.mrb[32].mxu1 %v13882_v3  ;;  %v11015_v3 = vld [vmem:[%s14610_s6 + $0x58] sm:$0xff]  }
 0x6be   :  { %9647 = vmatpush3.bf16.msra.mxu1 %v11004_v4  ;;  %v14337_v4 = vld [vmem:[%s14611_s8 + $0x4] ss:$40 sps:$4 sm:$0xff]  }
 0x6bf   :  { %9648 = vmatprep.subr.bf16.mxu1 %v11007_v8  ;;  %v14342_v8 = vld [vmem:[%s14611_s8 + $0x10] ss:$40 sps:$4 sm:$0xff]  }
 0x6c2   :  { %9649 = vmatpush3.bf16.msra.mxu1 %v11008_v17  ;;  %v14347_v17 = vld [vmem:[%s14611_s8 + $0x14] ss:$40 sps:$4 sm:$0xff]  }
 0x6c3   :  { %9650 = vmatprep.subr.bf16.mxu1 %v11011_v9  ;;  %8143 = vmatprep.subr.bf16.mxu0 %v14347_v17  ;;  %v14354_v9 = vld [vmem:[%s14611_s8 + $0x60] ss:$40 sps:$4 sm:$0xff]  }
 0x6c6   :  { %9651 = vmatpush3.bf16.msra.mxu1 %v11012_v10  ;;  %v14360_v10 = vld [vmem:[%s14611_s8 + $0x64] ss:$40 sps:$4 sm:$0xff]  }
 0x6c7   :  { %9652 = vmatprep.subr.bf16.mxu1 %v11015_v3  ;;  %v5453_v3 = vrot.slane %v14257_v12, %v11406_v51  ;;  %v14371_v51 = vld [vmem:[%s14611_s8] ss:$40 sps:$4 sm:$0xff]  }
 0x6ca   :  { %9653 = vmatpush3.bf16.msra.mxu1 %v11016_v6  ;;  %v5457_v6 = vrot.slane %v14257_v12, %v11318_v61  ;;  %v14376_v61 = vld [vmem:[%s14611_s8 + $0x54] ss:$40 sps:$4 sm:$0xff]   ;;  %v14382_v12 = vld [vmem:[%s14611_s8 + $0x50] ss:$40 sps:$4 sm:$0xff]  }
 0x6cb   :  { %9654 = vmatprep.subr.bf16.mxu1 %v11019_v32 }
 0x6ce   :  { %9655 = vmatpush3.bf16.msra.mxu1 %v11020_v11 }
 0x6cf   :  { %9656 = vmatprep.subr.bf16.mxu1 %v11023_v13 }
 0x6d0   :  { %v7028_v58 = vpop.f32.mrb[28].mxu1  ;;  %v7274_v22 = vpop.f32.mrb[20].mxu0 }
 0x6d1   :  { %v9720_v23 = vadd.f32 %v7028_v58, %v5445_v14  ;;  %v9724_v36 = vadd.f32 %v7274_v22, %v5461_v15  ;;  %v7030_v33 = vpop.f32.mrb[29].mxu1  ;;  %v7276_v34 = vpop.f32.mrb[21].mxu0 }
 0x6d2   :  { %v9721_v41 = vadd.f32 %v7030_v33, %v5449_v16  ;;  %v9725_v60 = vadd.f32 %v7276_v34, %v5465_v19  ;;  %9657 = vmatpush3.bf16.msra.mxu1 %v11024_v20  ;;  %v7032_v25 = vpop.f32.mrb[30].mxu1  ;;  %v7278_v50 = vpop.f32.mrb[22].mxu0 }
 0x6d3   :  { %v7287_v27 = vmul.f32 0.01, %v9720_v23  ;;  %vm7285_vm10 = vcmp.gt.f32.partialorder %v9724_v36, 0.0  ;;  %v7291_v28 = vmul.f32 0.01, %v9724_v36  ;;  %9658 = vmatprep.subr.bf16.mxu1 %v11027_v21  ;;  %vm7281_vm13 = vcmp.gt.f32.partialorder %v9720_v23, 0.0 }
 0x6d4   :  { %vm7282_vm11 = vcmp.gt.f32.partialorder %v9721_v41, 0.0  ;;  %v7288_v30 = vmul.f32 0.01, %v9721_v41  ;;  %vm7286_vm12 = vcmp.gt.f32.partialorder %v9725_v60, 0.0  ;;  %v7292_v35 = vmul.f32 0.01, %v9725_v60 }
 0x6d5   :  { %v7297_v31 = vsel %vm7285_vm10, %v9724_v36, %v7291_v28  ;;  %v7033_v63 = vpop.f32.mrb[31].mxu1  ;;  %v7279_v37 = vpop.f32.mrb[23].mxu0  ;;  %v7293_v44 = vsel %vm7281_vm13, %v9720_v23, %v7287_v27 }
 0x6d6   :  { %9659 = vmatpush3.bf16.msra.mxu1 %v11028_v26  ;;  %v7294_v5 = vsel %vm7282_vm11, %v9721_v41, %v7288_v30  ;;  %v7298_v42 = vsel %vm7286_vm12, %v9725_v60, %v7292_v35  ;;  %v7303_v7 = vpack.c.bf16 %v7297_v31, %v7297_v31  ;;  %v7299_v52 = vpack.c.bf16 %v7293_v44, %v7293_v44  ;;  %v14395_v30 = vld [vmem:[%s14611_s8 + $0xb4] ss:$40 sps:$4 sm:$0xff]   ;;  %v14400_v35 = vld [vmem:[%s14611_s8 + $0xa0] ss:$40 sps:$4 sm:$0xff]   ;;  %v14405_v31 = vld [vmem:[%s14611_s8 + $0xb0] ss:$40 sps:$4 sm:$0xff]  }
 0x6d7   :  { %9660 = vmatprep.subr.bf16.mxu1 %v11031_v29  ;;  %v7300_v38 = vpack.c.bf16 %v7294_v5, %v7294_v5  ;;  %v7304_v39 = vpack.c.bf16 %v7298_v42, %v7298_v42  ;;  %v14390_v29 = vld [vmem:[%s14611_s8 + $0xa4] ss:$40 sps:$4 sm:$0xff]   ;;  %v14414_v63 = vld [vmem:[%s14611_s8 + $0xf4] ss:$40 sps:$4 sm:$0xff]   ;;  %v14429_v5 = vld [vmem:[%s14611_s8 + $0x100] ss:$40 sps:$4 sm:$0xff]  }
 0x6d8   :  { %v14419_v37 = vld [vmem:[%s14611_s8 + $0x104] ss:$40 sps:$4 sm:$0xff]  }
 0x6d9   :  { %7728 = vmatprep.mubr.bf16.mxu1 %v7300_v38  ;;  %7808 = vmatprep.mubr.bf16.mxu0 %v7304_v39  ;;  %v11075_v42 = vld [vmem:[%s14611_s8 + $0xc] ss:$40 sps:$4 sm:$0xff]   ;;  %v9542_v39 = vld [vmem:[%s14606_s7 + $0x1e] ss:$0 sm:$0xff] }
 0x6da   :  { %9661 = vmatpush3.bf16.msra.mxu1 %v11032_v18  ;;  %7809 = vmatmul.mubr.bf16.vlgmr.msra.gmra.mrb[24].mxu0 %v7303_v7  ;;  %v14424_v18 = vld [vmem:[%s14611_s8 + $0xf0] ss:$40 sps:$4 sm:$0xff]   ;;  %v14441_v38 = vld [vmem:[%s14611_s8 + $0x24] ss:$40 sps:$4 sm:$0xff]  }
 0x6db   :  { %9668 = vmatprep.subr.bf16.mxu1 %v11033_v59  ;;  %8175 = vmatprep.mubr.bf16.mxu0 %v11109_v2 }
 0x6dc   :  { %8144 = vmatpush1.bf16.msra.mxu0 %v14342_v8 }
 0x6dd   :  { %7729 = vmatmul.mubr.bf16.vlgmr.msra.gmra.mrb[36].mxu1 %v7299_v52  ;;  %8145 = vmatprep.subr.bf16.mxu0 %v14360_v10 }
 0x6de   :  { %9669 = vmatpush3.bf16.msra.mxu1 %v11034_v45 }
 0x6df   :  { %9670 = vmatprep.subr.bf16.mxu1 %v11035_v62 }
 0x6e0   :  { %8146 = vmatpush1.bf16.msra.mxu0 %v14354_v9 }
 0x6e1   :  { %8147 = vmatprep.subr.bf16.mxu0 %v14395_v30 }
 0x6e2   :  { %9671 = vmatpush3.bf16.msra.mxu1 %v11036_v46 }
 0x6e3   :  { %9672 = vmatprep.subr.bf16.mxu1 %v11037_v47 }
 0x6e4   :  { %8148 = vmatpush1.bf16.msra.mxu0 %v14405_v31 }
 0x6e5   :  { %8149 = vmatprep.subr.bf16.mxu0 %v14419_v37 }
 0x6e6   :  { %9673 = vmatpush3.bf16.msra.mxu1 %v11038_v48  ;;  %v11073_v48 = vld [vmem:[%s14611_s8 + $0x8] ss:$40 sps:$4 sm:$0xff]  }
 0x6e7   :  { %9674 = vmatprep.subr.bf16.mxu1 %v11039_v49  ;;  %v14453_v49 = vld [vmem:[%s14611_s8 + $0x20] ss:$40 sps:$4 sm:$0xff]  }
 0x6e8   :  { %8150 = vmatpush1.bf16.msra.mxu0 %v14429_v5 }
 0x6e9   :  { %8225 = vmatprep.subr.bf16.mxu0 %v14441_v38 }
 0x6ea   :  { %9675 = vmatpush3.bf16.msra.mxu1 %v11040_v1 }
 0x6eb   :  { %9676 = vmatprep.subr.bf16.mxu1 %v11041_v53  ;;  %v11081_v53 = vld [vmem:[%s14611_s8 + $0x5c] ss:$40 sps:$4 sm:$0xff]  }
 0x6ee   :  { %9677 = vmatpush3.bf16.msra.mxu1 %v11042_v54  ;;  %v14463_v54 = vld [vmem:[%s14611_s8 + $0x74] ss:$40 sps:$4 sm:$0xff]  }
 0x6ef   :  { %9678 = vmatprep.subr.bf16.mxu1 %v11043_v55  ;;  %v11079_v55 = vld [vmem:[%s14611_s8 + $0x58] ss:$40 sps:$4 sm:$0xff]  }
 0x6f2   :  { %9679 = vmatpush3.bf16.msra.mxu1 %v11044_v56  ;;  %v14476_v56 = vld [vmem:[%s14611_s8 + $0x70] ss:$40 sps:$4 sm:$0xff]  }
 0x6f3   :  { %9680 = vmatprep.subr.bf16.mxu1 %v11045_v0  ;;  %v11087_v0 = vld [vmem:[%s14611_s8 + $0xac] ss:$40 sps:$4 sm:$0xff]  }
 0x6f6   :  { %9681 = vmatpush3.bf16.msra.mxu1 %v11046_v40  ;;  %v14485_v40 = vld [vmem:[%s14611_s8 + $0xc4] ss:$40 sps:$4 sm:$0xff]  }
 0x6f7   :  { %9682 = vmatprep.subr.bf16.mxu1 %v11047_v43  ;;  %v11085_v43 = vld [vmem:[%s14611_s8 + $0xa8] ss:$40 sps:$4 sm:$0xff]  }
 0x6fa   :  { %9683 = vmatpush3.bf16.msra.mxu1 %v11048_v24  ;;  %v14497_v24 = vld [vmem:[%s14611_s8 + $0xc0] ss:$40 sps:$4 sm:$0xff]  }
 0x6fb   :  { %8061 = vmatprep.subr.bf16.mxu1 %v14337_v4 }
 0x790   :  { %v7151_v32 = vpop.f32.mrb[32].mxu1 }
 0x791   :  { %v9722_v11 = vadd.f32 %v7151_v32, %v5453_v3  ;;  %v7153_v13 = vpop.f32.mrb[33].mxu1  ;;  %v11093_v3 = vld [vmem:[%s14611_s8 + $0xfc] ss:$40 sps:$4 sm:$0xff]   ;;  %v11091_v32 = vld [vmem:[%s14611_s8 + $0xf8] ss:$40 sps:$4 sm:$0xff]  }
 0x792   :  { %v9723_v14 = vadd.f32 %v7153_v13, %v5457_v6  ;;  %v7155_v15 = vpop.f32.mrb[34].mxu1  ;;  %v14506_v6 = vld [vmem:[%s14611_s8 + $0x114] ss:$40 sps:$4 sm:$0xff]  }
 0x793   :  { %vm7283_vm14 = vcmp.gt.f32.partialorder %v9722_v11, 0.0  ;;  %v7289_v16 = vmul.f32 0.01, %v9722_v11  ;;  %v7156_v19 = vpop.f32.mrb[35].mxu1  ;;  %v11099_v13 = vld [vmem:[%s14611_s8 + $0x1c] ss:$40 sps:$4 sm:$0xff]  }
 0x794   :  { %vm7284_vm15 = vcmp.gt.f32.partialorder %v9723_v14, 0.0  ;;  %v7290_v20 = vmul.f32 0.01, %v9723_v14  ;;  %v11102_v15 = vld [vmem:[%s14611_s8 + $0x6c] ss:$40 sps:$4 sm:$0xff]  }
 0x795   :  { %v7295_v21 = vsel %vm7283_vm14, %v9722_v11, %v7289_v16  ;;  %v14515_v11 = vld [vmem:[%s14611_s8 + $0x110] ss:$40 sps:$4 sm:$0xff]   ;;  %v11105_v19 = vld [vmem:[%s14611_s8 + $0xbc] ss:$40 sps:$4 sm:$0xff]  }
 0x796   :  { %v7296_v58 = vsel %vm7284_vm15, %v9723_v14, %v7290_v20  ;;  %v7301_v23 = vpack.c.bf16 %v7295_v21, %v7295_v21  ;;  %v11097_v14 = vld [vmem:[%s14611_s8 + $0x18] ss:$40 sps:$4 sm:$0xff]   ;;  %v11100_v16 = vld [vmem:[%s14611_s8 + $0x68] ss:$40 sps:$4 sm:$0xff]   ;;  %v11108_v21 = vld [vmem:[%s14611_s8 + $0x10c] ss:$40 sps:$4 sm:$0xff]  }
 0x797   :  { %v7302_v22 = vpack.c.bf16 %v7296_v58, %v7296_v58  ;;  %v11103_v20 = vld [vmem:[%s14611_s8 + $0xb8] ss:$40 sps:$4 sm:$0xff]   ;;  %v11106_v58 = vld [vmem:[%s14611_s8 + $0x108] ss:$40 sps:$4 sm:$0xff]  }
 0x799   :  { %7768 = vmatprep.mubr.bf16.mxu1 %v7302_v22 }
 0x79a   :  { %7769 = vmatmul.mubr.bf16.vlgmr.msra.gmra.mrb[40].mxu1 %v7301_v23 }
 0x79b   :  { %8062 = vmatpush1.bf16.msra.mxu1 %v14371_v51  ;;  %8093 = vmatprep.mubr.bf16.mxu1 %v11109_v2 }
 0x79c   :  { %8063 = vmatprep.subr.bf16.mxu1 %v14376_v61 }
 0x79f   :  { %8064 = vmatpush1.bf16.msra.mxu1 %v14382_v12 }
 0x7a0   :  { %8065 = vmatprep.subr.bf16.mxu1 %v14390_v29 }
 0x7a3   :  { %8066 = vmatpush1.bf16.msra.mxu1 %v14400_v35 }
 0x7a4   :  { %8067 = vmatprep.subr.bf16.mxu1 %v14414_v63 }
 0x7a7   :  { %8068 = vmatpush1.bf16.msra.mxu1 %v14424_v18 }
 0x7a8   :  { %8102 = vmatprep.subr.bf16.mxu1 %v11075_v42 }
 0x7ad   :  { %v9706_v36 = vpop.f32.mrb[24].mxu0 }
 0x7ae   :  { %v9707_v33 = vpop.f32.mrb[25].mxu0 }
 0x7af   :  { %v9708_v34 = vadd.f32 %v9707_v33, %v9706_v36  ;;  %v9709_v41 = vpop.f32.mrb[26].mxu0  ;;  %v11111_v36 = vmov 1983009808  }
 0x7b0   :  { %v9662_v60 = vpop.f32.mrb[36].mxu1  ;;  %v9710_v25 = vpop.f32.mrb[27].mxu0  ;;  %v8279_v33 = vunpack.c.l.s4 %v11111_v36 }
 0x7b1   :  { %v9663_v50 = vpop.f32.mrb[37].mxu1 }
 0x7b2   :  { %v9664_v26 = vadd.f32 %v9663_v50, %v9662_v60  ;;  %v9665_v27 = vpop.f32.mrb[38].mxu1 }
 0x7b3   :  { %v9666_v28 = vpop.f32.mrb[39].mxu1 }
 0x7b4   :  { %v7731_v7 = vadd.f32 %v9664_v26, %v9542_v39 }
 0x86d   :  { %v9684_v59 = vpop.f32.mrb[40].mxu1 }
 0x86e   :  { %v9685_v44 = vpop.f32.mrb[41].mxu1 }
 0x86f   :  { %v9686_v45 = vadd.f32 %v9685_v44, %v9684_v59  ;;  %v9687_v52 = vpop.f32.mrb[42].mxu1 }
 0x870   :  { %v9688_v62 = vpop.f32.mrb[43].mxu1 }
 0x871   :  { %v7771_v46 = vadd.f32 %v9686_v45, %v7731_v7 }
 0x873   :  { %v7811_v47 = vadd.f32 %v9708_v34, %v7771_v46  ;;  %v8280_v34 = vunpack.c.0.s8 %v8279_v33 }
 0x875   :  { %v14455_v1 = vpack.c.bf16 %v7811_v47, %v7811_v47  ;;  %v8283_v41 = vsub.s32 %v8280_v34, %v11304_v57 }
 0x877   :  { %9631 = vmatmul.mubr.msk.bf16.vlgmr.msra.gmra.mrb[44].mxu1 %vm8057_vm0, %v14455_v1  ;;  %9633 = vmatmul.mubr.msk.bf16.vlgmr.msra.gmra.mrb[28].mxu0 %vm8057_vm0, %v14455_v1 }
 0x878   :  { %8103 = vmatpush1.bf16.msra.mxu1 %v11073_v48  ;;  %8226 = vmatpush1.bf16.msra.mxu0 %v14453_v49 }
 0x879   :  { %8325 = vrot.lane.b32.xlu0 %v14455_v1, %s11110_s0  ;;  %8104 = vmatprep.subr.bf16.mxu1 %v11081_v53 }
 0x87a   :  { %8227 = vmatprep.subr.bf16.mxu0 %v14463_v54  ;;  %8134 = vmatprep.mubr.bf16.mxu1 %v11109_v2 }
 0x87b   :  { %8257 = vmatprep.mubr.bf16.mxu0 %v11109_v2 }
 0x87c   :  { %8105 = vmatpush1.bf16.msra.mxu1 %v11079_v55  ;;  %8228 = vmatpush1.bf16.msra.mxu0 %v14476_v56 }
 0x87d   :  { %8106 = vmatprep.subr.bf16.mxu1 %v11087_v0  ;;  %8229 = vmatprep.subr.bf16.mxu0 %v14485_v40 }
 0x880   :  { %8107 = vmatpush1.bf16.msra.mxu1 %v11085_v43  ;;  %8230 = vmatpush1.bf16.msra.mxu0 %v14497_v24 }
 0x881   :  { %8108 = vmatprep.subr.bf16.mxu1 %v11093_v3  ;;  %8231 = vmatprep.subr.bf16.mxu0 %v14506_v6 }
 0x884   :  { %8109 = vmatpush1.bf16.msra.mxu1 %v11091_v32  ;;  %8232 = vmatpush1.bf16.msra.mxu0 %v14515_v11 }
 0x885   :  { %8184 = vmatprep.subr.bf16.mxu1 %v11099_v13  ;;  %8371 = vmatprep.subr.bf16.mxu0 %v11075_v42 }
 0x887   :  { %9632 = vmatmul.mubr.msk.bf16.vlgmr.msra.gmra.mrb[48].mxu1 %vm8057_vm0, %v14455_v1  ;;  %9635 = vmatmul.mubr.msk.bf16.vlgmr.msra.gmra.mrb[32].mxu0 %vm8057_vm0, %v14455_v1 }
 0x888   :  { %8185 = vmatpush1.bf16.msra.mxu1 %v11097_v14  ;;  %8216 = vmatprep.mubr.bf16.mxu1 %v11109_v2 }
 0x889   :  { %8186 = vmatprep.subr.bf16.mxu1 %v11102_v15  ;;  %8372 = vmatpush1.bf16.msra.mxu0 %v11073_v48 }
 0x88a   :  { %8373 = vmatprep.subr.bf16.mxu0 %v11081_v53  ;;  %8403 = vmatprep.mubr.bf16.mxu0 %v11109_v2 }
 0x88c   :  { %8187 = vmatpush1.bf16.msra.mxu1 %v11100_v16 }
 0x88d   :  { %8188 = vmatprep.subr.bf16.mxu1 %v11105_v19  ;;  %8374 = vmatpush1.bf16.msra.mxu0 %v11079_v55 }
 0x88e   :  { %8375 = vmatprep.subr.bf16.mxu0 %v11087_v0 }
 0x890   :  { %8189 = vmatpush1.bf16.msra.mxu1 %v11103_v20 }
 0x891   :  { %8190 = vmatprep.subr.bf16.mxu1 %v11108_v21  ;;  %8376 = vmatpush1.bf16.msra.mxu0 %v11085_v43 }
 0x892   :  { %8377 = vmatprep.subr.bf16.mxu0 %v11093_v3 }
 0x894   :  { %8191 = vmatpush1.bf16.msra.mxu1 %v11106_v58 }
 0x895   :  { %8330 = vmatprep.subr.bf16.mxu1 %v14337_v4  ;;  %8378 = vmatpush1.bf16.msra.mxu0 %v11091_v32 }
 0x896   :  { %8453 = vmatprep.subr.bf16.mxu0 %v11099_v13 }
 0x897   :  { %9634 = vmatmul.mubr.msk.bf16.vlgmr.msra.gmra.mrb[52].mxu1 %vm8057_vm0, %v14455_v1 }
 0x898   :  { %8331 = vmatpush1.bf16.msra.mxu1 %v14371_v51  ;;  %8362 = vmatprep.mubr.bf16.mxu1 %v11109_v2 }
 0x899   :  { %8332 = vmatprep.subr.bf16.mxu1 %v14376_v61 }
 0x89c   :  { %8333 = vmatpush1.bf16.msra.mxu1 %v14382_v12 }
 0x89d   :  { %8334 = vmatprep.subr.bf16.mxu1 %v14390_v29 }
 0x8a0   :  { %8335 = vmatpush1.bf16.msra.mxu1 %v14400_v35 }
 0x8a1   :  { %8336 = vmatprep.subr.bf16.mxu1 %v14414_v63 }
 0x8a4   :  { %8337 = vmatpush1.bf16.msra.mxu1 %v14424_v18 }
 0x8a5   :  { %8412 = vmatprep.subr.bf16.mxu1 %v14347_v17 }
 0x8eb   :  { %v8326_v4 = vpop.permute.xlu0 %8325 }
 0x8ec   :  { %9637 = vmatmul.mubr.msk.bf16.vlgmr.msra.gmra.mrb[56].mxu1 %vm8057_vm0, %v8326_v4  ;;  %9638 = vmatmul.mubr.msk.bf16.vlgmr.msra.gmra.mrb[36].mxu0 %vm8057_vm0, %v8326_v4 }
 0x8ed   :  { %8413 = vmatpush1.bf16.msra.mxu1 %v14342_v8  ;;  %8454 = vmatpush1.bf16.msra.mxu0 %v11097_v14 }
 0x8ee   :  { %8414 = vmatprep.subr.bf16.mxu1 %v14360_v10  ;;  %8455 = vmatprep.subr.bf16.mxu0 %v11102_v15 }
 0x8ef   :  { %8444 = vmatprep.mubr.bf16.mxu1 %v11109_v2  ;;  %8485 = vmatprep.mubr.bf16.mxu0 %v11109_v2 }
 0x8f1   :  { %8415 = vmatpush1.bf16.msra.mxu1 %v14354_v9  ;;  %8456 = vmatpush1.bf16.msra.mxu0 %v11100_v16 }
 0x8f2   :  { %8416 = vmatprep.subr.bf16.mxu1 %v14395_v30  ;;  %8457 = vmatprep.subr.bf16.mxu0 %v11105_v19 }
 0x8f5   :  { %8417 = vmatpush1.bf16.msra.mxu1 %v14405_v31  ;;  %8458 = vmatpush1.bf16.msra.mxu0 %v11103_v20 }
 0x8f6   :  { %8418 = vmatprep.subr.bf16.mxu1 %v14419_v37  ;;  %8459 = vmatprep.subr.bf16.mxu0 %v11108_v21 }
 0x8f9   :  { %8419 = vmatpush1.bf16.msra.mxu1 %v14429_v5  ;;  %8460 = vmatpush1.bf16.msra.mxu0 %v11106_v58 }
 0x8fa   :  { %8494 = vmatprep.subr.bf16.mxu1 %v14441_v38 }
 0x8fc   :  { %9639 = vmatmul.mubr.msk.bf16.vlgmr.msra.gmra.mrb[60].mxu1 %vm8057_vm0, %v8326_v4  ;;  %9640 = vmatmul.mubr.msk.bf16.vlgmr.msra.gmra.mrb[40].mxu0 %vm8057_vm0, %v8326_v4 }
 0x8fd   :  { %8495 = vmatpush1.bf16.msra.mxu1 %v14453_v49  ;;  %8526 = vmatprep.mubr.bf16.mxu1 %v11109_v2 }
 0x8fe   :  { %8496 = vmatprep.subr.bf16.mxu1 %v14463_v54 }
 0x901   :  { %8497 = vmatpush1.bf16.msra.mxu1 %v14476_v56 }
 0x902   :  { %8498 = vmatprep.subr.bf16.mxu1 %v14485_v40 }
 0x905   :  { %8499 = vmatpush1.bf16.msra.mxu1 %v14497_v24 }
 0x906   :  { %8500 = vmatprep.subr.bf16.mxu1 %v14506_v6 }
 0x909   :  { %8501 = vmatpush1.bf16.msra.mxu1 %v14515_v11 }
 0x90c   :  { %9641 = vmatmul.mubr.msk.bf16.vlgmr.msra.gmra.mrb[64].mxu1 %vm8057_vm0, %v8326_v4 }
 0x94a   :  { %v8095_v8 = vpop.f32.mrb[44].mxu1  ;;  %v8177_v17 = vpop.f32.mrb[28].mxu0 }
 0x94b   :  { %v8097_v9 = vpop.f32.mrb[45].mxu1  ;;  %v8179_v10 = vpop.f32.mrb[29].mxu0 }
 0x94c   :  { %v8276_v22 = vcombine.low %v8095_v8, %v8097_v9  ;;  %v8293_v2 = vcombine.low %v8177_v17, %v8179_v10  ;;  %v8099_v51 = vpop.f32.mrb[46].mxu1  ;;  %v8181_v23 = vpop.f32.mrb[30].mxu0 }
 0x94d   :  { %v8100_v61 = vpop.f32.mrb[47].mxu1  ;;  %v8182_v12 = vpop.f32.mrb[31].mxu0 }
 0x94e   :  { %v8284_v63 = vrot.slane %v8276_v22, %v8283_v41  ;;  %v8301_v59 = vrot.slane %v8293_v2, %v8283_v41 }
 0x95a   :  { %v8136_v60 = vpop.f32.mrb[48].mxu1  ;;  %v8259_v25 = vpop.f32.mrb[32].mxu0 }
 0x95b   :  { %v8138_v50 = vpop.f32.mrb[49].mxu1  ;;  %v8261_v26 = vpop.f32.mrb[33].mxu0 }
 0x95c   :  { %v8277_v27 = vcombine.low %v8136_v60, %v8138_v50  ;;  %v8310_v28 = vcombine.low %v8259_v25, %v8261_v26  ;;  %v8140_v29 = vpop.f32.mrb[50].mxu1  ;;  %v8263_v30 = vpop.f32.mrb[34].mxu0 }
 0x95d   :  { %v8141_v35 = vpop.f32.mrb[51].mxu1  ;;  %v8264_v31 = vpop.f32.mrb[35].mxu0 }
 0x95e   :  { %v8291_v37 = vrot.slane %v8277_v27, %v8283_v41  ;;  %9636 = vst.sshfl [vmem:[%s14612_s9 + $0x10] sm:$0x33 pattern:$0x76325410] %v8310_v28 }
 0x960   :  { %v8292_v18 = vcombine.low %v8284_v63, %v8291_v37 }
 0x962   :  { %8321 = vst [vmem:[%s14612_s9] sm:$0xff] %v8292_v18 }
 0x96a   :  { %v8218_v57 = vpop.f32.mrb[52].mxu1 }
 0x96b   :  { %v8220_v5 = vpop.f32.mrb[53].mxu1 }
 0x96c   :  { %v8294_v42 = vcombine.low %v8218_v57, %v8220_v5  ;;  %v8222_v38 = vpop.f32.mrb[54].mxu1 }
 0x96d   :  { %v8223_v39 = vpop.f32.mrb[55].mxu1 }
 0x96e   :  { %v8308_v44 = vrot.slane %v8294_v42, %v8283_v41 }
 0x970   :  { %v8309_v7 = vcombine.low %v8301_v59, %v8308_v44 }
 0x972   :  { %8322 = vst [vmem:[%s14612_s9 + $0x8] sm:$0xff] %v8309_v7 }
 0x9bf   :  { %v8364_v45 = vpop.f32.mrb[56].mxu1  ;;  %v8405_v52 = vpop.f32.mrb[36].mxu0 }
 0x9c0   :  { %v8366_v62 = vpop.f32.mrb[57].mxu1  ;;  %v8407_v46 = vpop.f32.mrb[37].mxu0 }
 0x9c1   :  { %v8545_v47 = vcombine.low %v8364_v45, %v8366_v62  ;;  %v8546_v48 = vcombine.low %v8405_v52, %v8407_v46  ;;  %v8368_v49 = vpop.f32.mrb[58].mxu1  ;;  %v8409_v1 = vpop.f32.mrb[38].mxu0 }
 0x9c2   :  { %v8369_v53 = vpop.f32.mrb[59].mxu1  ;;  %v8410_v54 = vpop.f32.mrb[39].mxu0 }
 0x9c3   :  { %v8553_v55 = vrot.slane %v8545_v47, %v8283_v41  ;;  %v8560_v56 = vrot.slane %v8546_v48, %v8283_v41 }
 0x9c5   :  { %v8561_v0 = vcombine.low %v8553_v55, %v8560_v56 }
 0x9c7   :  { %9642 = vst [vmem:[%s14612_s9 + $0x14] sm:$0xff] %v8561_v0 }
 0x9cf   :  { %v8446_v40 = vpop.f32.mrb[60].mxu1  ;;  %v8487_v43 = vpop.f32.mrb[40].mxu0 }
 0x9d0   :  { %v8448_v24 = vpop.f32.mrb[61].mxu1  ;;  %v8489_v3 = vpop.f32.mrb[41].mxu0 }
 0x9d1   :  { %v8562_v6 = vcombine.low %v8446_v40, %v8448_v24  ;;  %v8563_v32 = vcombine.low %v8487_v43, %v8489_v3  ;;  %v8450_v11 = vpop.f32.mrb[62].mxu1  ;;  %v8491_v13 = vpop.f32.mrb[42].mxu0 }
 0x9d2   :  { %v8451_v14 = vpop.f32.mrb[63].mxu1  ;;  %v8492_v15 = vpop.f32.mrb[43].mxu0 }
 0x9d3   :  { %v8570_v16 = vrot.slane %v8562_v6, %v8283_v41  ;;  %v8577_v19 = vrot.slane %v8563_v32, %v8283_v41 }
 0x9d5   :  { %v8578_v20 = vcombine.low %v8570_v16, %v8577_v19 }
 0x9d7   :  { %9643 = vst [vmem:[%s14612_s9 + $0x1c] sm:$0xff] %v8578_v20 }
 0x9df   :  { %v8528_v21 = vpop.f32.mrb[64].mxu1 }
 0x9e0   :  { %v8530_v58 = vpop.f32.mrb[65].mxu1 }
 0x9e1   :  { %v8579_v4 = vcombine.low %v8528_v21, %v8530_v58  ;;  %v8532_v8 = vpop.f32.mrb[66].mxu1 }
 0x9e2   :  { %v8533_v17 = vpop.f32.mrb[67].mxu1 }
 0x9e3   :  { %9645 = vst.sshfl [vmem:[%s14612_s9 + $0x24] sm:$0x33 pattern:$0x76325410] %v8579_v4 }

</bundles_post_ra>
